<compile_context>
chip_gen: v7x
topology: tpu7x:2x2x1
jax: 0.10.0
libtpu: 0.0.40
codegen_flags: <defaults>
</compile_context>

<pallas_src>
import functools
import numpy as np
import jax
import jax.numpy as jnp
from jax import lax
from jax.experimental import pallas as pl
from jax.experimental.pallas import tpu as pltpu

VMEM = pltpu.MemorySpace.VMEM


def _layernorm(x, w, b, eps=1e-5):
    mu = jnp.mean(x, axis=-1, keepdims=True)
    xc = x - mu
    var = jnp.mean(xc * xc, axis=-1, keepdims=True)
    return xc * lax.rsqrt(var + eps) * w + b


# ---------------------------------------------------------------------------
# Kernel 1: fused dual-stream encoder
#   grid = (n_streams=2,)  ("parallel"); all layers unrolled inside the kernel.
# ---------------------------------------------------------------------------
def _dual_encoder_kernel(mouse_ref, kbd_ref,
                         wp_m_ref, bp_m_ref, wp_k_ref, bp_k_ref,
                         pe_ref, cls_ref,
                         wqkv_ref, bqkv_ref, wo_ref, bo_ref,
                         w1_ref, b1_ref, w2_ref, b2_ref,
                         ln1w_ref, ln1b_ref, ln2w_ref, ln2b_ref,
                         out_ref, x_ref,
                         *, batch, s_mouse, s_kbd, lp_pad, n_heads, n_layers):
    s = pl.program_id(0)          # stream index: 0 = mouse, 1 = keyboard
    B = batch
    Lp = lp_pad                   # padded (seq_len + 1 CLS), multiple of 8
    BL = B * Lp
    E = wo_ref.shape[-1]
    H = n_heads
    Dh = E // H

    # ---- prologue: zero-init, CLS token, input proj + positional encoding ----
    x_ref[...] = jnp.zeros_like(x_ref)                                   # (B, Lp, E)
    x_ref[:, 0:1, :] = jnp.broadcast_to(cls_ref[...].reshape(1, 1, E), (B, 1, E))

    def project(seq_ref, wp_ref, bp_ref, S):
        din = seq_ref.shape[-1]
        xin = seq_ref[...].reshape(B * S, din).astype(jnp.bfloat16)
        y = jnp.dot(xin, wp_ref[...],
                    preferred_element_type=jnp.float32) + bp_ref[...]    # (B*S, E)
        pe = pe_ref[0:S, :]                                              # (S, E)
        for b in range(B):
            x_ref[b, 1:S + 1, :] = y[b * S:(b + 1) * S, :] + pe

    @pl.when(s == 0)
    def _():
        project(mouse_ref, wp_m_ref, bp_m_ref, s_mouse)

    @pl.when(s == 1)
    def _():
        project(kbd_ref, wp_k_ref, bp_k_ref, s_kbd)

    # ---- hoisted attention constants (shared by all layers) ----
    valid = jnp.where(s == 0, s_mouse + 1, s_kbd + 1)        # valid key count (+CLS)
    key_pos = lax.broadcasted_iota(jnp.int32, (Lp, Lp), 1)
    scale = jnp.float32(1.0 / np.sqrt(Dh))

    x = x_ref[...].reshape(BL, E)                            # f32 activation

    # ---- unrolled transformer layers (post-norm, ReLU FFN) ----
    for l in range(n_layers):
        xb = x.astype(jnp.bfloat16)

        # single fused QKV projection: (BL, E) x (E, 3E)
        qkv = jnp.dot(xb, wqkv_ref[0, l],
                      preferred_element_type=jnp.float32) + bqkv_ref[0, l]
        qkvb = qkv.astype(jnp.bfloat16)

        def heads(base, _qkvb=qkvb):
            return jnp.concatenate(
                [_qkvb[:, base + h * Dh: base + (h + 1) * Dh].reshape(B, Lp, Dh)
                 for h in range(H)], axis=0)                 # (H*B, Lp, Dh)

        q = heads(0)
        k = heads(E)
        v = heads(2 * E)

        scores = jnp.einsum('nld,nmd->nlm', q, k,
                            preferred_element_type=jnp.float32) * scale  # (H*B, Lp, Lp)
        scores = jnp.where(key_pos < valid, scores, jnp.float32(-1e30))
        scores = scores - jnp.max(scores, axis=-1, keepdims=True)
        p = jnp.exp(scores)
        p = p * pl.reciprocal(jnp.sum(p, axis=-1, keepdims=True), approx=True)
        ctx = jnp.einsum('nlm,nmd->nld', p.astype(jnp.bfloat16), v,
                         preferred_element_type=jnp.float32)             # (H*B, Lp, Dh)

        attn = jnp.concatenate(
            [ctx[h * B:(h + 1) * B].reshape(BL, Dh) for h in range(H)], axis=-1)
        attn = jnp.dot(attn.astype(jnp.bfloat16), wo_ref[0, l],
                       preferred_element_type=jnp.float32) + bo_ref[0, l]

        h1 = _layernorm(x + attn, ln1w_ref[0, l], ln1b_ref[0, l])

        ff = jnp.dot(h1.astype(jnp.bfloat16), w1_ref[0, l],
                     preferred_element_type=jnp.float32) + b1_ref[0, l]
        ff = jnp.maximum(ff, 0.0)
        ff = jnp.dot(ff.astype(jnp.bfloat16), w2_ref[0, l],
                     preferred_element_type=jnp.float32) + b2_ref[0, l]
        x = _layernorm(h1 + ff, ln2w_ref[0, l], ln2b_ref[0, l])

    # ---- epilogue: emit the CLS rows ----
    cls_rows = x.reshape(B, Lp, E)[:, 0, :]                               # (B, E)
    out_ref[...] = cls_rows.reshape(1, B, E)


def dual_encoder(mouse_seq, keyboard_seq, p, *, n_heads):
    """Two raw sequences -> (2, B, E) CLS outputs (mouse, keyboard)."""
    B, Sm, _ = mouse_seq.shape
    _, Sk, _ = keyboard_seq.shape
    S = max(Sm, Sk)
    Lp_pad = ((S + 1 + 7) // 8) * 8          # CLS + seq, padded to sublane multiple
    E = p["wo"].shape[-1]
    n_layers = p["wo"].shape[1]
    pe = p["pe"][:S]

    def full_spec(arr):
        return pl.BlockSpec(arr.shape, lambda s, _n=arr.ndim: (0,) * _n)

    def stream_spec(arr):
        return pl.BlockSpec((1,) + arr.shape[1:],
                            lambda s, _n=arr.ndim: (s,) + (0,) * (_n - 1))

    kern = functools.partial(_dual_encoder_kernel,
                             batch=B, s_mouse=Sm, s_kbd=Sk,
                             lp_pad=Lp_pad, n_heads=n_heads, n_layers=n_layers)

    return pl.pallas_call(
        kern,
        grid=(2,),
        in_specs=[
            full_spec(mouse_seq), full_spec(keyboard_seq),
            full_spec(p["wp_m"]), full_spec(p["bp_m"]),
            full_spec(p["wp_k"]), full_spec(p["bp_k"]),
            full_spec(pe), stream_spec(p["cls"]),
            stream_spec(p["wqkv"]), stream_spec(p["bqkv"]),
            stream_spec(p["wo"]), stream_spec(p["bo"]),
            stream_spec(p["w1"]), stream_spec(p["b1"]),
            stream_spec(p["w2"]), stream_spec(p["b2"]),
            stream_spec(p["ln1w"]), stream_spec(p["ln1b"]),
            stream_spec(p["ln2w"]), stream_spec(p["ln2b"]),
        ],
        out_specs=pl.BlockSpec((1, B, E), lambda s: (s, 0, 0)),
        out_shape=jax.ShapeDtypeStruct((2, B, E), jnp.float32),
        scratch_shapes=[pltpu.VMEM((B, Lp_pad, E), jnp.float32)],
        compiler_params=pltpu.CompilerParams(dimension_semantics=("parallel",)),
    )(mouse_seq, keyboard_seq,
      p["wp_m"], p["bp_m"], p["wp_k"], p["bp_k"],
      pe, p["cls"],
      p["wqkv"], p["bqkv"], p["wo"], p["bo"],
      p["w1"], p["b1"], p["w2"], p["b2"],
      p["ln1w"], p["ln1b"], p["ln2w"], p["ln2b"])


# ---------------------------------------------------------------------------
# Kernel 2: fusion MLP (Linear -> ReLU -> Linear) + L2 normalize
#   kept as a separate tiny call so the encoder stream axis can stay "parallel"
#   across the two TensorCores on v7x.
# TODO(synk): on single-TC chips (v5e/v6e) fold this into the encoder epilogue.
# ---------------------------------------------------------------------------
def _fusion_kernel(z_ref, w1a_ref, w1b_ref, b1_ref, w2_ref, b2_ref, o_ref):
    zm = z_ref[0].astype(jnp.bfloat16)          # (B, E) mouse CLS
    zk = z_ref[1].astype(jnp.bfloat16)          # (B, E) keyboard CLS
    h = (jnp.dot(zm, w1a_ref[...], preferred_element_type=jnp.float32)
         + jnp.dot(zk, w1b_ref[...], preferred_element_type=jnp.float32)
         + b1_ref[...])
    h = jnp.maximum(h, 0.0)
    out = jnp.dot(h.astype(jnp.bfloat16), w2_ref[...],
                  preferred_element_type=jnp.float32) + b2_ref[...]
    ss = jnp.sum(out * out, axis=-1, keepdims=True)
    o_ref[...] = out * lax.rsqrt(jnp.maximum(ss, 1e-24))   # F.normalize(p=2, dim=1)


def fusion_forward(z_all, fp):
    B = z_all.shape[1]
    E = fp["w2"].shape[1]
    return pl.pallas_call(
        _fusion_kernel,
        out_shape=jax.ShapeDtypeStruct((B, E), jnp.float32),
        in_specs=[pl.BlockSpec(memory_space=VMEM)] * 6,
        out_specs=pl.BlockSpec(memory_space=VMEM),
    )(z_all, fp["w1a"], fp["w1b"], fp["b1"], fp["w2"], fp["b2"])


# ---------------------------------------------------------------------------
# Parameter construction (deterministic, synthetic) + packing to kernel layout
# ---------------------------------------------------------------------------
def _linear(key, fan_in, fan_out):
    k1, k2 = jax.random.split(key)
    lim = 1.0 / np.sqrt(fan_in)
    w_t = jax.random.uniform(k1, (fan_in, fan_out), jnp.float32, -lim, lim)
    b = jax.random.uniform(k2, (fan_out,), jnp.float32, -lim, lim)
    return w_t, b


def _sinusoidal_pe(max_len, d):
    pos = np.arange(max_len, dtype=np.float32)[:, None]
    div = np.exp(np.arange(0, d, 2, dtype=np.float32) * (-np.log(10000.0) / d))
    pe = np.zeros((max_len, d), dtype=np.float32)
    pe[:, 0::2] = np.sin(pos * div)
    pe[:, 1::2] = np.cos(pos * div)
    return jnp.asarray(pe)


def init_encoder_params(key, input_dim, E, n_layers):
    keys = jax.random.split(key, 1 + 4 * n_layers)
    proj_w, proj_b = _linear(keys[0], input_dim, E)
    layers = []
    for l in range(n_layers):
        k0, k1, k2, k3 = keys[1 + 4 * l: 5 + 4 * l]
        wqkv, bqkv = _linear(k0, E, 3 * E)      # MHA in_proj (pre-transposed, (E, 3E))
        wo, bo = _linear(k1, E, E)              # MHA out_proj
        w1, b1 = _linear(k2, E, 4 * E)          # FFN linear1
        w2, b2 = _linear(k3, 4 * E, E)          # FFN linear2
        layers.append(dict(
            wqkv=wqkv, bqkv=bqkv, wo=wo, bo=bo, w1=w1, b1=b1, w2=w2, b2=b2,
            ln1w=jnp.ones((E,), jnp.float32), ln1b=jnp.zeros((E,), jnp.float32),
            ln2w=jnp.ones((E,), jnp.float32), ln2b=jnp.zeros((E,), jnp.float32)))
    return dict(proj_w=proj_w, proj_b=proj_b,
                cls=jnp.zeros((E,), jnp.float32), layers=layers)


def init_model_params(key, mouse_dim, kbd_dim, E, n_layers, n_heads, max_len):
    del n_heads  # head split is a static lane slice; no repack needed
    k_m, k_k, k_f1, k_f2 = jax.random.split(key, 4)
    enc_m = init_encoder_params(k_m, mouse_dim, E, n_layers)
    enc_k = init_encoder_params(k_k, kbd_dim, E, n_layers)
    encs = [enc_m, enc_k]

    def stack_layers(field, shape, dtype=jnp.float32):
        return jnp.stack([
            jnp.stack([l[field].reshape(shape) for l in e["layers"]]) for e in encs
        ]).astype(dtype)

    p = dict(
        wp_m=enc_m["proj_w"].astype(jnp.bfloat16),
        bp_m=enc_m["proj_b"].reshape(1, E),
        wp_k=enc_k["proj_w"].astype(jnp.bfloat16),
        bp_k=enc_k["proj_b"].reshape(1, E),
        cls=jnp.stack([e["cls"].reshape(1, E) for e in encs]),          # (2, 1, E)
        wqkv=stack_layers("wqkv", (E, 3 * E), jnp.bfloat16),            # (2, nl, E, 3E)
        bqkv=stack_layers("bqkv", (1, 3 * E)),
        wo=stack_layers("wo", (E, E), jnp.bfloat16),
        bo=stack_layers("bo", (1, E)),
        w1=stack_layers("w1", (E, 4 * E), jnp.bfloat16),
        b1=stack_layers("b1", (1, 4 * E)),
        w2=stack_layers("w2", (4 * E, E), jnp.bfloat16),
        b2=stack_layers("b2", (1, E)),
        ln1w=stack_layers("ln1w", (1, E)),
        ln1b=stack_layers("ln1b", (1, E)),
        ln2w=stack_layers("ln2w", (1, E)),
        ln2b=stack_layers("ln2b", (1, E)),
        pe=_sinusoidal_pe(max_len, E),
    )

    w1, b1 = _linear(k_f1, 2 * E, E)            # fusion Linear(2E, E)
    w2, b2 = _linear(k_f2, E, E)                # fusion Linear(E, E)
    p["fusion"] = dict(
        w1a=w1[:E].astype(jnp.bfloat16),        # multiplies z_mouse
        w1b=w1[E:].astype(jnp.bfloat16),        # multiplies z_keyboard
        b1=b1.reshape(1, E),
        w2=w2.astype(jnp.bfloat16),
        b2=b2.reshape(1, E))
    return p


# ---------------------------------------------------------------------------
# Model forward: one encoder call (both streams), one fusion call
# ---------------------------------------------------------------------------
def dual_stream_forward(params, mouse_seq, keyboard_seq, n_heads):
    cls_out = dual_encoder(mouse_seq, keyboard_seq, params, n_heads=n_heads)  # (2, B, E)
    return fusion_forward(cls_out, params["fusion"])                          # (B, E)


# ---------------------------------------------------------------------------
if __name__ == "__main__":
    # small shapes consistent with the module
    batch = 2
    mouse_input_dim = 6
    keyboard_input_dim = 5
    embed_dim = 32
    n_layers = 2
    n_heads = 4
    max_len = 64
    mouse_seq_len = 10
    keyboard_seq_len = 8

    root = jax.random.PRNGKey(0)
    k_params, k_mouse, k_kbd = jax.random.split(root, 3)

    params = init_model_params(k_params, mouse_input_dim, keyboard_input_dim,
                               embed_dim, n_layers, n_heads, max_len)

    mouse_seq = jax.random.normal(
        k_mouse, (batch, mouse_seq_len, mouse_input_dim), jnp.float32)
    keyboard_seq = jax.random.normal(
        k_kbd, (batch, keyboard_seq_len, keyboard_input_dim), jnp.float32)

    fwd = jax.jit(functools.partial(dual_stream_forward, n_heads=n_heads))
    out = fwd(params, mouse_seq, keyboard_seq)
    jax.block_until_ready(out)

    assert out.shape == (batch, embed_dim)
    assert bool(jnp.all(jnp.isfinite(out)))
    # sanity: L2-normalized rows
    norms = jnp.linalg.norm(out, axis=1)
    assert bool(jnp.all(jnp.abs(norms - 1.0) < 1e-3))
    print("KERNEL_OK")
</pallas_src>

<mosaic_0001>
module attributes {stable_mosaic.version = 11 : i64} {
  func.func @_fusion_kernel(%arg0: memref<2x2x32xf32, #tpu.memory_space<vmem>>, %arg1: memref<32x32xbf16, #tpu.memory_space<vmem>>, %arg2: memref<32x32xbf16, #tpu.memory_space<vmem>>, %arg3: memref<1x32xf32, #tpu.memory_space<vmem>>, %arg4: memref<32x32xbf16, #tpu.memory_space<vmem>>, %arg5: memref<1x32xf32, #tpu.memory_space<vmem>>, %arg6: memref<2x32xf32, #tpu.memory_space<vmem>>) attributes {dimension_semantics = [], scalar_prefetch = 0 : i64, scratch_operands = 0 : i64, tpu.core_type = #tpu.core_type<tc>} {
    %c0 = arith.constant 0 : index
    %c0_0 = arith.constant 0 : index
    %c0_1 = arith.constant 0 : index
    %0 = vector.load %arg0[%c0, %c0_0, %c0_1] : memref<2x2x32xf32, #tpu.memory_space<vmem>>, vector<1x2x32xf32>
    %1 = vector.shape_cast %0 : vector<1x2x32xf32> to vector<2x32xf32>
    %2 = arith.truncf %1 : vector<2x32xf32> to vector<2x32xbf16>
    %c1 = arith.constant 1 : index
    %c0_2 = arith.constant 0 : index
    %c0_3 = arith.constant 0 : index
    %3 = vector.load %arg0[%c1, %c0_2, %c0_3] : memref<2x2x32xf32, #tpu.memory_space<vmem>>, vector<1x2x32xf32>
    %4 = vector.shape_cast %3 : vector<1x2x32xf32> to vector<2x32xf32>
    %5 = arith.truncf %4 : vector<2x32xf32> to vector<2x32xbf16>
    %c0_4 = arith.constant 0 : index
    %c0_5 = arith.constant 0 : index
    %6 = vector.load %arg1[%c0_4, %c0_5] : memref<32x32xbf16, #tpu.memory_space<vmem>>, vector<32x32xbf16>
    %cst = arith.constant dense<0.000000e+00> : vector<2x32xf32>
    %7 = tpu.matmul %2, %6, %cst {dimension_numbers = #tpu.dot_dimension_numbers<[1], [0], [0], [1], [0, 0, 1, 1], [], []>} : vector<2x32xbf16>, vector<32x32xbf16>, vector<2x32xf32> -> vector<2x32xf32>
    %c0_6 = arith.constant 0 : index
    %c0_7 = arith.constant 0 : index
    %8 = vector.load %arg2[%c0_6, %c0_7] : memref<32x32xbf16, #tpu.memory_space<vmem>>, vector<32x32xbf16>
    %cst_8 = arith.constant dense<0.000000e+00> : vector<2x32xf32>
    %9 = tpu.matmul %5, %8, %cst_8 {dimension_numbers = #tpu.dot_dimension_numbers<[1], [0], [0], [1], [0, 0, 1, 1], [], []>} : vector<2x32xbf16>, vector<32x32xbf16>, vector<2x32xf32> -> vector<2x32xf32>
    %10 = arith.addf %7, %9 : vector<2x32xf32>
    %c0_9 = arith.constant 0 : index
    %c0_10 = arith.constant 0 : index
    %11 = vector.load %arg3[%c0_9, %c0_10] : memref<1x32xf32, #tpu.memory_space<vmem>>, vector<1x32xf32>
    %12 = vector.broadcast %11 : vector<1x32xf32> to vector<2x32xf32>
    %13 = arith.addf %10, %12 : vector<2x32xf32>
    %cst_11 = arith.constant 0.000000e+00 : f32
    %14 = vector.broadcast %cst_11 : f32 to vector<2x32xf32>
    %15 = arith.maximumf %13, %14 : vector<2x32xf32>
    %16 = arith.truncf %15 : vector<2x32xf32> to vector<2x32xbf16>
    %c0_12 = arith.constant 0 : index
    %c0_13 = arith.constant 0 : index
    %17 = vector.load %arg4[%c0_12, %c0_13] : memref<32x32xbf16, #tpu.memory_space<vmem>>, vector<32x32xbf16>
    %cst_14 = arith.constant dense<0.000000e+00> : vector<2x32xf32>
    %18 = tpu.matmul %16, %17, %cst_14 {dimension_numbers = #tpu.dot_dimension_numbers<[1], [0], [0], [1], [0, 0, 1, 1], [], []>} : vector<2x32xbf16>, vector<32x32xbf16>, vector<2x32xf32> -> vector<2x32xf32>
    %c0_15 = arith.constant 0 : index
    %c0_16 = arith.constant 0 : index
    %19 = vector.load %arg5[%c0_15, %c0_16] : memref<1x32xf32, #tpu.memory_space<vmem>>, vector<1x32xf32>
    %20 = vector.broadcast %19 : vector<1x32xf32> to vector<2x32xf32>
    %21 = arith.addf %18, %20 : vector<2x32xf32>
    %22 = arith.mulf %21, %21 : vector<2x32xf32>
    %cst_17 = arith.constant dense<0.000000e+00> : vector<2xf32>
    %23 = vector.multi_reduction <add>, %22, %cst_17 [1] : vector<2x32xf32> to vector<2xf32>
    %24 = vector.shape_cast %23 : vector<2xf32> to vector<2x1xf32>
    %cst_18 = arith.constant 1.000000e-24 : f32
    %25 = vector.broadcast %cst_18 : f32 to vector<2x1xf32>
    %26 = arith.maximumf %24, %25 : vector<2x1xf32>
    %27 = math.rsqrt %26 : vector<2x1xf32>
    %28 = vector.broadcast %27 : vector<2x1xf32> to vector<2x32xf32>
    %29 = arith.mulf %21, %28 : vector<2x32xf32>
    %c0_19 = arith.constant 0 : index
    %c0_20 = arith.constant 0 : index
    %30 = vector.load %arg6[%c0_19, %c0_20] : memref<2x32xf32, #tpu.memory_space<vmem>>, vector<2x32xf32>
    tpu.vector_store %arg6[%c0_19, %c0_20], %29 {strides = array<i32>} : memref<2x32xf32, #tpu.memory_space<vmem>>, vector<2x32xf32>,
    return
  }
}

module attributes {stable_mosaic.version = 11 : i64} {
  func.func @_dual_encoder_kernel(%arg0: i32, %arg1: memref<2x10x6xf32, #tpu.memory_space<vmem>>, %arg2: memref<2x8x5xf32, #tpu.memory_space<vmem>>, %arg3: memref<6x32xbf16, #tpu.memory_space<vmem>>, %arg4: memref<1x32xf32, #tpu.memory_space<vmem>>, %arg5: memref<5x32xbf16, #tpu.memory_space<vmem>>, %arg6: memref<1x32xf32, #tpu.memory_space<vmem>>, %arg7: memref<10x32xf32, #tpu.memory_space<vmem>>, %arg8: memref<1x1x32xf32, #tpu.memory_space<vmem>>, %arg9: memref<1x2x32x96xbf16, #tpu.memory_space<vmem>>, %arg10: memref<1x2x1x96xf32, #tpu.memory_space<vmem>>, %arg11: memref<1x2x32x32xbf16, #tpu.memory_space<vmem>>, %arg12: memref<1x2x1x32xf32, #tpu.memory_space<vmem>>, %arg13: memref<1x2x32x128xbf16, #tpu.memory_space<vmem>>, %arg14: memref<1x2x1x128xf32, #tpu.memory_space<vmem>>, %arg15: memref<1x2x128x32xbf16, #tpu.memory_space<vmem>>, %arg16: memref<1x2x1x32xf32, #tpu.memory_space<vmem>>, %arg17: memref<1x2x1x32xf32, #tpu.memory_space<vmem>>, %arg18: memref<1x2x1x32xf32, #tpu.memory_space<vmem>>, %arg19: memref<1x2x1x32xf32, #tpu.memory_space<vmem>>, %arg20: memref<1x2x1x32xf32, #tpu.memory_space<vmem>>, %arg21: memref<1x2x32xf32, #tpu.memory_space<vmem>>, %arg22: memref<2x16x32xf32, #tpu.memory_space<vmem>>) attributes {dimension_semantics = [#tpu.dimension_semantics<parallel>], iteration_bounds = array<i64: 2>, scalar_prefetch = 0 : i64, scratch_operands = 1 : i64, tpu.core_type = #tpu.core_type<tc>, window_params = [{pipeline_mode = #tpu.pipeline_mode<synchronous>, transform_indices = @transform_0, window_bounds = array<i64: 2, 10, 6>}, {pipeline_mode = #tpu.pipeline_mode<synchronous>, transform_indices = @transform_1, window_bounds = array<i64: 2, 8, 5>}, {pipeline_mode = #tpu.pipeline_mode<synchronous>, transform_indices = @transform_2, window_bounds = array<i64: 6, 32>}, {pipeline_mode = #tpu.pipeline_mode<synchronous>, transform_indices = @transform_3, window_bounds = array<i64: 1, 32>}, {pipeline_mode = #tpu.pipeline_mode<synchronous>, transform_indices = @transform_4, window_bounds = array<i64: 5, 32>}, {pipeline_mode = #tpu.pipeline_mode<synchronous>, transform_indices = @transform_5, window_bounds = array<i64: 1, 32>}, {pipeline_mode = #tpu.pipeline_mode<synchronous>, transform_indices = @transform_6, window_bounds = array<i64: 10, 32>}, {transform_indices = @transform_7, window_bounds = array<i64: 1, 1, 32>}, {transform_indices = @transform_8, window_bounds = array<i64: 1, 2, 32, 96>}, {transform_indices = @transform_9, window_bounds = array<i64: 1, 2, 1, 96>}, {transform_indices = @transform_10, window_bounds = array<i64: 1, 2, 32, 32>}, {transform_indices = @transform_11, window_bounds = array<i64: 1, 2, 1, 32>}, {transform_indices = @transform_12, window_bounds = array<i64: 1, 2, 32, 128>}, {transform_indices = @transform_13, window_bounds = array<i64: 1, 2, 1, 128>}, {transform_indices = @transform_14, window_bounds = array<i64: 1, 2, 128, 32>}, {transform_indices = @transform_15, window_bounds = array<i64: 1, 2, 1, 32>}, {transform_indices = @transform_16, window_bounds = array<i64: 1, 2, 1, 32>}, {transform_indices = @transform_17, window_bounds = array<i64: 1, 2, 1, 32>}, {transform_indices = @transform_18, window_bounds = array<i64: 1, 2, 1, 32>}, {transform_indices = @transform_19, window_bounds = array<i64: 1, 2, 1, 32>}, {transform_indices = @transform_20, window_bounds = array<i64: 1, 2, 32>}]} {
    %cst = arith.constant 0.000000e+00 : f32
    %0 = vector.broadcast %cst : f32 to vector<2x16x32xf32>
    %c0 = arith.constant 0 : index
    %c0_0 = arith.constant 0 : index
    %c0_1 = arith.constant 0 : index
    %1 = vector.load %arg22[%c0, %c0_0, %c0_1] : memref<2x16x32xf32, #tpu.memory_space<vmem>>, vector<2x16x32xf32>
    tpu.vector_store %arg22[%c0, %c0_0, %c0_1], %0 {strides = array<i32>} : memref<2x16x32xf32, #tpu.memory_space<vmem>>, vector<2x16x32xf32>,
    %c0_2 = arith.constant 0 : index
    %c0_3 = arith.constant 0 : index
    %c0_4 = arith.constant 0 : index
    %2 = vector.load %arg8[%c0_2, %c0_3, %c0_4] : memref<1x1x32xf32, #tpu.memory_space<vmem>>, vector<1x1x32xf32>
    %3 = vector.shape_cast %2 : vector<1x1x32xf32> to vector<1x1x32xf32>
    %4 = vector.broadcast %3 : vector<1x1x32xf32> to vector<2x1x32xf32>
    %c0_5 = arith.constant 0 : index
    %c0_6 = arith.constant 0 : index
    %c0_7 = arith.constant 0 : index
    %5 = vector.load %arg22[%c0_5, %c0_6, %c0_7] : memref<2x16x32xf32, #tpu.memory_space<vmem>>, vector<2x1x32xf32>
    tpu.vector_store %arg22[%c0_5, %c0_6, %c0_7], %4 {strides = array<i32>} : memref<2x16x32xf32, #tpu.memory_space<vmem>>, vector<2x1x32xf32>,
    %c0_i32 = arith.constant 0 : i32
    %6 = arith.cmpi eq, %arg0, %c0_i32 : i32
    %7 = arith.extui %6 : i1 to i32
    %c0_i32_8 = arith.constant 0 : i32
    %8 = arith.cmpi ne, %7, %c0_i32_8 : i32
    scf.if %8 {
      %c0_154 = arith.constant 0 : index
      %c0_155 = arith.constant 0 : index
      %c0_156 = arith.constant 0 : index
      %306 = vector.load %arg1[%c0_154, %c0_155, %c0_156] : memref<2x10x6xf32, #tpu.memory_space<vmem>>, vector<2x10x6xf32>
      %307 = vector.shape_cast %306 : vector<2x10x6xf32> to vector<20x6xf32>
      %308 = arith.truncf %307 : vector<20x6xf32> to vector<20x6xbf16>
      %c0_157 = arith.constant 0 : index
      %c0_158 = arith.constant 0 : index
      %309 = vector.load %arg3[%c0_157, %c0_158] : memref<6x32xbf16, #tpu.memory_space<vmem>>, vector<6x32xbf16>
      %cst_159 = arith.constant dense<0.000000e+00> : vector<20x32xf32>
      %310 = tpu.matmul %308, %309, %cst_159 {dimension_numbers = #tpu.dot_dimension_numbers<[1], [0], [0], [1], [0, 0, 1, 1], [], []>} : vector<20x6xbf16>, vector<6x32xbf16>, vector<20x32xf32> -> vector<20x32xf32>
      %c0_160 = arith.constant 0 : index
      %c0_161 = arith.constant 0 : index
      %311 = vector.load %arg4[%c0_160, %c0_161] : memref<1x32xf32, #tpu.memory_space<vmem>>, vector<1x32xf32>
      %312 = vector.broadcast %311 : vector<1x32xf32> to vector<20x32xf32>
      %313 = arith.addf %310, %312 : vector<20x32xf32>
      %c0_162 = arith.constant 0 : index
      %c0_163 = arith.constant 0 : index
      %314 = vector.load %arg7[%c0_162, %c0_163] : memref<10x32xf32, #tpu.memory_space<vmem>>, vector<10x32xf32>
      %315 = vector.extract_strided_slice %313 {offsets = [0, 0], sizes = [10, 32], strides = [1, 1]} : vector<20x32xf32> to vector<10x32xf32>
      %316 = arith.addf %315, %314 : vector<10x32xf32>
      %c0_164 = arith.constant 0 : index
      %c1_165 = arith.constant 1 : index
      %c0_166 = arith.constant 0 : index
      %317 = vector.load %arg22[%c0_164, %c1_165, %c0_166] : memref<2x16x32xf32, #tpu.memory_space<vmem>>, vector<1x10x32xf32>
      %318 = vector.shape_cast %317 : vector<1x10x32xf32> to vector<10x32xf32>
      %319 = vector.shape_cast %316 : vector<10x32xf32> to vector<1x10x32xf32>
      tpu.vector_store %arg22[%c0_164, %c1_165, %c0_166], %319 {strides = array<i32>} : memref<2x16x32xf32, #tpu.memory_space<vmem>>, vector<1x10x32xf32>,
      %320 = vector.extract_strided_slice %313 {offsets = [10, 0], sizes = [10, 32], strides = [1, 1]} : vector<20x32xf32> to vector<10x32xf32>
      %321 = arith.addf %320, %314 : vector<10x32xf32>
      %c1_167 = arith.constant 1 : index
      %c1_168 = arith.constant 1 : index
      %c0_169 = arith.constant 0 : index
      %322 = vector.load %arg22[%c1_167, %c1_168, %c0_169] : memref<2x16x32xf32, #tpu.memory_space<vmem>>, vector<1x10x32xf32>
      %323 = vector.shape_cast %322 : vector<1x10x32xf32> to vector<10x32xf32>
      %324 = vector.shape_cast %321 : vector<10x32xf32> to vector<1x10x32xf32>
      tpu.vector_store %arg22[%c1_167, %c1_168, %c0_169], %324 {strides = array<i32>} : memref<2x16x32xf32, #tpu.memory_space<vmem>>, vector<1x10x32xf32>,
    } else {
    }
    %c1_i32 = arith.constant 1 : i32
    %9 = arith.cmpi eq, %arg0, %c1_i32 : i32
    %10 = arith.extui %9 : i1 to i32
    %c0_i32_9 = arith.constant 0 : i32
    %11 = arith.cmpi ne, %10, %c0_i32_9 : i32
    scf.if %11 {
      %c0_154 = arith.constant 0 : index
      %c0_155 = arith.constant 0 : index
      %c0_156 = arith.constant 0 : index
      %306 = vector.load %arg2[%c0_154, %c0_155, %c0_156] : memref<2x8x5xf32, #tpu.memory_space<vmem>>, vector<2x8x5xf32>
      %307 = vector.shape_cast %306 : vector<2x8x5xf32> to vector<16x5xf32>
      %308 = arith.truncf %307 : vector<16x5xf32> to vector<16x5xbf16>
      %c0_157 = arith.constant 0 : index
      %c0_158 = arith.constant 0 : index
      %309 = vector.load %arg5[%c0_157, %c0_158] : memref<5x32xbf16, #tpu.memory_space<vmem>>, vector<5x32xbf16>
      %cst_159 = arith.constant dense<0.000000e+00> : vector<16x32xf32>
      %310 = tpu.matmul %308, %309, %cst_159 {dimension_numbers = #tpu.dot_dimension_numbers<[1], [0], [0], [1], [0, 0, 1, 1], [], []>} : vector<16x5xbf16>, vector<5x32xbf16>, vector<16x32xf32> -> vector<16x32xf32>
      %c0_160 = arith.constant 0 : index
      %c0_161 = arith.constant 0 : index
      %311 = vector.load %arg6[%c0_160, %c0_161] : memref<1x32xf32, #tpu.memory_space<vmem>>, vector<1x32xf32>
      %312 = vector.broadcast %311 : vector<1x32xf32> to vector<16x32xf32>
      %313 = arith.addf %310, %312 : vector<16x32xf32>
      %c0_162 = arith.constant 0 : index
      %c0_163 = arith.constant 0 : index
      %314 = vector.load %arg7[%c0_162, %c0_163] : memref<10x32xf32, #tpu.memory_space<vmem>>, vector<8x32xf32>
      %315 = vector.extract_strided_slice %313 {offsets = [0, 0], sizes = [8, 32], strides = [1, 1]} : vector<16x32xf32> to vector<8x32xf32>
      %316 = arith.addf %315, %314 : vector<8x32xf32>
      %c0_164 = arith.constant 0 : index
      %c1_165 = arith.constant 1 : index
      %c0_166 = arith.constant 0 : index
      %317 = vector.load %arg22[%c0_164, %c1_165, %c0_166] : memref<2x16x32xf32, #tpu.memory_space<vmem>>, vector<1x8x32xf32>
      %318 = vector.shape_cast %317 : vector<1x8x32xf32> to vector<8x32xf32>
      %319 = vector.shape_cast %316 : vector<8x32xf32> to vector<1x8x32xf32>
      tpu.vector_store %arg22[%c0_164, %c1_165, %c0_166], %319 {strides = array<i32>} : memref<2x16x32xf32, #tpu.memory_space<vmem>>, vector<1x8x32xf32>,
      %320 = vector.extract_strided_slice %313 {offsets = [8, 0], sizes = [8, 32], strides = [1, 1]} : vector<16x32xf32> to vector<8x32xf32>
      %321 = arith.addf %320, %314 : vector<8x32xf32>
      %c1_167 = arith.constant 1 : index
      %c1_168 = arith.constant 1 : index
      %c0_169 = arith.constant 0 : index
      %322 = vector.load %arg22[%c1_167, %c1_168, %c0_169] : memref<2x16x32xf32, #tpu.memory_space<vmem>>, vector<1x8x32xf32>
      %323 = vector.shape_cast %322 : vector<1x8x32xf32> to vector<8x32xf32>
      %324 = vector.shape_cast %321 : vector<8x32xf32> to vector<1x8x32xf32>
      tpu.vector_store %arg22[%c1_167, %c1_168, %c0_169], %324 {strides = array<i32>} : memref<2x16x32xf32, #tpu.memory_space<vmem>>, vector<1x8x32xf32>,
    } else {
    }
    %c0_i32_10 = arith.constant 0 : i32
    %12 = arith.cmpi eq, %arg0, %c0_i32_10 : i32
    %c11_i32 = arith.constant 11 : i32
    %c9_i32 = arith.constant 9 : i32
    %13 = arith.select %12, %c11_i32, %c9_i32 : i32
    %14 = tpu.iota {dimensions = array<i32: 1>} : vector<16x16xi32>
    %c0_11 = arith.constant 0 : index
    %c0_12 = arith.constant 0 : index
    %c0_13 = arith.constant 0 : index
    %15 = vector.load %arg22[%c0_11, %c0_12, %c0_13] : memref<2x16x32xf32, #tpu.memory_space<vmem>>, vector<2x16x32xf32>
    %16 = vector.shape_cast %15 : vector<2x16x32xf32> to vector<32x32xf32>
    %17 = arith.truncf %16 : vector<32x32xf32> to vector<32x32xbf16>
    %c0_14 = arith.constant 0 : index
    %c0_15 = arith.constant 0 : index
    %c0_16 = arith.constant 0 : index
    %c0_17 = arith.constant 0 : index
    %18 = vector.load %arg9[%c0_14, %c0_15, %c0_16, %c0_17] : memref<1x2x32x96xbf16, #tpu.memory_space<vmem>>, vector<1x1x32x96xbf16>
    %19 = vector.shape_cast %18 : vector<1x1x32x96xbf16> to vector<32x96xbf16>
    %cst_18 = arith.constant dense<0.000000e+00> : vector<32x96xf32>
    %20 = tpu.matmul %17, %19, %cst_18 {dimension_numbers = #tpu.dot_dimension_numbers<[1], [0], [0], [1], [0, 0, 1, 1], [], []>} : vector<32x32xbf16>, vector<32x96xbf16>, vector<32x96xf32> -> vector<32x96xf32>
    %c0_19 = arith.constant 0 : index
    %c0_20 = arith.constant 0 : index
    %c0_21 = arith.constant 0 : index
    %c0_22 = arith.constant 0 : index
    %21 = vector.load %arg10[%c0_19, %c0_20, %c0_21, %c0_22] : memref<1x2x1x96xf32, #tpu.memory_space<vmem>>, vector<1x1x1x96xf32>
    %22 = vector.shape_cast %21 : vector<1x1x1x96xf32> to vector<1x96xf32>
    %23 = vector.broadcast %22 : vector<1x96xf32> to vector<32x96xf32>
    %24 = arith.addf %20, %23 : vector<32x96xf32>
    %25 = arith.truncf %24 : vector<32x96xf32> to vector<32x96xbf16>
    %26 = vector.extract_strided_slice %25 {offsets = [0, 0], sizes = [32, 8], strides = [1, 1]} : vector<32x96xbf16> to vector<32x8xbf16>
    %27 = vector.shape_cast %26 : vector<32x8xbf16> to vector<2x16x8xbf16>
    %28 = vector.extract_strided_slice %25 {offsets = [0, 8], sizes = [32, 8], strides = [1, 1]} : vector<32x96xbf16> to vector<32x8xbf16>
    %29 = vector.shape_cast %28 : vector<32x8xbf16> to vector<2x16x8xbf16>
    %30 = vector.extract_strided_slice %25 {offsets = [0, 16], sizes = [32, 8], strides = [1, 1]} : vector<32x96xbf16> to vector<32x8xbf16>
    %31 = vector.shape_cast %30 : vector<32x8xbf16> to vector<2x16x8xbf16>
    %32 = vector.extract_strided_slice %25 {offsets = [0, 24], sizes = [32, 8], strides = [1, 1]} : vector<32x96xbf16> to vector<32x8xbf16>
    %33 = vector.shape_cast %32 : vector<32x8xbf16> to vector<2x16x8xbf16>
    %34 = tpu.concatenate %27, %29, %31, %33 in 0 : vector<2x16x8xbf16>, vector<2x16x8xbf16>, vector<2x16x8xbf16>, vector<2x16x8xbf16> -> vector<8x16x8xbf16>
    %35 = vector.extract_strided_slice %25 {offsets = [0, 32], sizes = [32, 8], strides = [1, 1]} : vector<32x96xbf16> to vector<32x8xbf16>
    %36 = vector.shape_cast %35 : vector<32x8xbf16> to vector<2x16x8xbf16>
    %37 = vector.extract_strided_slice %25 {offsets = [0, 40], sizes = [32, 8], strides = [1, 1]} : vector<32x96xbf16> to vector<32x8xbf16>
    %38 = vector.shape_cast %37 : vector<32x8xbf16> to vector<2x16x8xbf16>
    %39 = vector.extract_strided_slice %25 {offsets = [0, 48], sizes = [32, 8], strides = [1, 1]} : vector<32x96xbf16> to vector<32x8xbf16>
    %40 = vector.shape_cast %39 : vector<32x8xbf16> to vector<2x16x8xbf16>
    %41 = vector.extract_strided_slice %25 {offsets = [0, 56], sizes = [32, 8], strides = [1, 1]} : vector<32x96xbf16> to vector<32x8xbf16>
    %42 = vector.shape_cast %41 : vector<32x8xbf16> to vector<2x16x8xbf16>
    %43 = tpu.concatenate %36, %38, %40, %42 in 0 : vector<2x16x8xbf16>, vector<2x16x8xbf16>, vector<2x16x8xbf16>, vector<2x16x8xbf16> -> vector<8x16x8xbf16>
    %44 = vector.extract_strided_slice %25 {offsets = [0, 64], sizes = [32, 8], strides = [1, 1]} : vector<32x96xbf16> to vector<32x8xbf16>
    %45 = vector.shape_cast %44 : vector<32x8xbf16> to vector<2x16x8xbf16>
    %46 = vector.extract_strided_slice %25 {offsets = [0, 72], sizes = [32, 8], strides = [1, 1]} : vector<32x96xbf16> to vector<32x8xbf16>
    %47 = vector.shape_cast %46 : vector<32x8xbf16> to vector<2x16x8xbf16>
    %48 = vector.extract_strided_slice %25 {offsets = [0, 80], sizes = [32, 8], strides = [1, 1]} : vector<32x96xbf16> to vector<32x8xbf16>
    %49 = vector.shape_cast %48 : vector<32x8xbf16> to vector<2x16x8xbf16>
    %50 = vector.extract_strided_slice %25 {offsets = [0, 88], sizes = [32, 8], strides = [1, 1]} : vector<32x96xbf16> to vector<32x8xbf16>
    %51 = vector.shape_cast %50 : vector<32x8xbf16> to vector<2x16x8xbf16>
    %52 = tpu.concatenate %45, %47, %49, %51 in 0 : vector<2x16x8xbf16>, vector<2x16x8xbf16>, vector<2x16x8xbf16>, vector<2x16x8xbf16> -> vector<8x16x8xbf16>
    "tpu.trace_start"() <{level = 10 : i32, message = "nld,nmd->nlm"}> : () -> ()
    %cst_23 = arith.constant dense<0.000000e+00> : vector<8x16x16xf32>
    %53 = tpu.matmul %34, %43, %cst_23 {dimension_numbers = #tpu.dot_dimension_numbers<[2], [2], [1], [1], [0, 0, 0, 1, 1, 1], [0], [0]>} : vector<8x16x8xbf16>, vector<8x16x8xbf16>, vector<8x16x16xf32> -> vector<8x16x16xf32>
    "tpu.trace_stop"() : () -> ()
    %cst_24 = arith.constant 0.353553385 : f32
    %54 = vector.broadcast %cst_24 : f32 to vector<8x16x16xf32>
    %55 = arith.mulf %53, %54 : vector<8x16x16xf32>
    %56 = vector.broadcast %13 : i32 to vector<16x16xi32>
    %57 = arith.cmpi slt, %14, %56 : vector<16x16xi32>
    %cst_25 = arith.constant -1.000000e+30 : f32
    %58 = vector.shape_cast %57 : vector<16x16xi1> to vector<1x16x16xi1>
    %59 = vector.broadcast %58 : vector<1x16x16xi1> to vector<8x16x16xi1>
    %60 = vector.broadcast %cst_25 : f32 to vector<8x16x16xf32>
    %61 = arith.select %59, %55, %60 : vector<8x16x16xi1>, vector<8x16x16xf32>
    %cst_26 = arith.constant dense<0xFF800000> : vector<8x16xf32>
    %62 = vector.multi_reduction <maximumf>, %61, %cst_26 [2] : vector<8x16x16xf32> to vector<8x16xf32>
    %63 = vector.shape_cast %62 : vector<8x16xf32> to vector<8x16x1xf32>
    %64 = vector.broadcast %63 : vector<8x16x1xf32> to vector<8x16x16xf32>
    %65 = arith.subf %61, %64 : vector<8x16x16xf32>
    %66 = math.exp %65 : vector<8x16x16xf32>
    %cst_27 = arith.constant dense<0.000000e+00> : vector<8x16xf32>
    %67 = vector.multi_reduction <add>, %66, %cst_27 [2] : vector<8x16x16xf32> to vector<8x16xf32>
    %68 = vector.shape_cast %67 : vector<8x16xf32> to vector<8x16x1xf32>
    %69 = tpu.reciprocal %68 {approx = true} : vector<8x16x1xf32> -> vector<8x16x1xf32>
    %70 = vector.broadcast %69 : vector<8x16x1xf32> to vector<8x16x16xf32>
    %71 = arith.mulf %66, %70 : vector<8x16x16xf32>
    %72 = arith.truncf %71 : vector<8x16x16xf32> to vector<8x16x16xbf16>
    "tpu.trace_start"() <{level = 10 : i32, message = "nlm,nmd->nld"}> : () -> ()
    %cst_28 = arith.constant dense<0.000000e+00> : vector<8x16x8xf32>
    %73 = tpu.matmul %72, %52, %cst_28 {dimension_numbers = #tpu.dot_dimension_numbers<[2], [1], [1], [2], [0, 0, 0, 1, 1, 2], [0], [0]>} : vector<8x16x16xbf16>, vector<8x16x8xbf16>, vector<8x16x8xf32> -> vector<8x16x8xf32>
    "tpu.trace_stop"() : () -> ()
    %74 = vector.extract_strided_slice %73 {offsets = [0, 0, 0], sizes = [2, 16, 8], strides = [1, 1, 1]} : vector<8x16x8xf32> to vector<2x16x8xf32>
    %75 = vector.shape_cast %74 : vector<2x16x8xf32> to vector<32x8xf32>
    %76 = vector.extract_strided_slice %73 {offsets = [2, 0, 0], sizes = [2, 16, 8], strides = [1, 1, 1]} : vector<8x16x8xf32> to vector<2x16x8xf32>
    %77 = vector.shape_cast %76 : vector<2x16x8xf32> to vector<32x8xf32>
    %78 = vector.extract_strided_slice %73 {offsets = [4, 0, 0], sizes = [2, 16, 8], strides = [1, 1, 1]} : vector<8x16x8xf32> to vector<2x16x8xf32>
    %79 = vector.shape_cast %78 : vector<2x16x8xf32> to vector<32x8xf32>
    %80 = vector.extract_strided_slice %73 {offsets = [6, 0, 0], sizes = [2, 16, 8], strides = [1, 1, 1]} : vector<8x16x8xf32> to vector<2x16x8xf32>
    %81 = vector.shape_cast %80 : vector<2x16x8xf32> to vector<32x8xf32>
    %82 = tpu.concatenate %75, %77, %79, %81 in 1 : vector<32x8xf32>, vector<32x8xf32>, vector<32x8xf32>, vector<32x8xf32> -> vector<32x32xf32>
    %83 = arith.truncf %82 : vector<32x32xf32> to vector<32x32xbf16>
    %c0_29 = arith.constant 0 : index
    %c0_30 = arith.constant 0 : index
    %c0_31 = arith.constant 0 : index
    %c0_32 = arith.constant 0 : index
    %84 = vector.load %arg11[%c0_29, %c0_30, %c0_31, %c0_32] : memref<1x2x32x32xbf16, #tpu.memory_space<vmem>>, vector<1x1x32x32xbf16>
    %85 = vector.shape_cast %84 : vector<1x1x32x32xbf16> to vector<32x32xbf16>
    %cst_33 = arith.constant dense<0.000000e+00> : vector<32x32xf32>
    %86 = tpu.matmul %83, %85, %cst_33 {dimension_numbers = #tpu.dot_dimension_numbers<[1], [0], [0], [1], [0, 0, 1, 1], [], []>} : vector<32x32xbf16>, vector<32x32xbf16>, vector<32x32xf32> -> vector<32x32xf32>
    %c0_34 = arith.constant 0 : index
    %c0_35 = arith.constant 0 : index
    %c0_36 = arith.constant 0 : index
    %c0_37 = arith.constant 0 : index
    %87 = vector.load %arg12[%c0_34, %c0_35, %c0_36, %c0_37] : memref<1x2x1x32xf32, #tpu.memory_space<vmem>>, vector<1x1x1x32xf32>
    %88 = vector.shape_cast %87 : vector<1x1x1x32xf32> to vector<1x32xf32>
    %89 = vector.broadcast %88 : vector<1x32xf32> to vector<32x32xf32>
    %90 = arith.addf %86, %89 : vector<32x32xf32>
    %91 = arith.addf %16, %90 : vector<32x32xf32>
    %c0_38 = arith.constant 0 : index
    %c0_39 = arith.constant 0 : index
    %c0_40 = arith.constant 0 : index
    %c0_41 = arith.constant 0 : index
    %92 = vector.load %arg17[%c0_38, %c0_39, %c0_40, %c0_41] : memref<1x2x1x32xf32, #tpu.memory_space<vmem>>, vector<1x1x1x32xf32>
    %93 = vector.shape_cast %92 : vector<1x1x1x32xf32> to vector<1x32xf32>
    %c0_42 = arith.constant 0 : index
    %c0_43 = arith.constant 0 : index
    %c0_44 = arith.constant 0 : index
    %c0_45 = arith.constant 0 : index
    %94 = vector.load %arg18[%c0_42, %c0_43, %c0_44, %c0_45] : memref<1x2x1x32xf32, #tpu.memory_space<vmem>>, vector<1x1x1x32xf32>
    %95 = vector.shape_cast %94 : vector<1x1x1x32xf32> to vector<1x32xf32>
    %cst_46 = arith.constant dense<0.000000e+00> : vector<32xf32>
    %96 = vector.multi_reduction <add>, %91, %cst_46 [1] : vector<32x32xf32> to vector<32xf32>
    %97 = vector.shape_cast %96 : vector<32xf32> to vector<32x1xf32>
    %cst_47 = arith.constant 3.200000e+01 : f32
    %98 = vector.broadcast %cst_47 : f32 to vector<32x1xf32>
    %99 = arith.divf %97, %98 : vector<32x1xf32>
    %100 = vector.broadcast %99 : vector<32x1xf32> to vector<32x32xf32>
    %101 = arith.subf %91, %100 : vector<32x32xf32>
    %102 = arith.mulf %101, %101 : vector<32x32xf32>
    %cst_48 = arith.constant dense<0.000000e+00> : vector<32xf32>
    %103 = vector.multi_reduction <add>, %102, %cst_48 [1] : vector<32x32xf32> to vector<32xf32>
    %104 = vector.shape_cast %103 : vector<32xf32> to vector<32x1xf32>
    %cst_49 = arith.constant 3.200000e+01 : f32
    %105 = vector.broadcast %cst_49 : f32 to vector<32x1xf32>
    %106 = arith.divf %104, %105 : vector<32x1xf32>
    %cst_50 = arith.constant 9.99999974E-6 : f32
    %107 = vector.broadcast %cst_50 : f32 to vector<32x1xf32>
    %108 = arith.addf %106, %107 : vector<32x1xf32>
    %109 = math.rsqrt %108 : vector<32x1xf32>
    %110 = vector.broadcast %109 : vector<32x1xf32> to vector<32x32xf32>
    %111 = arith.mulf %101, %110 : vector<32x32xf32>
    %112 = vector.broadcast %93 : vector<1x32xf32> to vector<32x32xf32>
    %113 = arith.mulf %111, %112 : vector<32x32xf32>
    %114 = vector.broadcast %95 : vector<1x32xf32> to vector<32x32xf32>
    %115 = arith.addf %113, %114 : vector<32x32xf32>
    %116 = arith.truncf %115 : vector<32x32xf32> to vector<32x32xbf16>
    %c0_51 = arith.constant 0 : index
    %c0_52 = arith.constant 0 : index
    %c0_53 = arith.constant 0 : index
    %c0_54 = arith.constant 0 : index
    %117 = vector.load %arg13[%c0_51, %c0_52, %c0_53, %c0_54] : memref<1x2x32x128xbf16, #tpu.memory_space<vmem>>, vector<1x1x32x128xbf16>
    %118 = vector.shape_cast %117 : vector<1x1x32x128xbf16> to vector<32x128xbf16>
    %cst_55 = arith.constant dense<0.000000e+00> : vector<32x128xf32>
    %119 = tpu.matmul %116, %118, %cst_55 {dimension_numbers = #tpu.dot_dimension_numbers<[1], [0], [0], [1], [0, 0, 1, 1], [], []>} : vector<32x32xbf16>, vector<32x128xbf16>, vector<32x128xf32> -> vector<32x128xf32>
    %c0_56 = arith.constant 0 : index
    %c0_57 = arith.constant 0 : index
    %c0_58 = arith.constant 0 : index
    %c0_59 = arith.constant 0 : index
    %120 = vector.load %arg14[%c0_56, %c0_57, %c0_58, %c0_59] : memref<1x2x1x128xf32, #tpu.memory_space<vmem>>, vector<1x1x1x128xf32>
    %121 = vector.shape_cast %120 : vector<1x1x1x128xf32> to vector<1x128xf32>
    %122 = vector.broadcast %121 : vector<1x128xf32> to vector<32x128xf32>
    %123 = arith.addf %119, %122 : vector<32x128xf32>
    %cst_60 = arith.constant 0.000000e+00 : f32
    %124 = vector.broadcast %cst_60 : f32 to vector<32x128xf32>
    %125 = arith.maximumf %123, %124 : vector<32x128xf32>
    %126 = arith.truncf %125 : vector<32x128xf32> to vector<32x128xbf16>
    %c0_61 = arith.constant 0 : index
    %c0_62 = arith.constant 0 : index
    %c0_63 = arith.constant 0 : index
    %c0_64 = arith.constant 0 : index
    %127 = vector.load %arg15[%c0_61, %c0_62, %c0_63, %c0_64] : memref<1x2x128x32xbf16, #tpu.memory_space<vmem>>, vector<1x1x128x32xbf16>
    %128 = vector.shape_cast %127 : vector<1x1x128x32xbf16> to vector<128x32xbf16>
    %cst_65 = arith.constant dense<0.000000e+00> : vector<32x32xf32>
    %129 = tpu.matmul %126, %128, %cst_65 {dimension_numbers = #tpu.dot_dimension_numbers<[1], [0], [0], [1], [0, 0, 1, 1], [], []>} : vector<32x128xbf16>, vector<128x32xbf16>, vector<32x32xf32> -> vector<32x32xf32>
    %c0_66 = arith.constant 0 : index
    %c0_67 = arith.constant 0 : index
    %c0_68 = arith.constant 0 : index
    %c0_69 = arith.constant 0 : index
    %130 = vector.load %arg16[%c0_66, %c0_67, %c0_68, %c0_69] : memref<1x2x1x32xf32, #tpu.memory_space<vmem>>, vector<1x1x1x32xf32>
    %131 = vector.shape_cast %130 : vector<1x1x1x32xf32> to vector<1x32xf32>
    %132 = vector.broadcast %131 : vector<1x32xf32> to vector<32x32xf32>
    %133 = arith.addf %129, %132 : vector<32x32xf32>
    %134 = arith.addf %115, %133 : vector<32x32xf32>
    %c0_70 = arith.constant 0 : index
    %c0_71 = arith.constant 0 : index
    %c0_72 = arith.constant 0 : index
    %c0_73 = arith.constant 0 : index
    %135 = vector.load %arg19[%c0_70, %c0_71, %c0_72, %c0_73] : memref<1x2x1x32xf32, #tpu.memory_space<vmem>>, vector<1x1x1x32xf32>
    %136 = vector.shape_cast %135 : vector<1x1x1x32xf32> to vector<1x32xf32>
    %c0_74 = arith.constant 0 : index
    %c0_75 = arith.constant 0 : index
    %c0_76 = arith.constant 0 : index
    %c0_77 = arith.constant 0 : index
    %137 = vector.load %arg20[%c0_74, %c0_75, %c0_76, %c0_77] : memref<1x2x1x32xf32, #tpu.memory_space<vmem>>, vector<1x1x1x32xf32>
    %138 = vector.shape_cast %137 : vector<1x1x1x32xf32> to vector<1x32xf32>
    %cst_78 = arith.constant dense<0.000000e+00> : vector<32xf32>
    %139 = vector.multi_reduction <add>, %134, %cst_78 [1] : vector<32x32xf32> to vector<32xf32>
    %140 = vector.shape_cast %139 : vector<32xf32> to vector<32x1xf32>
    %cst_79 = arith.constant 3.200000e+01 : f32
    %141 = vector.broadcast %cst_79 : f32 to vector<32x1xf32>
    %142 = arith.divf %140, %141 : vector<32x1xf32>
    %143 = vector.broadcast %142 : vector<32x1xf32> to vector<32x32xf32>
    %144 = arith.subf %134, %143 : vector<32x32xf32>
    %145 = arith.mulf %144, %144 : vector<32x32xf32>
    %cst_80 = arith.constant dense<0.000000e+00> : vector<32xf32>
    %146 = vector.multi_reduction <add>, %145, %cst_80 [1] : vector<32x32xf32> to vector<32xf32>
    %147 = vector.shape_cast %146 : vector<32xf32> to vector<32x1xf32>
    %cst_81 = arith.constant 3.200000e+01 : f32
    %148 = vector.broadcast %cst_81 : f32 to vector<32x1xf32>
    %149 = arith.divf %147, %148 : vector<32x1xf32>
    %cst_82 = arith.constant 9.99999974E-6 : f32
    %150 = vector.broadcast %cst_82 : f32 to vector<32x1xf32>
    %151 = arith.addf %149, %150 : vector<32x1xf32>
    %152 = math.rsqrt %151 : vector<32x1xf32>
    %153 = vector.broadcast %152 : vector<32x1xf32> to vector<32x32xf32>
    %154 = arith.mulf %144, %153 : vector<32x32xf32>
    %155 = vector.broadcast %136 : vector<1x32xf32> to vector<32x32xf32>
    %156 = arith.mulf %154, %155 : vector<32x32xf32>
    %157 = vector.broadcast %138 : vector<1x32xf32> to vector<32x32xf32>
    %158 = arith.addf %156, %157 : vector<32x32xf32>
    %159 = arith.truncf %158 : vector<32x32xf32> to vector<32x32xbf16>
    %c0_83 = arith.constant 0 : index
    %c1 = arith.constant 1 : index
    %c0_84 = arith.constant 0 : index
    %c0_85 = arith.constant 0 : index
    %160 = vector.load %arg9[%c0_83, %c1, %c0_84, %c0_85] : memref<1x2x32x96xbf16, #tpu.memory_space<vmem>>, vector<1x1x32x96xbf16>
    %161 = vector.shape_cast %160 : vector<1x1x32x96xbf16> to vector<32x96xbf16>
    %cst_86 = arith.constant dense<0.000000e+00> : vector<32x96xf32>
    %162 = tpu.matmul %159, %161, %cst_86 {dimension_numbers = #tpu.dot_dimension_numbers<[1], [0], [0], [1], [0, 0, 1, 1], [], []>} : vector<32x32xbf16>, vector<32x96xbf16>, vector<32x96xf32> -> vector<32x96xf32>
    %c0_87 = arith.constant 0 : index
    %c1_88 = arith.constant 1 : index
    %c0_89 = arith.constant 0 : index
    %c0_90 = arith.constant 0 : index
    %163 = vector.load %arg10[%c0_87, %c1_88, %c0_89, %c0_90] : memref<1x2x1x96xf32, #tpu.memory_space<vmem>>, vector<1x1x1x96xf32>
    %164 = vector.shape_cast %163 : vector<1x1x1x96xf32> to vector<1x96xf32>
    %165 = vector.broadcast %164 : vector<1x96xf32> to vector<32x96xf32>
    %166 = arith.addf %162, %165 : vector<32x96xf32>
    %167 = arith.truncf %166 : vector<32x96xf32> to vector<32x96xbf16>
    %168 = vector.extract_strided_slice %167 {offsets = [0, 0], sizes = [32, 8], strides = [1, 1]} : vector<32x96xbf16> to vector<32x8xbf16>
    %169 = vector.shape_cast %168 : vector<32x8xbf16> to vector<2x16x8xbf16>
    %170 = vector.extract_strided_slice %167 {offsets = [0, 8], sizes = [32, 8], strides = [1, 1]} : vector<32x96xbf16> to vector<32x8xbf16>
    %171 = vector.shape_cast %170 : vector<32x8xbf16> to vector<2x16x8xbf16>
    %172 = vector.extract_strided_slice %167 {offsets = [0, 16], sizes = [32, 8], strides = [1, 1]} : vector<32x96xbf16> to vector<32x8xbf16>
    %173 = vector.shape_cast %172 : vector<32x8xbf16> to vector<2x16x8xbf16>
    %174 = vector.extract_strided_slice %167 {offsets = [0, 24], sizes = [32, 8], strides = [1, 1]} : vector<32x96xbf16> to vector<32x8xbf16>
    %175 = vector.shape_cast %174 : vector<32x8xbf16> to vector<2x16x8xbf16>
    %176 = tpu.concatenate %169, %171, %173, %175 in 0 : vector<2x16x8xbf16>, vector<2x16x8xbf16>, vector<2x16x8xbf16>, vector<2x16x8xbf16> -> vector<8x16x8xbf16>
    %177 = vector.extract_strided_slice %167 {offsets = [0, 32], sizes = [32, 8], strides = [1, 1]} : vector<32x96xbf16> to vector<32x8xbf16>
    %178 = vector.shape_cast %177 : vector<32x8xbf16> to vector<2x16x8xbf16>
    %179 = vector.extract_strided_slice %167 {offsets = [0, 40], sizes = [32, 8], strides = [1, 1]} : vector<32x96xbf16> to vector<32x8xbf16>
    %180 = vector.shape_cast %179 : vector<32x8xbf16> to vector<2x16x8xbf16>
    %181 = vector.extract_strided_slice %167 {offsets = [0, 48], sizes = [32, 8], strides = [1, 1]} : vector<32x96xbf16> to vector<32x8xbf16>
    %182 = vector.shape_cast %181 : vector<32x8xbf16> to vector<2x16x8xbf16>
    %183 = vector.extract_strided_slice %167 {offsets = [0, 56], sizes = [32, 8], strides = [1, 1]} : vector<32x96xbf16> to vector<32x8xbf16>
    %184 = vector.shape_cast %183 : vector<32x8xbf16> to vector<2x16x8xbf16>
    %185 = tpu.concatenate %178, %180, %182, %184 in 0 : vector<2x16x8xbf16>, vector<2x16x8xbf16>, vector<2x16x8xbf16>, vector<2x16x8xbf16> -> vector<8x16x8xbf16>
    %186 = vector.extract_strided_slice %167 {offsets = [0, 64], sizes = [32, 8], strides = [1, 1]} : vector<32x96xbf16> to vector<32x8xbf16>
    %187 = vector.shape_cast %186 : vector<32x8xbf16> to vector<2x16x8xbf16>
    %188 = vector.extract_strided_slice %167 {offsets = [0, 72], sizes = [32, 8], strides = [1, 1]} : vector<32x96xbf16> to vector<32x8xbf16>
    %189 = vector.shape_cast %188 : vector<32x8xbf16> to vector<2x16x8xbf16>
    %190 = vector.extract_strided_slice %167 {offsets = [0, 80], sizes = [32, 8], strides = [1, 1]} : vector<32x96xbf16> to vector<32x8xbf16>
    %191 = vector.shape_cast %190 : vector<32x8xbf16> to vector<2x16x8xbf16>
    %192 = vector.extract_strided_slice %167 {offsets = [0, 88], sizes = [32, 8], strides = [1, 1]} : vector<32x96xbf16> to vector<32x8xbf16>
    %193 = vector.shape_cast %192 : vector<32x8xbf16> to vector<2x16x8xbf16>
    %194 = tpu.concatenate %187, %189, %191, %193 in 0 : vector<2x16x8xbf16>, vector<2x16x8xbf16>, vector<2x16x8xbf16>, vector<2x16x8xbf16> -> vector<8x16x8xbf16>
    "tpu.trace_start"() <{level = 10 : i32, message = "nld,nmd->nlm"}> : () -> ()
    %cst_91 = arith.constant dense<0.000000e+00> : vector<8x16x16xf32>
    %195 = tpu.matmul %176, %185, %cst_91 {dimension_numbers = #tpu.dot_dimension_numbers<[2], [2], [1], [1], [0, 0, 0, 1, 1, 1], [0], [0]>} : vector<8x16x8xbf16>, vector<8x16x8xbf16>, vector<8x16x16xf32> -> vector<8x16x16xf32>
    "tpu.trace_stop"() : () -> ()
    %cst_92 = arith.constant 0.353553385 : f32
    %196 = vector.broadcast %cst_92 : f32 to vector<8x16x16xf32>
    %197 = arith.mulf %195, %196 : vector<8x16x16xf32>
    %198 = vector.broadcast %13 : i32 to vector<16x16xi32>
    %199 = arith.cmpi slt, %14, %198 : vector<16x16xi32>
    %cst_93 = arith.constant -1.000000e+30 : f32
    %200 = vector.shape_cast %199 : vector<16x16xi1> to vector<1x16x16xi1>
    %201 = vector.broadcast %200 : vector<1x16x16xi1> to vector<8x16x16xi1>
    %202 = vector.broadcast %cst_93 : f32 to vector<8x16x16xf32>
    %203 = arith.select %201, %197, %202 : vector<8x16x16xi1>, vector<8x16x16xf32>
    %cst_94 = arith.constant dense<0xFF800000> : vector<8x16xf32>
    %204 = vector.multi_reduction <maximumf>, %203, %cst_94 [2] : vector<8x16x16xf32> to vector<8x16xf32>
    %205 = vector.shape_cast %204 : vector<8x16xf32> to vector<8x16x1xf32>
    %206 = vector.broadcast %205 : vector<8x16x1xf32> to vector<8x16x16xf32>
    %207 = arith.subf %203, %206 : vector<8x16x16xf32>
    %208 = math.exp %207 : vector<8x16x16xf32>
    %cst_95 = arith.constant dense<0.000000e+00> : vector<8x16xf32>
    %209 = vector.multi_reduction <add>, %208, %cst_95 [2] : vector<8x16x16xf32> to vector<8x16xf32>
    %210 = vector.shape_cast %209 : vector<8x16xf32> to vector<8x16x1xf32>
    %211 = tpu.reciprocal %210 {approx = true} : vector<8x16x1xf32> -> vector<8x16x1xf32>
    %212 = vector.broadcast %211 : vector<8x16x1xf32> to vector<8x16x16xf32>
    %213 = arith.mulf %208, %212 : vector<8x16x16xf32>
    %214 = arith.truncf %213 : vector<8x16x16xf32> to vector<8x16x16xbf16>
    "tpu.trace_start"() <{level = 10 : i32, message = "nlm,nmd->nld"}> : () -> ()
    %cst_96 = arith.constant dense<0.000000e+00> : vector<8x16x8xf32>
    %215 = tpu.matmul %214, %194, %cst_96 {dimension_numbers = #tpu.dot_dimension_numbers<[2], [1], [1], [2], [0, 0, 0, 1, 1, 2], [0], [0]>} : vector<8x16x16xbf16>, vector<8x16x8xbf16>, vector<8x16x8xf32> -> vector<8x16x8xf32>
    "tpu.trace_stop"() : () -> ()
    %216 = vector.extract_strided_slice %215 {offsets = [0, 0, 0], sizes = [2, 16, 8], strides = [1, 1, 1]} : vector<8x16x8xf32> to vector<2x16x8xf32>
    %217 = vector.shape_cast %216 : vector<2x16x8xf32> to vector<32x8xf32>
    %218 = vector.extract_strided_slice %215 {offsets = [2, 0, 0], sizes = [2, 16, 8], strides = [1, 1, 1]} : vector<8x16x8xf32> to vector<2x16x8xf32>
    %219 = vector.shape_cast %218 : vector<2x16x8xf32> to vector<32x8xf32>
    %220 = vector.extract_strided_slice %215 {offsets = [4, 0, 0], sizes = [2, 16, 8], strides = [1, 1, 1]} : vector<8x16x8xf32> to vector<2x16x8xf32>
    %221 = vector.shape_cast %220 : vector<2x16x8xf32> to vector<32x8xf32>
    %222 = vector.extract_strided_slice %215 {offsets = [6, 0, 0], sizes = [2, 16, 8], strides = [1, 1, 1]} : vector<8x16x8xf32> to vector<2x16x8xf32>
    %223 = vector.shape_cast %222 : vector<2x16x8xf32> to vector<32x8xf32>
    %224 = tpu.concatenate %217, %219, %221, %223 in 1 : vector<32x8xf32>, vector<32x8xf32>, vector<32x8xf32>, vector<32x8xf32> -> vector<32x32xf32>
    %225 = arith.truncf %224 : vector<32x32xf32> to vector<32x32xbf16>
    %c0_97 = arith.constant 0 : index
    %c1_98 = arith.constant 1 : index
    %c0_99 = arith.constant 0 : index
    %c0_100 = arith.constant 0 : index
    %226 = vector.load %arg11[%c0_97, %c1_98, %c0_99, %c0_100] : memref<1x2x32x32xbf16, #tpu.memory_space<vmem>>, vector<1x1x32x32xbf16>
    %227 = vector.shape_cast %226 : vector<1x1x32x32xbf16> to vector<32x32xbf16>
    %cst_101 = arith.constant dense<0.000000e+00> : vector<32x32xf32>
    %228 = tpu.matmul %225, %227, %cst_101 {dimension_numbers = #tpu.dot_dimension_numbers<[1], [0], [0], [1], [0, 0, 1, 1], [], []>} : vector<32x32xbf16>, vector<32x32xbf16>, vector<32x32xf32> -> vector<32x32xf32>
    %c0_102 = arith.constant 0 : index
    %c1_103 = arith.constant 1 : index
    %c0_104 = arith.constant 0 : index
    %c0_105 = arith.constant 0 : index
    %229 = vector.load %arg12[%c0_102, %c1_103, %c0_104, %c0_105] : memref<1x2x1x32xf32, #tpu.memory_space<vmem>>, vector<1x1x1x32xf32>
    %230 = vector.shape_cast %229 : vector<1x1x1x32xf32> to vector<1x32xf32>
    %231 = vector.broadcast %230 : vector<1x32xf32> to vector<32x32xf32>
    %232 = arith.addf %228, %231 : vector<32x32xf32>
    %233 = arith.addf %158, %232 : vector<32x32xf32>
    %c0_106 = arith.constant 0 : index
    %c1_107 = arith.constant 1 : index
    %c0_108 = arith.constant 0 : index
    %c0_109 = arith.constant 0 : index
    %234 = vector.load %arg17[%c0_106, %c1_107, %c0_108, %c0_109] : memref<1x2x1x32xf32, #tpu.memory_space<vmem>>, vector<1x1x1x32xf32>
    %235 = vector.shape_cast %234 : vector<1x1x1x32xf32> to vector<1x32xf32>
    %c0_110 = arith.constant 0 : index
    %c1_111 = arith.constant 1 : index
    %c0_112 = arith.constant 0 : index
    %c0_113 = arith.constant 0 : index
    %236 = vector.load %arg18[%c0_110, %c1_111, %c0_112, %c0_113] : memref<1x2x1x32xf32, #tpu.memory_space<vmem>>, vector<1x1x1x32xf32>
    %237 = vector.shape_cast %236 : vector<1x1x1x32xf32> to vector<1x32xf32>
    %cst_114 = arith.constant dense<0.000000e+00> : vector<32xf32>
    %238 = vector.multi_reduction <add>, %233, %cst_114 [1] : vector<32x32xf32> to vector<32xf32>
    %239 = vector.shape_cast %238 : vector<32xf32> to vector<32x1xf32>
    %cst_115 = arith.constant 3.200000e+01 : f32
    %240 = vector.broadcast %cst_115 : f32 to vector<32x1xf32>
    %241 = arith.divf %239, %240 : vector<32x1xf32>
    %242 = vector.broadcast %241 : vector<32x1xf32> to vector<32x32xf32>
    %243 = arith.subf %233, %242 : vector<32x32xf32>
    %244 = arith.mulf %243, %243 : vector<32x32xf32>
    %cst_116 = arith.constant dense<0.000000e+00> : vector<32xf32>
    %245 = vector.multi_reduction <add>, %244, %cst_116 [1] : vector<32x32xf32> to vector<32xf32>
    %246 = vector.shape_cast %245 : vector<32xf32> to vector<32x1xf32>
    %cst_117 = arith.constant 3.200000e+01 : f32
    %247 = vector.broadcast %cst_117 : f32 to vector<32x1xf32>
    %248 = arith.divf %246, %247 : vector<32x1xf32>
    %cst_118 = arith.constant 9.99999974E-6 : f32
    %249 = vector.broadcast %cst_118 : f32 to vector<32x1xf32>
    %250 = arith.addf %248, %249 : vector<32x1xf32>
    %251 = math.rsqrt %250 : vector<32x1xf32>
    %252 = vector.broadcast %251 : vector<32x1xf32> to vector<32x32xf32>
    %253 = arith.mulf %243, %252 : vector<32x32xf32>
    %254 = vector.broadcast %235 : vector<1x32xf32> to vector<32x32xf32>
    %255 = arith.mulf %253, %254 : vector<32x32xf32>
    %256 = vector.broadcast %237 : vector<1x32xf32> to vector<32x32xf32>
    %257 = arith.addf %255, %256 : vector<32x32xf32>
    %258 = arith.truncf %257 : vector<32x32xf32> to vector<32x32xbf16>
    %c0_119 = arith.constant 0 : index
    %c1_120 = arith.constant 1 : index
    %c0_121 = arith.constant 0 : index
    %c0_122 = arith.constant 0 : index
    %259 = vector.load %arg13[%c0_119, %c1_120, %c0_121, %c0_122] : memref<1x2x32x128xbf16, #tpu.memory_space<vmem>>, vector<1x1x32x128xbf16>
    %260 = vector.shape_cast %259 : vector<1x1x32x128xbf16> to vector<32x128xbf16>
    %cst_123 = arith.constant dense<0.000000e+00> : vector<32x128xf32>
    %261 = tpu.matmul %258, %260, %cst_123 {dimension_numbers = #tpu.dot_dimension_numbers<[1], [0], [0], [1], [0, 0, 1, 1], [], []>} : vector<32x32xbf16>, vector<32x128xbf16>, vector<32x128xf32> -> vector<32x128xf32>
    %c0_124 = arith.constant 0 : index
    %c1_125 = arith.constant 1 : index
    %c0_126 = arith.constant 0 : index
    %c0_127 = arith.constant 0 : index
    %262 = vector.load %arg14[%c0_124, %c1_125, %c0_126, %c0_127] : memref<1x2x1x128xf32, #tpu.memory_space<vmem>>, vector<1x1x1x128xf32>
    %263 = vector.shape_cast %262 : vector<1x1x1x128xf32> to vector<1x128xf32>
    %264 = vector.broadcast %263 : vector<1x128xf32> to vector<32x128xf32>
    %265 = arith.addf %261, %264 : vector<32x128xf32>
    %cst_128 = arith.constant 0.000000e+00 : f32
    %266 = vector.broadcast %cst_128 : f32 to vector<32x128xf32>
    %267 = arith.maximumf %265, %266 : vector<32x128xf32>
    %268 = arith.truncf %267 : vector<32x128xf32> to vector<32x128xbf16>
    %c0_129 = arith.constant 0 : index
    %c1_130 = arith.constant 1 : index
    %c0_131 = arith.constant 0 : index
    %c0_132 = arith.constant 0 : index
    %269 = vector.load %arg15[%c0_129, %c1_130, %c0_131, %c0_132] : memref<1x2x128x32xbf16, #tpu.memory_space<vmem>>, vector<1x1x128x32xbf16>
    %270 = vector.shape_cast %269 : vector<1x1x128x32xbf16> to vector<128x32xbf16>
    %cst_133 = arith.constant dense<0.000000e+00> : vector<32x32xf32>
    %271 = tpu.matmul %268, %270, %cst_133 {dimension_numbers = #tpu.dot_dimension_numbers<[1], [0], [0], [1], [0, 0, 1, 1], [], []>} : vector<32x128xbf16>, vector<128x32xbf16>, vector<32x32xf32> -> vector<32x32xf32>
    %c0_134 = arith.constant 0 : index
    %c1_135 = arith.constant 1 : index
    %c0_136 = arith.constant 0 : index
    %c0_137 = arith.constant 0 : index
    %272 = vector.load %arg16[%c0_134, %c1_135, %c0_136, %c0_137] : memref<1x2x1x32xf32, #tpu.memory_space<vmem>>, vector<1x1x1x32xf32>
    %273 = vector.shape_cast %272 : vector<1x1x1x32xf32> to vector<1x32xf32>
    %274 = vector.broadcast %273 : vector<1x32xf32> to vector<32x32xf32>
    %275 = arith.addf %271, %274 : vector<32x32xf32>
    %276 = arith.addf %257, %275 : vector<32x32xf32>
    %c0_138 = arith.constant 0 : index
    %c1_139 = arith.constant 1 : index
    %c0_140 = arith.constant 0 : index
    %c0_141 = arith.constant 0 : index
    %277 = vector.load %arg19[%c0_138, %c1_139, %c0_140, %c0_141] : memref<1x2x1x32xf32, #tpu.memory_space<vmem>>, vector<1x1x1x32xf32>
    %278 = vector.shape_cast %277 : vector<1x1x1x32xf32> to vector<1x32xf32>
    %c0_142 = arith.constant 0 : index
    %c1_143 = arith.constant 1 : index
    %c0_144 = arith.constant 0 : index
    %c0_145 = arith.constant 0 : index
    %279 = vector.load %arg20[%c0_142, %c1_143, %c0_144, %c0_145] : memref<1x2x1x32xf32, #tpu.memory_space<vmem>>, vector<1x1x1x32xf32>
    %280 = vector.shape_cast %279 : vector<1x1x1x32xf32> to vector<1x32xf32>
    %cst_146 = arith.constant dense<0.000000e+00> : vector<32xf32>
    %281 = vector.multi_reduction <add>, %276, %cst_146 [1] : vector<32x32xf32> to vector<32xf32>
    %282 = vector.shape_cast %281 : vector<32xf32> to vector<32x1xf32>
    %cst_147 = arith.constant 3.200000e+01 : f32
    %283 = vector.broadcast %cst_147 : f32 to vector<32x1xf32>
    %284 = arith.divf %282, %283 : vector<32x1xf32>
    %285 = vector.broadcast %284 : vector<32x1xf32> to vector<32x32xf32>
    %286 = arith.subf %276, %285 : vector<32x32xf32>
    %287 = arith.mulf %286, %286 : vector<32x32xf32>
    %cst_148 = arith.constant dense<0.000000e+00> : vector<32xf32>
    %288 = vector.multi_reduction <add>, %287, %cst_148 [1] : vector<32x32xf32> to vector<32xf32>
    %289 = vector.shape_cast %288 : vector<32xf32> to vector<32x1xf32>
    %cst_149 = arith.constant 3.200000e+01 : f32
    %290 = vector.broadcast %cst_149 : f32 to vector<32x1xf32>
    %291 = arith.divf %289, %290 : vector<32x1xf32>
    %cst_150 = arith.constant 9.99999974E-6 : f32
    %292 = vector.broadcast %cst_150 : f32 to vector<32x1xf32>
    %293 = arith.addf %291, %292 : vector<32x1xf32>
    %294 = math.rsqrt %293 : vector<32x1xf32>
    %295 = vector.broadcast %294 : vector<32x1xf32> to vector<32x32xf32>
    %296 = arith.mulf %286, %295 : vector<32x32xf32>
    %297 = vector.broadcast %278 : vector<1x32xf32> to vector<32x32xf32>
    %298 = arith.mulf %296, %297 : vector<32x32xf32>
    %299 = vector.broadcast %280 : vector<1x32xf32> to vector<32x32xf32>
    %300 = arith.addf %298, %299 : vector<32x32xf32>
    %301 = vector.shape_cast %300 : vector<32x32xf32> to vector<2x16x32xf32>
    %302 = vector.extract_strided_slice %301 {offsets = [0, 0, 0], sizes = [2, 1, 32], strides = [1, 1, 1]} : vector<2x16x32xf32> to vector<2x1x32xf32>
    %303 = vector.shape_cast %302 : vector<2x1x32xf32> to vector<2x32xf32>
    %304 = vector.shape_cast %303 : vector<2x32xf32> to vector<1x2x32xf32>
    %c0_151 = arith.constant 0 : index
    %c0_152 = arith.constant 0 : index
    %c0_153 = arith.constant 0 : index
    %305 = vector.load %arg21[%c0_151, %c0_152, %c0_153] : memref<1x2x32xf32, #tpu.memory_space<vmem>>, vector<1x2x32xf32>
    tpu.vector_store %arg21[%c0_151, %c0_152, %c0_153], %304 {strides = array<i32>} : memref<1x2x32xf32, #tpu.memory_space<vmem>>, vector<1x2x32xf32>,
    return
  }
  func.func @transform_0(%arg0: i32) -> (i32, i32, i32) {
    %c0_i32 = arith.constant 0 : i32
    %c0_i32_0 = arith.constant 0 : i32
    %c0_i32_1 = arith.constant 0 : i32
    %c0_i32_2 = arith.constant 0 : i32
    return %c0_i32, %c0_i32_0, %c0_i32_1 : i32, i32, i32
  }
  func.func @transform_1(%arg0: i32) -> (i32, i32, i32) {
    %c0_i32 = arith.constant 0 : i32
    %c0_i32_0 = arith.constant 0 : i32
    %c0_i32_1 = arith.constant 0 : i32
    %c0_i32_2 = arith.constant 0 : i32
    return %c0_i32, %c0_i32_0, %c0_i32_1 : i32, i32, i32
  }
  func.func @transform_2(%arg0: i32) -> (i32, i32) {
    %c0_i32 = arith.constant 0 : i32
    %c0_i32_0 = arith.constant 0 : i32
    %c0_i32_1 = arith.constant 0 : i32
    return %c0_i32, %c0_i32_0 : i32, i32
  }
  func.func @transform_3(%arg0: i32) -> (i32, i32) {
    %c0_i32 = arith.constant 0 : i32
    %c0_i32_0 = arith.constant 0 : i32
    %c0_i32_1 = arith.constant 0 : i32
    return %c0_i32, %c0_i32_0 : i32, i32
  }
  func.func @transform_4(%arg0: i32) -> (i32, i32) {
    %c0_i32 = arith.constant 0 : i32
    %c0_i32_0 = arith.constant 0 : i32
    %c0_i32_1 = arith.constant 0 : i32
    return %c0_i32, %c0_i32_0 : i32, i32
  }
  func.func @transform_5(%arg0: i32) -> (i32, i32) {
    %c0_i32 = arith.constant 0 : i32
    %c0_i32_0 = arith.constant 0 : i32
    %c0_i32_1 = arith.constant 0 : i32
    return %c0_i32, %c0_i32_0 : i32, i32
  }
  func.func @transform_6(%arg0: i32) -> (i32, i32) {
    %c0_i32 = arith.constant 0 : i32
    %c0_i32_0 = arith.constant 0 : i32
    %c0_i32_1 = arith.constant 0 : i32
    return %c0_i32, %c0_i32_0 : i32, i32
  }
  func.func @transform_7(%arg0: i32) -> (i32, i32, i32) {
    %c0_i32 = arith.constant 0 : i32
    %c0_i32_0 = arith.constant 0 : i32
    %c0_i32_1 = arith.constant 0 : i32
    return %arg0, %c0_i32, %c0_i32_0 : i32, i32, i32
  }
  func.func @transform_8(%arg0: i32) -> (i32, i32, i32, i32) {
    %c0_i32 = arith.constant 0 : i32
    %c0_i32_0 = arith.constant 0 : i32
    %c0_i32_1 = arith.constant 0 : i32
    %c0_i32_2 = arith.constant 0 : i32
    return %arg0, %c0_i32, %c0_i32_0, %c0_i32_1 : i32, i32, i32, i32
  }
  func.func @transform_9(%arg0: i32) -> (i32, i32, i32, i32) {
    %c0_i32 = arith.constant 0 : i32
    %c0_i32_0 = arith.constant 0 : i32
    %c0_i32_1 = arith.constant 0 : i32
    %c0_i32_2 = arith.constant 0 : i32
    return %arg0, %c0_i32, %c0_i32_0, %c0_i32_1 : i32, i32, i32, i32
  }
  func.func @transform_10(%arg0: i32) -> (i32, i32, i32, i32) {
    %c0_i32 = arith.constant 0 : i32
    %c0_i32_0 = arith.constant 0 : i32
    %c0_i32_1 = arith.constant 0 : i32
    %c0_i32_2 = arith.constant 0 : i32
    return %arg0, %c0_i32, %c0_i32_0, %c0_i32_1 : i32, i32, i32, i32
  }
  func.func @transform_11(%arg0: i32) -> (i32, i32, i32, i32) {
    %c0_i32 = arith.constant 0 : i32
    %c0_i32_0 = arith.constant 0 : i32
    %c0_i32_1 = arith.constant 0 : i32
    %c0_i32_2 = arith.constant 0 : i32
    return %arg0, %c0_i32, %c0_i32_0, %c0_i32_1 : i32, i32, i32, i32
  }
  func.func @transform_12(%arg0: i32) -> (i32, i32, i32, i32) {
    %c0_i32 = arith.constant 0 : i32
    %c0_i32_0 = arith.constant 0 : i32
    %c0_i32_1 = arith.constant 0 : i32
    %c0_i32_2 = arith.constant 0 : i32
    return %arg0, %c0_i32, %c0_i32_0, %c0_i32_1 : i32, i32, i32, i32
  }
  func.func @transform_13(%arg0: i32) -> (i32, i32, i32, i32) {
    %c0_i32 = arith.constant 0 : i32
    %c0_i32_0 = arith.constant 0 : i32
    %c0_i32_1 = arith.constant 0 : i32
    %c0_i32_2 = arith.constant 0 : i32
    return %arg0, %c0_i32, %c0_i32_0, %c0_i32_1 : i32, i32, i32, i32
  }
  func.func @transform_14(%arg0: i32) -> (i32, i32, i32, i32) {
    %c0_i32 = arith.constant 0 : i32
    %c0_i32_0 = arith.constant 0 : i32
    %c0_i32_1 = arith.constant 0 : i32
    %c0_i32_2 = arith.constant 0 : i32
    return %arg0, %c0_i32, %c0_i32_0, %c0_i32_1 : i32, i32, i32, i32
  }
  func.func @transform_15(%arg0: i32) -> (i32, i32, i32, i32) {
    %c0_i32 = arith.constant 0 : i32
    %c0_i32_0 = arith.constant 0 : i32
    %c0_i32_1 = arith.constant 0 : i32
    %c0_i32_2 = arith.constant 0 : i32
    return %arg0, %c0_i32, %c0_i32_0, %c0_i32_1 : i32, i32, i32, i32
  }
  func.func @transform_16(%arg0: i32) -> (i32, i32, i32, i32) {
    %c0_i32 = arith.constant 0 : i32
    %c0_i32_0 = arith.constant 0 : i32
    %c0_i32_1 = arith.constant 0 : i32
    %c0_i32_2 = arith.constant 0 : i32
    return %arg0, %c0_i32, %c0_i32_0, %c0_i32_1 : i32, i32, i32, i32
  }
  func.func @transform_17(%arg0: i32) -> (i32, i32, i32, i32) {
    %c0_i32 = arith.constant 0 : i32
    %c0_i32_0 = arith.constant 0 : i32
    %c0_i32_1 = arith.constant 0 : i32
    %c0_i32_2 = arith.constant 0 : i32
    return %arg0, %c0_i32, %c0_i32_0, %c0_i32_1 : i32, i32, i32, i32
  }
  func.func @transform_18(%arg0: i32) -> (i32, i32, i32, i32) {
    %c0_i32 = arith.constant 0 : i32
    %c0_i32_0 = arith.constant 0 : i32
    %c0_i32_1 = arith.constant 0 : i32
    %c0_i32_2 = arith.constant 0 : i32
    return %arg0, %c0_i32, %c0_i32_0, %c0_i32_1 : i32, i32, i32, i32
  }
  func.func @transform_19(%arg0: i32) -> (i32, i32, i32, i32) {
    %c0_i32 = arith.constant 0 : i32
    %c0_i32_0 = arith.constant 0 : i32
    %c0_i32_1 = arith.constant 0 : i32
    %c0_i32_2 = arith.constant 0 : i32
    return %arg0, %c0_i32, %c0_i32_0, %c0_i32_1 : i32, i32, i32, i32
  }
  func.func @transform_20(%arg0: i32) -> (i32, i32, i32) {
    %c0_i32 = arith.constant 0 : i32
    %c0_i32_0 = arith.constant 0 : i32
    %c0_i32_1 = arith.constant 0 : i32
    return %arg0, %c0_i32, %c0_i32_0 : i32, i32, i32
  }
}

</mosaic_0001>

<bundles_post_ra>
// kernel: dual_stream_forward.3
= control target key start
LH: loop header
LB: loop body
LE: loop exit
PB: predicated region body
PF: predicated region fallthrough
CT: control target
= control target key end

     0   :  { %v328_v1 = vmov 0.0   ;;  %vm329_vm0 = vmmov 0   ;;  %vm50_vm1 = vcmask 261120   ;;  %s414_s0 = inlined_call_operand.vmem [shape: f32[2,2,32], index: 0, kind: input, shape index: {}]   ;;  %s415_s1 = inlined_call_operand.vmem [shape: bf16[32,32], index: 1, kind: input, shape index: {}]   ;;  %s416_s2 = inlined_call_operand.vmem [shape: bf16[32,32], index: 2, kind: input, shape index: {}]   ;;  %s417_s3 = inlined_call_operand.vmem [shape: f32[1,32], index: 3, kind: input, shape index: {}]   ;;  %s418_s4 = inlined_call_operand.vmem [shape: bf16[32,32], index: 4, kind: input, shape index: {}]   ;;  %s419_s5 = inlined_call_operand.vmem [shape: f32[1,32], index: 5, kind: input, shape index: {}]   ;;  %s420_s6 = inlined_call_operand.hbm [shape: f32[2,32], index: 6, kind: output, shape index: {}]  }
   0x1   :  { %v296_v0 = vld [vmem:[%s416_s2] sm:$0xff]   ;;  %269 = vmatprep.subr.bf16.mxu0 %v328_v1  ;;  %277 = vmatprep.subr.bf16.mxu1 %v328_v1  ;;  %v298_v3 = vld [vmem:[%s416_s2 + $0x8] sm:$0xff]  }
   0x2   :  { %v297_v2 = vld [vmem:[%s415_s1] sm:$0xff]   ;;  %270 = vmatpush3.bf16.msra.mxu0 %v296_v0  ;;  %273 = vmatprep.mubr.msk.bf16.mxu0 %vm329_vm0, %v328_v1  ;;  %v299_v4 = vld [vmem:[%s415_s1 + $0x8] sm:$0xff]  }
   0x3   :  { %278 = vmatpush3.bf16.msra.mxu1 %v297_v2  ;;  %271 = vmatprep.subr.bf16.mxu0 %v328_v1  ;;  %v248_v5 = vld [vmem:[%s414_s0 + $0x2] sm:$0x3]  ;;  %v25_v6 = vld [vmem:[%s414_s0] sm:$0x3] }
   0x4   :  { %279 = vmatprep.subr.bf16.mxu1 %v328_v1  ;;  %281 = vmatprep.mubr.msk.bf16.mxu1 %vm329_vm0, %v328_v1  ;;  %v29_v7 = vpack.c.bf16 %v248_v5, %v248_v5  ;;  %v26_v8 = vpack.c.bf16 %v25_v6, %v25_v6 }
   0x6   :  { %272 = vmatpush3.bf16.msra.mxu0 %v298_v3 }
   0x7   :  { %11 = vsyncpa [#allocation3], 0  ;;  %280 = vmatpush3.bf16.msra.mxu1 %v299_v4  ;;  %285 = vmatprep.subr.bf16.mxu0 %v328_v1  ;;  %v300_v9 = vld [vmem:[%s418_s4] sm:$0xff]   ;;  %v301_v10 = vld [vmem:[%s418_s4 + $0x8] sm:$0xff]   ;;  %vm226_vm2 = vcmask 254976  }
   0x8   :  { %v255_v13 = vld [vmem:[%s417_s3] ss:$0 sm:$0xff]  ;;  %s330_s3 = smov [#allocation2]  }
   0x9   :  { %274 = vmatmul.mubr.msk.bf16.vlgmr.msra.gmra.mrb[0].mxu0 %vm50_vm1, %v29_v7  ;;  %v256_v24 = vld [vmem:[%s419_s5] ss:$0 sm:$0xff]  ;;  %s240_s13 = sshll.u32 %s330_s3, 4  ;;  %s241_s13 = int_to_ptr.vmem [resolvable:$true] %s240_s13 }
   0xa   :  { %282 = vmatmul.mubr.msk.bf16.vlgmr.msra.gmra.mrb[0].mxu1 %vm50_vm1, %v26_v8  ;;  %289 = vmatprep.mubr.msk.bf16.mxu0 %vm329_vm0, %v328_v1  ;;  %s304_s14 = scalar_lea.vmem %s241_s13, 32  ;;  %p309_p1 = scmp.lt.s32.totalorder %s241_s13, %s241_s13 }
   0xb   :  { %286 = vmatpush3.bf16.msra.mxu0 %v300_v9  ;;  %p305_p0 = scmp.ne.s32.totalorder %s241_s13, %s304_s14  ;;  %p310_p2 = scmp.lt.s32.totalorder %s304_s14, %s304_s14 }
   0xc   :  { %287 = vmatprep.subr.bf16.mxu0 %v328_v1 }
   0xd   :  { %p311_p3 = por %p310_p2, %p309_p1 }
   0xf   :  { %288 = vmatpush3.bf16.msra.mxu0 %v301_v10  ;;  %p312_p4 = pnand %p311_p3, %p305_p0 }
  0xdc   :  { %v88_v11 = vpop.f32.mrb[0].mxu0 }
  0xdd   :  { %v143_v12 = vpop.f32.mrb[0].mxu1  ;;  %v275_v14 = vpop.f32.mrb[1].mxu0 }
  0xde   :  { %v144_v15 = vadd.f32 %v143_v12, %v88_v11  ;;  %v283_v16 = vpop.f32.mrb[1].mxu1  ;;  %v91_v17 = vpop.f32.mrb[2].mxu0 }
  0xdf   :  { %v146_v18 = vpop.f32.mrb[2].mxu1  ;;  %v276_v19 = vpop.f32.mrb[3].mxu0 }
  0xe0   :  { %v156_v20 = vadd.f32 %v255_v13, %v144_v15  ;;  %v284_v21 = vpop.f32.mrb[3].mxu1 }
  0xe2   :  { %v157_v22 = vmax.f32 %v156_v20, 0.0 }
  0xe4   :  { %v158_v23 = vpack.c.bf16 %v157_v22, %v157_v22 }
  0xe6   :  { %290 = vmatmul.mubr.msk.bf16.vlgmr.msra.gmra.mrb[4].mxu0 %vm50_vm1, %v158_v23 }
 0x1b9   :  { %v219_v25 = vpop.f32.mrb[4].mxu0 }
 0x1ba   :  { %v220_v26 = vadd.f32 %v256_v24, %v219_v25  ;;  %v291_v27 = vpop.f32.mrb[5].mxu0 }
 0x1bb   :  { %v222_v28 = vpop.f32.mrb[6].mxu0 }
 0x1bc   :  { %v292_v29 = vpop.f32.mrb[7].mxu0  ;;  %v225_v30 = vmul.f32 %v220_v26, %v220_v26 }
 0x1be   :  { %v227_v31 = vsel %vm226_vm2, %v225_v30, 0.0 }
 0x1bf   :  { %228 = vadd.xlane.f32.xlu0 %v227_v31 }
 0x24c   :  { %v229_v32 = vpop.xlane.xlu0 %228 }
 0x24d   :  { %v230_v33 = vmax.f32 %v229_v32, 1e-24 }
 0x24f   :  { %302 = vrsqrt.f32 %v230_v33 }
 0x259   :  { %v303_v34 = vpop.eup %302 }
 0x25a   :  { %v232_v35 = vmul.f32 %v303_v34, %v220_v26 }
 0x25c   :  { %233 = vst.msk [vmem:[#allocation2] sm:$0x3] %vm226_vm2, %v232_v35 }
 0x25d   :  { %315 = shalt.err (!%p312_p4)
}
 0x25e   :  { %s316_s16 = scalar_lea.hbm %s420_s6, 32 }
 0x25f   :  { %p317_p5 = scmp.ne.s32.totalorder %s420_s6, %s316_s16  ;;  %p320_p6 = scmp.lt.u32.totalorder %s316_s16, %s420_s6 }
 0x261   :  { %p322_p7 = pnand %p320_p6, %p317_p5 }
 0x263   :  { %325 = shalt.err (!%p322_p7)
}
 0x264   :  { %243 = dma.vmem_to_hbm [thread:$0]  %s241_s13, 32, %s420_s6, [#allocation3]  }
 0x265   :  { %326 = dma.done.wait [#allocation3], 32  }
 0x266   :  { %327 = vsyncadd [#allocation3], 4294967264 }
 0x267   :  { %247 = vsyncpa [#allocation3], 1 }

// kernel: dual_stream_forward.2
= control target key start
LH: loop header
LB: loop body
LE: loop exit
PB: predicated region body
PF: predicated region fallthrough
CT: control target
= control target key end

     0   :  { %s6420_s0 = inlined_call_operand.vmem [shape: f32[2,10,6], index: 0, kind: input, shape index: {}]   ;;  %s6421_s1 = inlined_call_operand.vmem [shape: f32[2,8,5], index: 1, kind: input, shape index: {}]   ;;  %s6422_s2 = inlined_call_operand.vmem [shape: bf16[6,32], index: 2, kind: input, shape index: {}]   ;;  %s6423_s3 = inlined_call_operand.vmem [shape: f32[1,32], index: 3, kind: input, shape index: {}]   ;;  %s6424_s4 = inlined_call_operand.vmem [shape: bf16[5,32], index: 4, kind: input, shape index: {}]   ;;  %s6425_s5 = inlined_call_operand.vmem [shape: f32[1,32], index: 5, kind: input, shape index: {}]   ;;  %s6426_s6 = inlined_call_operand.vmem [shape: f32[10,32], index: 6, kind: input, shape index: {}]   ;;  %s6427_s7 = inlined_call_operand.vmem [shape: f32[2,1,32], index: 7, kind: input, shape index: {}]   ;;  %s6428_s8 = inlined_call_operand.vmem [shape: bf16[2,2,32,96], index: 8, kind: input, shape index: {}]   ;;  %s6429_s9 = inlined_call_operand.vmem [shape: f32[2,2,1,96], index: 9, kind: input, shape index: {}]   ;;  %s6430_s10 = inlined_call_operand.vmem [shape: bf16[2,2,32,32], index: 10, kind: input, shape index: {}]   ;;  %s6431_s11 = inlined_call_operand.vmem [shape: f32[2,2,1,32], index: 11, kind: input, shape index: {}]   ;;  %s6432_s12 = inlined_call_operand.vmem [shape: bf16[2,2,32,128], index: 12, kind: input, shape index: {}]   ;;  %s6433_s13 = inlined_call_operand.vmem [shape: f32[2,2,1,128], index: 13, kind: input, shape index: {}]   ;;  %s6434_s14 = inlined_call_operand.vmem [shape: bf16[2,2,128,32], index: 14, kind: input, shape index: {}]   ;;  %s6435_s15 = inlined_call_operand.vmem [shape: f32[2,2,1,32], index: 15, kind: input, shape index: {}]   ;;  %s6436_s16 = inlined_call_operand.vmem [shape: f32[2,2,1,32], index: 16, kind: input, shape index: {}]   ;;  %s6437_s17 = inlined_call_operand.vmem [shape: f32[2,2,1,32], index: 17, kind: input, shape index: {}]   ;;  %s6438_s18 = inlined_call_operand.vmem [shape: f32[2,2,1,32], index: 18, kind: input, shape index: {}]   ;;  %s6439_s19 = inlined_call_operand.vmem [shape: f32[2,2,1,32], index: 19, kind: input, shape index: {}]   ;;  %s6440_s20 = inlined_call_operand.vmem [shape: f32[2,2,32], index: 20, kind: output, shape index: {}]  }
   0x1   :  { %6446 = sst [smem:[#allocation6_spill]] %s6420_s0 }
   0x2   :  { %6447 = sst [smem:[#allocation7_spill]] %s6421_s1  ;;  %s5442_s1 = smov 0  }
   0x3   :  { %6448 = sst [smem:[#allocation8_spill]] %s6422_s2 }
   0x4   :  { %6449 = sst [smem:[#allocation9_spill]] %s6423_s3 }
   0x5   :  { %6450 = sst [smem:[#allocation10_spill]] %s6424_s4 }
   0x6   :  { %6451 = sst [smem:[#allocation11_spill]] %s6427_s7 }
   0x7   :  { %6452 = sst [smem:[#allocation12_spill]] %s6428_s8 }
   0x8   :  { %6453 = sst [smem:[#allocation13_spill]] %s6429_s9 }
   0x9   :  { %6454 = sst [smem:[#allocation14_spill]] %s6430_s10 }
   0xa   :  { %6455 = sst [smem:[#allocation15_spill]] %s6431_s11 }
   0xb   :  { %6456 = sst [smem:[#allocation16_spill]] %s6432_s12 }
   0xc   :  { %6457 = sst [smem:[#allocation17_spill]] %s6433_s13 }
   0xd   :  { %6458 = sst [smem:[#allocation18_spill]] %s6434_s14 }
   0xe LB: > { %6459 = sst [smem:[#allocation3_spill]] %s5321_s1  ;;  %s5448_s22 = sadd.s32 4294967295, %s5321_s1   ;;  %s5321_s1 = sphi %s5442_s1, %s30_s1  }
   0xf   : > { %p4480_p0 = scmp.ge.s32.totalorder %s5321_s1, 1  ;;  %p672_p1 = scmp.lt.s32.totalorder %s5321_s1, 3 }
  0x11   : > { %p673_p2 = pnand %p4480_p0, %p672_p1 }
  0x13   : > { %676 = sbr.rel (%p673_p2) target bundleno = 5821 (0x16bd), region = 100 }
  0x1a   : > { %vm839_vm0 = vcmask 261120   ;;  %p848_p3 = scmp.eq.s32.totalorder %s5448_s22, 0  ;;  %p779_p4 = scmp.lt.s32.totalorder %s5448_s22, 1  ;;  %v5323_v0 = vmov 0.0   ;;  %vm845_vm1 = vcmask 253952  }
  0x1b   : > { %840 = vst.msk [vmem:[#allocation2] sm:$0xff] %vm839_vm0, %v5323_v0  ;;  %841 = vst.msk [vmem:[#allocation2 + $0x8] sm:$0xff] %vm839_vm0, %v5323_v0  ;;  %s6460_s7 = sld [smem:[#allocation11_spill]]  ;;  %s6461_s8 = sld [smem:[#allocation12_spill]] }
  0x1c   : > { %842 = vst.msk [vmem:[#allocation2 + $0x10] sm:$0xff] %vm839_vm0, %v5323_v0  ;;  %843 = vst.msk [vmem:[#allocation2 + $0x18] sm:$0xff] %vm839_vm0, %v5323_v0  ;;  %s780_s23 = scalar_select %p779_p4, %s5448_s22, 1 }
  0x1d   : > { %s6462_s9 = sld [smem:[#allocation13_spill]]  ;;  %s6464_s10 = sld [smem:[#allocation14_spill]] }
  0x1e   : > { %s4633_s3 = sshll.u32 %s780_s23, 5  ;;  %s5471_s4 = sshll.u32 %s780_s23, 1 }
  0x1f   : > { %s6466_s11 = sld [smem:[#allocation15_spill]]  ;;  %s6467_s12 = sld [smem:[#allocation16_spill]] }
  0x20   : > { %s6468_s13 = sld [smem:[#allocation17_spill]]  ;;  %s4636_s21 = sshll.u32 %s780_s23, 7 }
  0x21   : > { %s781_s25 = scalar_lea.vmem %s6460_s7, %s780_s23  ;;  %s5469_s28 = scalar_lea.vmem %s6461_s8, %s4633_s3 }
  0x22   : > { %v844_v1 = vld [vmem:[%s781_s25] sm:$0x1]  ;;  %s6469_s14 = sld [smem:[#allocation18_spill]]  ;;  %s5510_s27 = scalar_lea.vmem %s6435_s15, %s5471_s4 }
  0x23   : > { %s5477_s0 = scalar_lea.vmem %s6462_s9, %s5471_s4  ;;  %s5482_s2 = scalar_lea.vmem %s6464_s10, %s4633_s3  ;;  %846 = vst.msk [vmem:[#allocation2] sm:$0x1] %vm845_vm1, %v844_v1  ;;  %847 = vst.msk [vmem:[#allocation2 + $0x10] sm:$0x1] %vm845_vm1, %v844_v1 }
  0x24   : > { %6463 = sst [smem:[#allocation4_spill]] %s5477_s0  ;;  %s5516_s1 = scalar_lea.vmem %s6436_s16, %s5471_s4 }
  0x25   : > { %6465 = sst [smem:[#allocation5_spill]] %s5482_s2  ;;  %s5488_s7 = scalar_lea.vmem %s6466_s11, %s5471_s4 }
  0x26   : > { %s5493_s25 = scalar_lea.vmem %s6467_s12, %s4633_s3  ;;  %s5499_s9 = scalar_lea.vmem %s6468_s13, %s5471_s4 }
  0x27   : > { %s5522_s30 = scalar_lea.vmem %s6437_s17, %s5471_s4  ;;  %s5528_s10 = scalar_lea.vmem %s6438_s18, %s5471_s4 }
  0x28   : > { %s5504_s2 = scalar_lea.vmem %s6469_s14, %s4636_s21  ;;  %s5534_s0 = scalar_lea.vmem %s6439_s19, %s5471_s4 }
  0x29   : > { %p4498_p5 = scmp.ne.s32.totalorder %s5448_s22, 0 }
  0x2a   : > { %s6470_s29 = sld [smem:[#allocation8_spill]] (!%p4498_p5)  ;;  %vm970_vm2 = vcmask (!%p4498_p5), 1042432   ;;  %v864_v3 = vlaneseq (!%p4498_p5)  ;;  %s6471_s21 = sld [smem:[#allocation6_spill]] (!%p4498_p5)  ;;  %v5324_v7 = vmov (!%p4498_p5), 1983009808   ;;  %vm963_vm3 = vcmask (!%p4498_p5), 48128  }
  0x2b   : > { %851 = sbr.rel (%p4498_p5) target bundleno = 286 (0x11e), region = 104  ;;  %v862_v8 = vunpack.c.l.s4 (!%p4498_p5), %v5324_v7  ;;  %v1022_v38 = vld [vmem:[%s6426_s6] sm:$0xff] (!%p4498_p5)  ;;  %v1023_v39 = vld [vmem:[%s6426_s6 + $0x8] sm:$0x3] (!%p4498_p5)  ;;  %vm1031_vm4 = vcmask (!%p4498_p5), 1041408   ;;  %s6472_s26 = sld [smem:[#allocation9_spill]] (!%p4498_p5) }
  0x2c   : > { %v865_v9 = vshrl.u32 (!%p4498_p5), %v864_v3, 7  ;;  %v1032_v40 = vrot.slane (!%p4498_p5), %v1022_v38, 6  ;;  %v1033_v41 = vrot.slane (!%p4498_p5), %v1023_v39, 6  ;;  %vm1042_vm5 = vcmask (!%p4498_p5), 257024  }
  0x2d   : > { %v863_v11 = vunpack.c.0.s8 (!%p4498_p5), %v862_v8  ;;  %vm1027_vm6 = vcmask (!%p4498_p5), 254976   ;;  %vm1040_vm7 = vcmask (!%p4498_p5), 261122  }
  0x2e   : > { %v1034_v44 = vsel (!%p4498_p5), %vm1031_vm4, %v1032_v40, %v1033_v41 }
  0x2f   : > { %v866_v13 = vsub.s32 (!%p4498_p5), %v863_v11, %v865_v9 }
  0x30   : > { %v955_v2 = vld [vmem:[%s6470_s29] sm:$0x7] (!%p4498_p5)  ;;  %v854_v6 = vld [vmem:[%s6471_s21 + $0x10] sm:$0xff] (!%p4498_p5) }
  0x31   : > { %5042 = vmatprep.subr.msk.bf16.mxu0 (!%p4498_p5), %vm970_vm2, %v955_v2  ;;  %v972_v4 = vsel (!%p4498_p5), %vm970_vm2, %v955_v2, 0  ;;  %v852_v5 = vld [vmem:[%s6471_s21] sm:$0xff] (!%p4498_p5)  ;;  %v884_v12 = vcombine.high (!%p4498_p5), %v854_v6, %v854_v6  ;;  %v4499_v14 = vld.sshfl [vmem:[%s6471_s21 + $0x8] sm:$0x3 pattern:$0x76325410] (!%p4498_p5)  ;;  %v891_v17 = vrot.slane (!%p4498_p5), %v854_v6, %v866_v13 }
  0x32   : > { %4751 = vmatpush3.bf16.msra.mxu0 %v972_v4  ;;  %v860_v10 = vcombine.high %v852_v5, %v852_v5  ;;  %v867_v15 = vrot.slane %v852_v5, %v866_v13  ;;  %v4500_v19 = vld.sshfl [vmem:[%s6471_s21 + $0x18] sm:$0x3 pattern:$0x76325410]  ;;  %v4501_v42 = vld [vmem:[%s6472_s26] ss:$0 sm:$0xff] }
  0x33   : > { %v898_v18 = vrot.slane %v884_v12, %v866_v13  ;;  %v899_v22 = vcombine.high %v891_v17, %v891_v17  ;;  %v925_v24 = vcombine.low %v4499_v14, %v891_v17 }
  0x34   : > { %v874_v16 = vrot.slane %v860_v10, %v866_v13  ;;  %v875_v20 = vcombine.high %v867_v15, %v867_v15 }
  0x35   : > { %v900_v23 = vcombine.high %v898_v18, %v898_v18  ;;  %v926_v27 = vcombine.low %v899_v22, %v898_v18  ;;  %v933_v29 = vrot.slane %v925_v24, %v866_v13 }
  0x36   : > { %v876_v21 = vcombine.high %v874_v16, %v874_v16  ;;  %v908_v25 = vcombine.low %v867_v15, %v875_v20 }
  0x37   : > { %v942_v28 = vcombine.low %v900_v23, %v4500_v19  ;;  %v940_v32 = vrot.slane %v926_v27, %v866_v13 }
  0x38   : > { %v909_v26 = vcombine.low %v874_v16, %v876_v21  ;;  %v916_v30 = vrot.slane %v908_v25, %v866_v13 }
  0x39   : > { %v949_v33 = vrot.slane %v942_v28, %v866_v13  ;;  %v941_v35 = vcombine.low %v933_v29, %v940_v32 }
  0x3a   : > { %v923_v31 = vrot.slane %v909_v26, %v866_v13 }
  0x3b   : > { %v954_v36 = vpack.c.bf16 %v949_v33, %v949_v33 }
  0x3c   : > { %v924_v34 = vcombine.low %v916_v30, %v923_v31 }
  0x3e   : > { %v953_v37 = vpack.c.bf16 %v941_v35, %v924_v34 }
  0x40   : > { %4752 = vmatprep.mubr.msk.bf16.mxu0 %vm963_vm3, %v953_v37 }
  0x41   : > { %4753 = vmatmul.mubr.msk.bf16.vlgmr.msra.gmra.mrb[0].mxu0 %vm963_vm3, %v954_v36 }
 0x114   : > { %v4754_v43 = vpop.f32.mrb[0].mxu0 }
 0x115   : > { %v1017_v45 = vadd.f32 %v4754_v43, %v4501_v42  ;;  %v1008_v46 = vpop.f32.mrb[1].mxu0 }
 0x116   : > { %v1009_v47 = vadd.f32 %v4501_v42, %v1008_v46  ;;  %v4755_v48 = vpop.f32.mrb[2].mxu0 }
 0x117   : > { %v1038_v49 = vadd.f32 %v1034_v44, %v1017_v45  ;;  %v1011_v50 = vpop.f32.mrb[3].mxu0 }
 0x118   : > { %v1024_v51 = vadd.f32 %v1022_v38, %v1009_v47  ;;  %v1012_v52 = vadd.f32 %v4501_v42, %v1011_v50 }
 0x119   : > { %1043 = vst.msk [vmem:[#allocation2 + $0x17] sm:$0xf] %vm1042_vm5, %v1038_v49 }
 0x11a   : > { %1026 = vst.msk [vmem:[#allocation2 + $0x1] sm:$0xff] %vm839_vm0, %v1024_v51  ;;  %v1025_v53 = vadd.f32 %v1023_v39, %v1012_v52  ;;  %v1037_v54 = vadd.f32 %v1032_v40, %v1012_v52 }
 0x11c   : > { %1028 = vst.msk [vmem:[#allocation2 + $0x9] sm:$0x3] %vm1027_vm6, %v1025_v53 }
 0x11d   : > { %1041 = vst.msk [vmem:[#allocation2 + $0xf] sm:$0xfc] %vm1040_vm7, %v1037_v54 }
 0x11e PF: > { %p4504_p6 = scmp.ne.s32.totalorder %s5448_s22, 1 }
 0x11f   : > { %s6473_s14 = sld [smem:[#allocation10_spill]] (!%p4504_p6)  ;;  %vm1063_vm8 = vcmask (!%p4504_p6), 1041408   ;;  %vm1064_vm9 = vcmask (!%p4504_p6), 1042432   ;;  %v5325_v56 = vmov (!%p4504_p6), 0.0   ;;  %v5326_v57 = vmov (!%p4504_p6), 65535   ;;  %s6474_s23 = sld [smem:[#allocation7_spill]] (!%p4504_p6) }
 0x120   : > { %1047 = sbr.rel (%p4504_p6) target bundleno = 518 (0x206), region = 108  ;;  %4756 = vmatprep.subr.bf16.mxu0 (!%p4504_p6), %v5325_v56  ;;  %v1065_v58 = vsel (!%p4504_p6), %vm1063_vm8, 4294967295, %v5326_v57  ;;  %vm5327_vm10 = vmmov (!%p4504_p6), 0   ;;  %vm1059_vm11 = vcmask (!%p4504_p6), 39936   ;;  %v4505_v1 = vld [vmem:[%s6425_s5] ss:$0 sm:$0xff] (!%p4504_p6) }
 0x121   : > { %v1066_v61 = vsel (!%p4504_p6), %vm1064_vm9, %v1065_v58, 0  ;;  %4758 = vmatprep.mubr.msk.bf16.mxu0 (!%p4504_p6), %vm5327_vm10, %v5325_v56  ;;  %v1111_v3 = vld [vmem:[%s6426_s6] sm:$0xff] (!%p4504_p6) }
 0x125   : > { %v1051_v55 = vld [vmem:[%s6473_s14] sm:$0x7] (!%p4504_p6)  ;;  %v1049_v60 = vld [vmem:[%s6474_s23 + $0x8] sm:$0xff] (!%p4504_p6) }
 0x126   : > { %v1048_v59 = vld [vmem:[%s6474_s23] sm:$0xff] (!%p4504_p6)  ;;  %v1068_v62 = vand.u32 (!%p4504_p6), %v1066_v61, %v1051_v55 }
 0x127   : > { %v1050_v63 = vpack.c.bf16 %v1049_v60, %v1048_v59 }
 0x128   : > { %4757 = vmatpush3.bf16.msra.mxu0 %v1068_v62 }
 0x12b   : > { %4759 = vmatmul.mubr.msk.bf16.vlgmr.msra.gmra.mrb[0].mxu0 %vm1059_vm11, %v1050_v63 }
 0x1fe   : > { %v1104_v2 = vpop.f32.mrb[0].mxu0 }
 0x1ff   : > { %v1105_v4 = vadd.f32 %v4505_v1, %v1104_v2  ;;  %v4760_v5 = vpop.f32.mrb[1].mxu0 }
 0x200   : > { %v1107_v6 = vpop.f32.mrb[2].mxu0 }
 0x201   : > { %v1112_v7 = vadd.f32 %v1111_v3, %v1105_v4  ;;  %v1108_v8 = vadd.f32 %v4505_v1, %v1107_v6  ;;  %v4761_v9 = vpop.f32.mrb[3].mxu0 }
 0x203   : > { %1113 = vst.msk [vmem:[#allocation2 + $0x1] sm:$0xff] %vm839_vm0, %v1112_v7  ;;  %v1114_v10 = vadd.f32 %v1111_v3, %v1108_v8 }
 0x205   : > { %1116 = vst.msk [vmem:[#allocation2 + $0x11] sm:$0xff] %vm839_vm0, %v1114_v10 }
 0x206 PF: > { %v5127_v11 = vld [vmem:[%s5469_s28] sm:$0xff]   ;;  %4788 = vmatprep.subr.bf16.mxu0 %v5323_v0  ;;  %s6475_s29 = sld [smem:[#allocation4_spill]]  ;;  %v5128_v12 = vld [vmem:[%s5469_s28 + $0x8] sm:$0xff]   ;;  %s5328_s12 = smov 112   ;;  %vm5330_vm12 = vmmov 0   ;;  %vm1222_vm13 = vcmask 64512   ;;  %v1118_v53 = vlaneseq }
 0x207   : > { %4762 = vmatprep.subr.bf16.mxu1 %v5127_v11  ;;  %s5329_s24 = smov 120   ;;  %4790 = vmatprep.mubr.msk.bf16.mxu0 %vm5330_vm12, %v5323_v0  ;;  %s5331_s13 = smov 104   ;;  %vm1649_vm15 = vcmask 130048   ;;  %vm2266_vm1 = vcmask 195584   ;;  %vm4280_vm2 = vcmask 254976  }
 0x208   : > { %4763 = vmatpush3.bf16.msra.mxu1 %v5127_v11  ;;  %s5332_s26 = smov 96   ;;  %s5333_s8 = smov 64   ;;  %v1119_v54 = vand.u32 127, %v1118_v53 }
 0x209   : > { %4764 = vmatprep.subr.bf16.mxu1 %v5128_v12  ;;  %s1117_s3 = scalar_select %p848_p3, 11, 9 }
 0x20a   : > { %v1120_v13 = vld [vmem:[#allocation2] sm:$0xff]  ;;  %v1121_v14 = vld [vmem:[#allocation2 + $0x8] sm:$0xff]  ;;  %s6478_s22 = sld [smem:[#allocation5_spill]]  ;;  %s5334_s14 = smov 8  }
 0x20b   : > { %v1124_v16 = vpack.c.bf16 %v1121_v14, %v1120_v13  ;;  %v1629_v55 = vstv %s1117_s3  ;;  %s5335_s3 = smov 16   ;;  %s5336_s11 = smov 24  }
 0x20c   : > { %v1122_v15 = vld [vmem:[#allocation2 + $0x10] sm:$0xff]  ;;  %v1123_v17 = vld [vmem:[#allocation2 + $0x18] sm:$0xff]  ;;  %4765 = vmatpush3.bf16.msra.mxu1 %v5128_v12  ;;  %v4507_v20 = vld [vmem:[%s6475_s29] ss:$0 sm:$0xff]  ;;  %vm5684_vm14 = vcmp.lt.s32.totalorder %v1119_v54, %v1629_v55 }
 0x20d   : > { %4766 = vmatprep.mubr.msk.bf16.mxu1 %vm839_vm0, %v1124_v16  ;;  %v1125_v18 = vpack.c.bf16 %v1123_v17, %v1122_v15  ;;  %4770 = vmatprep.subr.bf16.mxu1 %v5323_v0 }
 0x20f   : > { %4767 = vmatmul.mubr.msk.bf16.vlgmr.msra.gmra.mrb[0].mxu1 %vm839_vm0, %v1125_v18 }
 0x210   : > { %4772 = vmatprep.mubr.msk.bf16.mxu1 %vm5330_vm12, %v5323_v0 }
 0x2e2   : > { %v4768_v19 = vpop.f32.mrb[0].mxu1 }
 0x2e3   : > { %v1189_v21 = vpop.f32.mrb[1].mxu1  ;;  %v1198_v23 = vadd.f32 %v4768_v19, %v4507_v20 }
 0x2e4   : > { %v4769_v22 = vpop.f32.mrb[2].mxu1  ;;  %v1190_v26 = vadd.f32 %v4507_v20, %v1189_v21 }
 0x2e5   : > { %v1201_v24 = vadd.f32 %v4769_v22, %v4507_v20  ;;  %v1192_v25 = vpop.f32.mrb[3].mxu1 }
 0x2e6   : > { %v1193_v27 = vadd.f32 %v4507_v20, %v1192_v25 }
 0x2e7   : > { %v5591_v28 = vpack.c.bf16 %v1201_v24, %v1198_v23 }
 0x2e8   : > { %v1204_v29 = vpack.c.bf16 %v1193_v27, %v1190_v26 }
 0x2ea   : > { %1212 = vrot.lane.b32.xlu1 %v1204_v29, %s5328_s12  ;;  %1208 = vrot.lane.b32.xlu0 %v1204_v29, %s5329_s24 }
 0x2ee   : > { %1214 = vrot.lane.b32.xlu1 %v5591_v28, %s5328_s12  ;;  %1210 = vrot.lane.b32.xlu0 %v5591_v28, %s5329_s24 }
 0x2f2   : > { %1218 = vrot.lane.b32.xlu1 %v5591_v28, %s5331_s13  ;;  %1216 = vrot.lane.b32.xlu0 %v1204_v29, %s5331_s13 }
 0x2f6   : > { %1270 = vrot.lane.b32.xlu1 %v5591_v28, %s5332_s26  ;;  %1220 = vrot.lane.b32.xlu0 %v1204_v29, %s5332_s26 }
 0x35c   : > { %v5609_v30 = vpop.permute.xlu1 %1212  ;;  %v5611_v31 = vpop.permute.xlu0 %1208 }
 0x35d   : > { %1319 = vrot.lane.b32.xlu0 %v5611_v31, %s5332_s26 }
 0x360   : > { %v5615_v32 = vpop.permute.xlu0 %1210  ;;  %v5621_v33 = vpop.permute.xlu1 %1214 }
 0x361   : > { %1417 = vrot.lane.b32.xlu0 %v5609_v30, %s5332_s26  ;;  %1368 = vrot.lane.b32.xlu1 %v5615_v32, %s5332_s26 }
 0x364   : > { %v5623_v34 = vpop.permute.xlu0 %1216  ;;  %v5629_v35 = vpop.permute.xlu1 %1218 }
 0x365   : > { %1466 = vrot.lane.b32.xlu1 %v5621_v33, %s5332_s26  ;;  %1515 = vrot.lane.b32.xlu0 %v5623_v34, %s5332_s26 }
 0x368   : > { %v1221_v36 = vpop.permute.xlu0 %1220  ;;  %v1271_v38 = vpop.permute.xlu1 %1270 }
 0x369   : > { %v1227_v37 = vsel %vm1222_vm13, %v1221_v36, 0  ;;  %1564 = vrot.lane.b32.xlu1 %v5629_v35, %s5332_s26  ;;  %v1276_v39 = vsel %vm1222_vm13, %v1271_v38, 0 }
 0x36a   : > { %4771 = vmatpush3.bf16.xpose.msra.mxu1 %v1227_v37 }
 0x36b   : > { %4776 = vmatprep.subr.bf16.mxu1 %v5323_v0 }
 0x36d   : > { %1834 = vrot.lane.b32.xlu1 %v1204_v29, %s5333_s8 }
 0x371   : > { %4773 = vmatmul.mubr.msk.bf16.vlgmr.msra.gmra.mrb[4].mxu1 %vm1222_vm13, %v1204_v29 }
 0x372   : > { %4777 = vmatpush3.bf16.xpose.msra.mxu1 %v1276_v39  ;;  %4778 = vmatprep.mubr.msk.bf16.mxu1 %vm5330_vm12, %v5323_v0 }
 0x373   : > { %4782 = vmatprep.subr.bf16.mxu1 %v5323_v0 }
 0x379   : > { %4779 = vmatmul.mubr.msk.bf16.vlgmr.msra.gmra.mrb[8].mxu1 %vm1222_vm13, %v5591_v28 }
 0x37a   : > { %4784 = vmatprep.mubr.msk.bf16.mxu1 %vm5330_vm12, %v5323_v0 }
 0x3cf   : > { %v1320_v40 = vpop.permute.xlu0 %1319 }
 0x3d0   : > { %v1325_v41 = vsel %vm1222_vm13, %v1320_v40, 0 }
 0x3d1   : > { %4783 = vmatpush3.bf16.xpose.msra.mxu1 %v1325_v41 }
 0x3d2   : > { %4794 = vmatprep.subr.bf16.mxu1 %v5323_v0 }
 0x3d3   : > { %v1369_v42 = vpop.permute.xlu1 %1368  ;;  %v1418_v44 = vpop.permute.xlu0 %1417 }
 0x3d4   : > { %v1374_v43 = vsel %vm1222_vm13, %v1369_v42, 0  ;;  %v1423_v45 = vsel %vm1222_vm13, %v1418_v44, 0 }
 0x3d5   : > { %4789 = vmatpush3.bf16.xpose.msra.mxu0 %v1374_v43 }
 0x3d6   : > { %4800 = vmatprep.subr.bf16.mxu0 %v5323_v0 }
 0x3d7   : > { %v1467_v46 = vpop.permute.xlu1 %1466  ;;  %v1516_v48 = vpop.permute.xlu0 %1515 }
 0x3d8   : > { %4785 = vmatmul.mubr.msk.bf16.vlgmr.msra.gmra.mrb[12].mxu1 %vm1222_vm13, %v5611_v31  ;;  %v1472_v47 = vsel %vm1222_vm13, %v1467_v46, 0  ;;  %v1521_v49 = vsel %vm1222_vm13, %v1516_v48, 0 }
 0x3d9   : > { %4795 = vmatpush3.bf16.xpose.msra.mxu1 %v1423_v45  ;;  %4796 = vmatprep.mubr.msk.bf16.mxu1 %vm5330_vm12, %v5323_v0 }
 0x3da   : > { %4806 = vmatprep.subr.bf16.mxu1 %v5323_v0 }
 0x3db   : > { %v1565_v50 = vpop.permute.xlu1 %1564 }
 0x3dc   : > { %4791 = vmatmul.mubr.msk.bf16.vlgmr.msra.gmra.mrb[0].mxu0 %vm1222_vm13, %v5615_v32  ;;  %v1570_v51 = vsel %vm1222_vm13, %v1565_v50, 0 }
 0x3dd   : > { %4801 = vmatpush3.bf16.xpose.msra.mxu0 %v1472_v47  ;;  %4802 = vmatprep.mubr.msk.bf16.mxu0 %vm5330_vm12, %v5323_v0 }
 0x3de   : > { %4812 = vmatprep.subr.bf16.mxu0 %v5323_v0 }
 0x3df   : > { %v1835_v52 = vpop.permute.xlu1 %1834 }
 0x3e0   : > { %4797 = vmatmul.mubr.msk.bf16.vlgmr.msra.gmra.mrb[16].mxu1 %vm1222_vm13, %v5609_v30 }
 0x3e1   : > { %4807 = vmatpush3.bf16.xpose.msra.mxu1 %v1521_v49  ;;  %4808 = vmatprep.mubr.msk.bf16.mxu1 %vm5330_vm12, %v5323_v0 }
 0x3e2   : > { %4818 = vmatprep.subr.bf16.mxu1 %v5323_v0 }
 0x3e4   : > { %4803 = vmatmul.mubr.msk.bf16.vlgmr.msra.gmra.mrb[4].mxu0 %vm1222_vm13, %v5621_v33 }
 0x3e5   : > { %4813 = vmatpush3.bf16.xpose.msra.mxu0 %v1570_v51  ;;  %4814 = vmatprep.mubr.msk.bf16.mxu0 %vm5330_vm12, %v5323_v0 }
 0x3e6   : > { %4824 = vmatprep.subr.bf16.mxu0 %v5323_v0 }
 0x3e8   : > { %4809 = vmatmul.mubr.msk.bf16.vlgmr.msra.gmra.mrb[20].mxu1 %vm1222_vm13, %v5623_v34 }
 0x3e9   : > { %4819 = vmatpush3.bf16.msra.mxu1 %v1835_v52  ;;  %4820 = vmatprep.mubr.msk.bf16.mxu1 %vm5330_vm12, %v5323_v0 }
 0x3ea   : > { %4830 = vmatprep.subr.bf16.mxu1 %v5323_v0 }
 0x3ec   : > { %4815 = vmatmul.mubr.msk.bf16.vlgmr.msra.gmra.mrb[8].mxu0 %vm1222_vm13, %v5629_v35 }
 0x3ed   : > { %4826 = vmatprep.mubr.msk.bf16.mxu0 %vm5330_vm12, %v5323_v0 }
 0x444   : > { %v1263_v56 = vpop.f32.mrb[4].mxu1 }
 0x445   : > { %v1613_v58 = vmul.f32 0.35355338, %v1263_v56  ;;  %v4774_v59 = vpop.f32.mrb[5].mxu1 }
 0x446   : > { %v1266_v60 = vpop.f32.mrb[6].mxu1 }
 0x447   : > { %v1614_v61 = vmul.f32 0.35355338, %v1266_v60  ;;  %v4775_v62 = vpop.f32.mrb[7].mxu1  ;;  %v5690_v63 = vsel %vm5684_vm14, %v1613_v58, -1e+30 }
 0x448   : > { %v1650_v1 = vsel %vm1649_vm15, %v5690_v63, -inf }
 0x449   : > { %1651 = vmax.xlane.f32.xlu0 %v1650_v1  ;;  %v5696_v2 = vsel %vm5684_vm14, %v1614_v61, -1e+30 }
 0x44a   : > { %v1653_v3 = vsel %vm1649_vm15, %v5696_v2, -inf }
 0x44b   : > { %1654 = vmax.xlane.f32.xlu1 %v1653_v3 }
 0x44c   : > { %v1312_v4 = vpop.f32.mrb[8].mxu1 }
 0x44d   : > { %v1615_v5 = vmul.f32 0.35355338, %v1312_v4  ;;  %v4780_v6 = vpop.f32.mrb[9].mxu1 }
 0x44e   : > { %v1315_v7 = vpop.f32.mrb[10].mxu1 }
 0x44f   : > { %v1616_v8 = vmul.f32 0.35355338, %v1315_v7  ;;  %v4781_v9 = vpop.f32.mrb[11].mxu1  ;;  %v5702_v10 = vsel %vm5684_vm14, %v1615_v5, -1e+30 }
 0x450   : > { %v1656_v11 = vsel %vm1649_vm15, %v5702_v10, -inf }
 0x451   : > { %1657 = vmax.xlane.f32.xlu0 %v1656_v11  ;;  %v5708_v12 = vsel %vm5684_vm14, %v1616_v8, -1e+30 }
 0x452   : > { %v1659_v13 = vsel %vm1649_vm15, %v5708_v12, -inf }
 0x455   : > { %1660 = vmax.xlane.f32.xlu0 %v1659_v13 }
 0x4ab   : > { %v1361_v14 = vpop.f32.mrb[12].mxu1 }
 0x4ac   : > { %v4786_v15 = vpop.f32.mrb[13].mxu1  ;;  %v1617_v19 = vmul.f32 0.35355338, %v1361_v14 }
 0x4ad   : > { %v1364_v16 = vpop.f32.mrb[14].mxu1 }
 0x4ae   : > { %v4787_v17 = vpop.f32.mrb[15].mxu1  ;;  %v1618_v22 = vmul.f32 0.35355338, %v1364_v16  ;;  %v5724_v38 = vsel %vm5684_vm14, %v1617_v19, -1e+30 }
 0x4af   : > { %v1410_v18 = vpop.f32.mrb[0].mxu0  ;;  %v1662_v44 = vsel %vm1649_vm15, %v5724_v38, -inf }
 0x4b0   : > { %v1619_v20 = vmul.f32 0.35355338, %v1410_v18  ;;  %v4792_v21 = vpop.f32.mrb[1].mxu0  ;;  %v5730_v42 = vsel %vm5684_vm14, %v1618_v22, -1e+30 }
 0x4b1   : > { %v1413_v23 = vpop.f32.mrb[2].mxu0  ;;  %v1665_v50 = vsel %vm1649_vm15, %v5730_v42, -inf }
 0x4b2   : > { %v1620_v24 = vmul.f32 0.35355338, %v1413_v23  ;;  %v4793_v25 = vpop.f32.mrb[3].mxu0  ;;  %v5714_v26 = vsel %vm5684_vm14, %v1619_v20, -1e+30 }
 0x4b3   : > { %v1459_v27 = vpop.f32.mrb[16].mxu1  ;;  %v1668_v29 = vsel %vm1649_vm15, %v5714_v26, -inf }
 0x4b4   : > { %v4798_v36 = vpop.f32.mrb[17].mxu1  ;;  %1669 = vmax.xlane.f32.xlu1 %v1668_v29  ;;  %v5720_v37 = vsel %vm5684_vm14, %v1620_v24, -1e+30  ;;  %v1621_v45 = vmul.f32 0.35355338, %v1459_v27 }
 0x4b5   : > { %v1462_v39 = vpop.f32.mrb[18].mxu1  ;;  %v1671_v40 = vsel %vm1649_vm15, %v5720_v37, -inf }
 0x4b6   : > { %v4799_v41 = vpop.f32.mrb[19].mxu1  ;;  %1672 = vmax.xlane.f32.xlu0 %v1671_v40  ;;  %v1622_v48 = vmul.f32 0.35355338, %v1462_v39  ;;  %v5748_v59 = vsel %vm5684_vm14, %v1621_v45, -1e+30 }
 0x4b7   : > { %v1508_v43 = vpop.f32.mrb[4].mxu0  ;;  %v1674_v4 = vsel %vm1649_vm15, %v5748_v59, -inf }
 0x4b8   : > { %v1623_v46 = vmul.f32 0.35355338, %v1508_v43  ;;  %v4804_v47 = vpop.f32.mrb[5].mxu0  ;;  %1663 = vmax.xlane.f32.xlu1 %v1662_v44  ;;  %v5754_v1 = vsel %vm5684_vm14, %v1622_v48, -1e+30 }
 0x4b9   : > { %v1511_v49 = vpop.f32.mrb[6].mxu0  ;;  %v1677_v11 = vsel %vm1649_vm15, %v5754_v1, -inf }
 0x4ba   : > { %v1624_v51 = vmul.f32 0.35355338, %v1511_v49  ;;  %v4805_v52 = vpop.f32.mrb[7].mxu0  ;;  %1666 = vmax.xlane.f32.xlu0 %v1665_v50  ;;  %v5738_v53 = vsel %vm5684_vm14, %v1623_v46, -1e+30 }
 0x4bb   : > { %v1557_v54 = vpop.f32.mrb[20].mxu1  ;;  %v1680_v55 = vsel %vm1649_vm15, %v5738_v53, -inf }
 0x4bc   : > { %v4810_v56 = vpop.f32.mrb[21].mxu1  ;;  %1681 = vmax.xlane.f32.xlu1 %v1680_v55  ;;  %v5744_v58 = vsel %vm5684_vm14, %v1624_v51, -1e+30  ;;  %v1625_v5 = vmul.f32 0.35355338, %v1557_v54 }
 0x4bd   : > { %v1560_v60 = vpop.f32.mrb[22].mxu1  ;;  %v1683_v61 = vsel %vm1649_vm15, %v5744_v58, -inf }
 0x4be   : > { %v4811_v62 = vpop.f32.mrb[23].mxu1  ;;  %1684 = vmax.xlane.f32.xlu0 %v1683_v61  ;;  %v1626_v8 = vmul.f32 0.35355338, %v1560_v60  ;;  %v5772_v18 = vsel %vm5684_vm14, %v1625_v5, -1e+30 }
 0x4bf   : > { %v1606_v3 = vpop.f32.mrb[8].mxu0  ;;  %v1686_v21 = vsel %vm1649_vm15, %v5772_v18, -inf }
 0x4c0   : > { %v1627_v6 = vmul.f32 0.35355338, %v1606_v3  ;;  %v4816_v7 = vpop.f32.mrb[9].mxu0  ;;  %1675 = vmax.xlane.f32.xlu1 %v1674_v4  ;;  %v5778_v20 = vsel %vm5684_vm14, %v1626_v8, -1e+30 }
 0x4c1   : > { %v1609_v9 = vpop.f32.mrb[10].mxu0  ;;  %v1689_v22 = vsel %vm1649_vm15, %v5778_v20, -inf }
 0x4c2   : > { %v1628_v13 = vmul.f32 0.35355338, %v1609_v9  ;;  %v4817_v14 = vpop.f32.mrb[11].mxu0  ;;  %1678 = vmax.xlane.f32.xlu0 %v1677_v11  ;;  %v5762_v15 = vsel %vm5684_vm14, %v1627_v6, -1e+30 }
 0x4c3   : > { %v1692_v16 = vsel %vm1649_vm15, %v5762_v15, -inf }
 0x4c4   : > { %1693 = vmax.xlane.f32.xlu1 %v1692_v16  ;;  %v5768_v17 = vsel %vm5684_vm14, %v1628_v13, -1e+30 }
 0x4c5   : > { %v1695_v19 = vsel %vm1649_vm15, %v5768_v17, -inf }
 0x4c6   : > { %1696 = vmax.xlane.f32.xlu0 %v1695_v19 }
 0x4c8   : > { %1687 = vmax.xlane.f32.xlu1 %v1686_v21 }
 0x4ca   : > { %1690 = vmax.xlane.f32.xlu0 %v1689_v22 }
 0x4d6   : > { %v1652_v23 = vpop.xlane.xlu0 %1651 }
 0x4d8   : > { %v1655_v25 = vpop.xlane.xlu1 %1654 }
 0x4d9   : > { %1928 = vrot.lane.b32.xlu1 %v5611_v31, %s5333_s8  ;;  %v1699_v27 = vsub.f32 %v5696_v2, %v1655_v25  ;;  %v1698_v31 = vsub.f32 %v5690_v63, %v1652_v23 }
 0x4db   : > { %v1716_v36 = vmul.f32 1.442695, %v1699_v27  ;;  %v1714_v39 = vmul.f32 1.442695, %v1698_v31 }
 0x4dd   : > { %1975 = vrot.lane.b32.xlu1 %v5615_v32, %s5333_s8  ;;  %5155 = vpow2.f32 %v1716_v36 }
 0x4de   : > { %v1658_v24 = vpop.xlane.xlu0 %1657  ;;  %5157 = vpow2.f32 %v1714_v39 }
 0x4e0   : > { %1881 = vrot.lane.b32.xlu0 %v5591_v28, %s5333_s8  ;;  %v1700_v28 = vsub.f32 %v5702_v10, %v1658_v24 }
 0x4e1   : > { %2069 = vrot.lane.b32.xlu1 %v5621_v33, %s5333_s8 }
 0x4e2   : > { %v1661_v29 = vpop.xlane.xlu0 %1660  ;;  %v1718_v33 = vmul.f32 1.442695, %v1700_v28 }
 0x4e3   : > { %v1701_v32 = vsub.f32 %v5708_v12, %v1661_v29 }
 0x4e4   : > { %2022 = vrot.lane.b32.xlu0 %v5609_v30, %s5333_s8 }
 0x4e5   : > { %v1720_v40 = vmul.f32 1.442695, %v1701_v32 }
 0x4e7   : > { %5159 = vpow2.f32 %v1720_v40  ;;  %v5798_v30 = vpop.eup %5155 }
 0x4e8   : > { %5161 = vpow2.f32 %v1718_v33  ;;  %v5800_v41 = vpop.eup %5157  ;;  %v1749_v2 = vsel %vm1649_vm15, %v5798_v30, 0.0 }
 0x4e9   : > { %v1746_v12 = vsel %vm1649_vm15, %v5800_v41, 0.0 }
 0x4f1   : > { %v5804_v63 = vpop.eup %5159 }
 0x4f2   : > { %v5808_v10 = vpop.eup %5161  ;;  %v1755_v43 = vsel %vm1649_vm15, %v5804_v63, 0.0 }
 0x4f3   : > { %v1752_v44 = vsel %vm1649_vm15, %v5808_v10, 0.0 }
 0x503   : > { %1750 = vadd.xlane.f32.xlu0 %v1749_v2 }
 0x505   : > { %1747 = vadd.xlane.f32.xlu1 %v1746_v12 }
 0x507   : > { %1756 = vadd.xlane.f32.xlu0 %v1755_v43 }
 0x509   : > { %1753 = vadd.xlane.f32.xlu1 %v1752_v44 }
 0x541   : > { %v1670_v45 = vpop.xlane.xlu1 %1669 }
 0x542   : > { %v1704_v46 = vsub.f32 %v5714_v26, %v1670_v45 }
 0x543   : > { %v1673_v47 = vpop.xlane.xlu0 %1672 }
 0x544   : > { %v1726_v48 = vmul.f32 1.442695, %v1704_v46  ;;  %v1705_v49 = vsub.f32 %v5720_v37, %v1673_v47 }
 0x545   : > { %v1664_v50 = vpop.xlane.xlu1 %1663 }
 0x546   : > { %5163 = vpow2.f32 %v1726_v48  ;;  %v1728_v51 = vmul.f32 1.442695, %v1705_v49  ;;  %v1702_v52 = vsub.f32 %v5724_v38, %v1664_v50 }
 0x547   : > { %v1667_v54 = vpop.xlane.xlu0 %1666 }
 0x548   : > { %5165 = vpow2.f32 %v1728_v51  ;;  %v1722_v55 = vmul.f32 1.442695, %v1702_v52  ;;  %v1703_v56 = vsub.f32 %v5730_v42, %v1667_v54 }
 0x549   : > { %v1682_v60 = vpop.xlane.xlu1 %1681 }
 0x54a   : > { %5167 = vpow2.f32 %v1722_v55  ;;  %v1724_v61 = vmul.f32 1.442695, %v1703_v56  ;;  %v1708_v62 = vsub.f32 %v5738_v53, %v1682_v60 }
 0x54b   : > { %v1685_v26 = vpop.xlane.xlu0 %1684 }
 0x54c   : > { %5169 = vpow2.f32 %v1724_v61  ;;  %v1734_v3 = vmul.f32 1.442695, %v1708_v62  ;;  %v1709_v37 = vsub.f32 %v5744_v58, %v1685_v26 }
 0x54d   : > { %v1676_v4 = vpop.xlane.xlu1 %1675 }
 0x54e   : > { %5171 = vpow2.f32 %v1734_v3  ;;  %v1736_v5 = vmul.f32 1.442695, %v1709_v37  ;;  %v1706_v38 = vsub.f32 %v5748_v59, %v1676_v4 }
 0x54f   : > { %v1679_v6 = vpop.xlane.xlu0 %1678 }
 0x550   : > { %v5821_v7 = vpop.eup %5163  ;;  %5173 = vpow2.f32 %v1736_v5  ;;  %v1730_v42 = vmul.f32 1.442695, %v1706_v38  ;;  %v1707_v8 = vsub.f32 %v5754_v1, %v1679_v6 }
 0x551   : > { %v1694_v9 = vpop.xlane.xlu1 %1693  ;;  %v1764_v53 = vsel %vm1649_vm15, %v5821_v7, 0.0 }
 0x552   : > { %v5826_v11 = vpop.eup %5165  ;;  %5175 = vpow2.f32 %v1730_v42  ;;  %v1732_v58 = vmul.f32 1.442695, %v1707_v8  ;;  %v1712_v13 = vsub.f32 %v5762_v15, %v1694_v9  ;;  %1765 = vadd.xlane.f32.xlu1 %v1764_v53 }
 0x553   : > { %v1697_v14 = vpop.xlane.xlu0 %1696  ;;  %v1767_v59 = vsel %vm1649_vm15, %v5826_v11, 0.0 }
 0x554   : > { %v5831_v16 = vpop.eup %5167  ;;  %5177 = vpow2.f32 %v1732_v58  ;;  %v1742_v19 = vmul.f32 1.442695, %v1712_v13  ;;  %v1713_v1 = vsub.f32 %v5768_v17, %v1697_v14  ;;  %1768 = vadd.xlane.f32.xlu0 %v1767_v59 }
 0x555   : > { %v1688_v21 = vpop.xlane.xlu1 %1687  ;;  %v1758_v22 = vsel %vm1649_vm15, %v5831_v16, 0.0 }
 0x556   : > { %v5836_v23 = vpop.eup %5169  ;;  %5179 = vpow2.f32 %v1742_v19  ;;  %v1744_v15 = vmul.f32 1.442695, %v1713_v1  ;;  %v1710_v24 = vsub.f32 %v5772_v18, %v1688_v21  ;;  %1759 = vadd.xlane.f32.xlu1 %v1758_v22 }
 0x557   : > { %v1691_v25 = vpop.xlane.xlu0 %1690  ;;  %v1761_v27 = vsel %vm1649_vm15, %v5836_v23, 0.0 }
 0x558   : > { %v5841_v29 = vpop.eup %5171  ;;  %5181 = vpow2.f32 %v1744_v15  ;;  %v1738_v17 = vmul.f32 1.442695, %v1710_v24  ;;  %v1711_v31 = vsub.f32 %v5778_v20, %v1691_v25  ;;  %1762 = vadd.xlane.f32.xlu0 %v1761_v27 }
 0x559   : > { %v1776_v36 = vsel %vm1649_vm15, %v5841_v29, 0.0  ;;  %v1929_v50 = vpop.permute.xlu1 %1928 }
 0x55a   : > { %v5846_v32 = vpop.eup %5173  ;;  %5183 = vpow2.f32 %v1738_v17  ;;  %v1740_v39 = vmul.f32 1.442695, %v1711_v31  ;;  %1777 = vadd.xlane.f32.xlu1 %v1776_v36 }
 0x55b   : > { %v1882_v18 = vpop.permute.xlu0 %1881  ;;  %v1779_v28 = vsel %vm1649_vm15, %v5846_v32, 0.0 }
 0x55c   : > { %v5850_v40 = vpop.eup %5175  ;;  %5185 = vpow2.f32 %v1740_v39  ;;  %1780 = vadd.xlane.f32.xlu0 %v1779_v28  ;;  %4825 = vmatpush3.bf16.msra.mxu0 %v1882_v18 }
 0x55d   : > { %v1770_v20 = vsel %vm1649_vm15, %v5850_v40, 0.0  ;;  %4836 = vmatprep.subr.bf16.mxu0 %v5323_v0  ;;  %v1976_v51 = vpop.permute.xlu1 %1975 }
 0x55e   : > { %v5855_v33 = vpop.eup %5177  ;;  %1771 = vadd.xlane.f32.xlu1 %v1770_v20 }
 0x55f   : > { %v1773_v2 = vsel %vm1649_vm15, %v5855_v33, 0.0  ;;  %v5879_v52 = vpop.permute.xlu0 %2022 }
 0x560   : > { %v5859_v12 = vpop.eup %5179  ;;  %1774 = vadd.xlane.f32.xlu0 %v1773_v2 }
 0x561   : > { %v1788_v43 = vsel %vm1649_vm15, %v5859_v12, 0.0  ;;  %v2070_v54 = vpop.permute.xlu1 %2069 }
 0x562   : > { %v5863_v44 = vpop.eup %5181  ;;  %1789 = vadd.xlane.f32.xlu1 %v1788_v43 }
 0x563   : > { %v1791_v45 = vsel %vm1649_vm15, %v5863_v44, 0.0 }
 0x564   : > { %v5867_v46 = vpop.eup %5183  ;;  %1792 = vadd.xlane.f32.xlu0 %v1791_v45 }
 0x565   : > { %v1782_v47 = vsel %vm1649_vm15, %v5867_v46, 0.0 }
 0x566   : > { %v5871_v48 = vpop.eup %5185  ;;  %1783 = vadd.xlane.f32.xlu1 %v1782_v47 }
 0x567   : > { %v1785_v49 = vsel %vm1649_vm15, %v5871_v48, 0.0 }
 0x568   : > { %1786 = vadd.xlane.f32.xlu0 %v1785_v49 }
 0x577   : > { %2163 = vrot.lane.b32.xlu1 %v5629_v35, %s5333_s8 }
 0x57e   : > { %2116 = vrot.lane.b32.xlu0 %v5623_v34, %s5333_s8 }
 0x590   : > { %v1751_v55 = vpop.xlane.xlu0 %1750 }
 0x591   : > { %5187 = vrcp.f32 %v1751_v55 }
 0x592   : > { %v1748_v56 = vpop.xlane.xlu1 %1747 }
 0x593   : > { %5189 = vrcp.f32 %v1748_v56 }
 0x594   : > { %v1757_v60 = vpop.xlane.xlu0 %1756 }
 0x595   : > { %5191 = vrcp.f32 %v1757_v60 }
 0x596   : > { %v1754_v61 = vpop.xlane.xlu1 %1753 }
 0x597   : > { %5193 = vrcp.f32 %v1754_v61 }
 0x59b   : > { %v5188_v62 = vpop.eup %5187 }
 0x59c   : > { %v1811_v35 = vmul.f32 %v5188_v62, %v5798_v30 }
 0x59d   : > { %v5190_v26 = vpop.eup %5189 }
 0x59e   : > { %v1810_v3 = vmul.f32 %v5190_v26, %v5800_v41 }
 0x59f   : > { %v5192_v34 = vpop.eup %5191 }
 0x5a0   : > { %v1826_v37 = vpack.c.bf16 %v1811_v35, %v1810_v3  ;;  %v1813_v5 = vmul.f32 %v5192_v34, %v5804_v63 }
 0x5a1   : > { %v5194_v4 = vpop.eup %5193 }
 0x5a2   : > { %v1812_v38 = vmul.f32 %v5194_v4, %v5808_v10  ;;  %4821 = vmatmul.mubr.msk.bf16.vlgmr.msra.gmra.mrb[24].mxu1 %vm1649_vm15, %v1826_v37 }
 0x5a3   : > { %4831 = vmatpush3.bf16.msra.mxu1 %v1929_v50  ;;  %4832 = vmatprep.mubr.msk.bf16.mxu1 %vm5330_vm12, %v5323_v0 }
 0x5a4   : > { %v1827_v6 = vpack.c.bf16 %v1813_v5, %v1812_v38  ;;  %4842 = vmatprep.subr.bf16.mxu1 %v5323_v0 }
 0x5a6   : > { %4827 = vmatmul.mubr.msk.bf16.vlgmr.msra.gmra.mrb[12].mxu0 %vm1649_vm15, %v1827_v6 }
 0x5a7   : > { %4837 = vmatpush3.bf16.msra.mxu0 %v1976_v51  ;;  %4838 = vmatprep.mubr.msk.bf16.mxu0 %vm5330_vm12, %v5323_v0 }
 0x5a8   : > { %4848 = vmatprep.subr.bf16.mxu0 %v5323_v0 }
 0x5df   : > { %v1766_v30 = vpop.xlane.xlu1 %1765 }
 0x5e0   : > { %5195 = vrcp.f32 %v1766_v30 }
 0x5e1   : > { %v1769_v41 = vpop.xlane.xlu0 %1768 }
 0x5e2   : > { %5197 = vrcp.f32 %v1769_v41 }
 0x5e3   : > { %v1760_v63 = vpop.xlane.xlu1 %1759 }
 0x5e4   : > { %5199 = vrcp.f32 %v1760_v63  ;;  %v5129_v63 = vld [vmem:[%s6478_s22] sm:$0xff]  }
 0x5e5   : > { %v1763_v10 = vpop.xlane.xlu0 %1762 }
 0x5e6   : > { %5201 = vrcp.f32 %v1763_v10 }
 0x5e7   : > { %v1778_v42 = vpop.xlane.xlu1 %1777 }
 0x5e8   : > { %5203 = vrcp.f32 %v1778_v42 }
 0x5e9   : > { %v1781_v8 = vpop.xlane.xlu0 %1780 }
 0x5ea   : > { %v5196_v9 = vpop.eup %5195  ;;  %5205 = vrcp.f32 %v1781_v8 }
 0x5eb   : > { %v1772_v53 = vpop.xlane.xlu1 %1771  ;;  %v1816_v13 = vmul.f32 %v5196_v9, %v5821_v7 }
 0x5ec   : > { %v5198_v58 = vpop.eup %5197  ;;  %5207 = vrcp.f32 %v1772_v53  ;;  %v5130_v53 = vld [vmem:[%s6478_s22 + $0x8] sm:$0xff]  }
 0x5ed   : > { %v1817_v14 = vmul.f32 %v5198_v58, %v5826_v11  ;;  %v1775_v59 = vpop.xlane.xlu0 %1774 }
 0x5ee   : > { %v5200_v19 = vpop.eup %5199  ;;  %5209 = vrcp.f32 %v1775_v59 }
 0x5ef   : > { %v1790_v1 = vpop.xlane.xlu1 %1789  ;;  %v1829_v21 = vpack.c.bf16 %v1817_v14, %v1816_v13  ;;  %v1814_v15 = vmul.f32 %v5200_v19, %v5831_v16 }
 0x5f0   : > { %v5202_v22 = vpop.eup %5201  ;;  %5211 = vrcp.f32 %v1790_v1 }
 0x5f1   : > { %v1815_v24 = vmul.f32 %v5202_v22, %v5836_v23  ;;  %4839 = vmatmul.mubr.msk.bf16.vlgmr.msra.gmra.mrb[16].mxu0 %vm1649_vm15, %v1829_v21  ;;  %v1793_v25 = vpop.xlane.xlu0 %1792 }
 0x5f2   : > { %v5204_v27 = vpop.eup %5203  ;;  %4849 = vmatpush3.bf16.msra.mxu0 %v2070_v54  ;;  %5213 = vrcp.f32 %v1793_v25  ;;  %4850 = vmatprep.mubr.msk.bf16.mxu0 %vm5330_vm12, %v5323_v0 }
 0x5f3   : > { %v1784_v7 = vpop.xlane.xlu1 %1783  ;;  %v1828_v11 = vpack.c.bf16 %v1815_v24, %v1814_v15  ;;  %4860 = vmatprep.subr.bf16.mxu0 %v5323_v0  ;;  %v1820_v31 = vmul.f32 %v5204_v27, %v5841_v29 }
 0x5f4   : > { %v5206_v17 = vpop.eup %5205  ;;  %5215 = vrcp.f32 %v1784_v7 }
 0x5f5   : > { %v1821_v16 = vmul.f32 %v5206_v17, %v5846_v32  ;;  %4833 = vmatmul.mubr.msk.bf16.vlgmr.msra.gmra.mrb[28].mxu1 %vm1649_vm15, %v1828_v11  ;;  %v1787_v23 = vpop.xlane.xlu0 %1786 }
 0x5f6   : > { %v5208_v36 = vpop.eup %5207  ;;  %4843 = vmatpush3.bf16.msra.mxu1 %v5879_v52  ;;  %5217 = vrcp.f32 %v1787_v23  ;;  %4844 = vmatprep.mubr.msk.bf16.mxu1 %vm5330_vm12, %v5323_v0 }
 0x5f7   : > { %v2164_v39 = vpop.permute.xlu1 %2163  ;;  %v1831_v18 = vpack.c.bf16 %v1821_v16, %v1820_v31  ;;  %4854 = vmatprep.subr.bf16.mxu1 %v5323_v0  ;;  %v1818_v20 = vmul.f32 %v5208_v36, %v5850_v40 }
 0x5f8   : > { %v5210_v28 = vpop.eup %5209 }
 0x5f9   : > { %v1819_v29 = vmul.f32 %v5210_v28, %v5855_v33  ;;  %4851 = vmatmul.mubr.msk.bf16.vlgmr.msra.gmra.mrb[20].mxu0 %vm1649_vm15, %v1831_v18  ;;  %v2117_v49 = vpop.permute.xlu0 %2116 }
 0x5fa   : > { %v5212_v32 = vpop.eup %5211  ;;  %4861 = vmatpush3.bf16.msra.mxu0 %v2164_v39  ;;  %4862 = vmatprep.mubr.msk.bf16.mxu0 %vm5330_vm12, %v5323_v0 }
 0x5fb   : > { %v1830_v2 = vpack.c.bf16 %v1819_v29, %v1818_v20  ;;  %v1824_v45 = vmul.f32 %v5212_v32, %v5859_v12 }
 0x5fc   : > { %v5214_v43 = vpop.eup %5213 }
 0x5fd   : > { %v1825_v47 = vmul.f32 %v5214_v43, %v5863_v44  ;;  %4845 = vmatmul.mubr.msk.bf16.vlgmr.msra.gmra.mrb[32].mxu1 %vm1649_vm15, %v1830_v2 }
 0x5fe   : > { %v5216_v50 = vpop.eup %5215  ;;  %4855 = vmatpush3.bf16.msra.mxu1 %v2117_v49  ;;  %4856 = vmatprep.mubr.msk.bf16.mxu1 %vm5330_vm12, %v5323_v0 }
 0x5ff   : > { %v1833_v40 = vpack.c.bf16 %v1825_v47, %v1824_v45  ;;  %v1822_v51 = vmul.f32 %v5216_v50, %v5867_v46  ;;  %4866 = vmatprep.subr.bf16.mxu1 %v5129_v63 }
 0x600   : > { %v5218_v33 = vpop.eup %5217 }
 0x601   : > { %v1823_v52 = vmul.f32 %v5218_v33, %v5871_v48  ;;  %4863 = vmatmul.mubr.msk.bf16.vlgmr.msra.gmra.mrb[24].mxu0 %vm1649_vm15, %v1833_v40 }
 0x603   : > { %v1832_v54 = vpack.c.bf16 %v1823_v52, %v1822_v51 }
 0x605   : > { %4857 = vmatmul.mubr.msk.bf16.vlgmr.msra.gmra.mrb[36].mxu1 %vm1649_vm15, %v1832_v54 }
 0x606   : > { %4867 = vmatpush3.bf16.msra.mxu1 %v5129_v63 }
 0x607   : > { %4868 = vmatprep.subr.bf16.mxu1 %v5130_v53 }
 0x60a   : > { %4869 = vmatpush3.bf16.msra.mxu1 %v5130_v53 }
 0x675   : > { %v5922_v12 = vpop.f32.mrb[24].mxu1 }
 0x676   : > { %v4822_v44 = vpop.f32.mrb[25].mxu1 }
 0x677   : > { %v5924_v55 = vpop.f32.mrb[26].mxu1 }
 0x678   : > { %v4823_v56 = vpop.f32.mrb[27].mxu1 }
 0x679   : > { %v1921_v60 = vpop.f32.mrb[12].mxu0 }
 0x67a   : > { %v4828_v61 = vpop.f32.mrb[13].mxu0 }
 0x67b   : > { %v1924_v62 = vpop.f32.mrb[14].mxu0 }
 0x67c   : > { %v4829_v26 = vpop.f32.mrb[15].mxu0 }
 0x6c4   : > { %v2015_v35 = vpop.f32.mrb[16].mxu0 }
 0x6c5   : > { %v4840_v46 = vpop.f32.mrb[17].mxu0 }
 0x6c6   : > { %v2018_v3 = vpop.f32.mrb[18].mxu0 }
 0x6c7   : > { %v5067_v48 = vpack.i.bf16 %v2018_v3, %v2015_v35  ;;  %v4841_v34 = vpop.f32.mrb[19].mxu0 }
 0x6c8   : > { %v1968_v37 = vpop.f32.mrb[28].mxu1  ;;  %v4528_v34 = vld [vmem:[%s5488_s7] ss:$0 sm:$0xff] }
 0x6c9   : > { %5068 = vrot.lane.b32.xlu1 %v5067_v48, %s5334_s14  ;;  %v4834_v4 = vpop.f32.mrb[29].mxu1 }
 0x6ca   : > { %v1971_v5 = vpop.f32.mrb[30].mxu1 }
 0x6cb   : > { %v5072_v38 = vpack.i.bf16 %v1971_v5, %v1968_v37  ;;  %v4835_v6 = vpop.f32.mrb[31].mxu1 }
 0x6cc   : > { %v2109_v30 = vpop.f32.mrb[20].mxu0 }
 0x6cd   : > { %5073 = vrot.lane.b32.xlu0 %v5072_v38, %s5334_s14  ;;  %v4852_v41 = vpop.f32.mrb[21].mxu0 }
 0x6ce   : > { %v2112_v10 = vpop.f32.mrb[22].mxu0 }
 0x6cf   : > { %v5077_v42 = vpack.i.bf16 %v2112_v10, %v2109_v30  ;;  %v4853_v8 = vpop.f32.mrb[23].mxu0  ;;  %v5311_v30 = vld [vmem:[#allocation2] sm:$0xff] }
 0x6d0   : > { %v2062_v9 = vpop.f32.mrb[32].mxu1 }
 0x6d1   : > { %5078 = vrot.lane.b32.xlu1 %v5077_v42, %s5335_s3  ;;  %v4846_v58 = vpop.f32.mrb[33].mxu1  ;;  %v5312_v42 = vld [vmem:[#allocation2 + $0x8] sm:$0xff] }
 0x6d2   : > { %v2065_v13 = vpop.f32.mrb[34].mxu1 }
 0x6d3   : > { %v5082_v14 = vpack.i.bf16 %v2065_v13, %v2062_v9  ;;  %v4847_v59 = vpop.f32.mrb[35].mxu1  ;;  %v5313_v9 = vld [vmem:[#allocation2 + $0x10] sm:$0xff] }
 0x6d4   : > { %v2203_v19 = vpop.f32.mrb[24].mxu0 }
 0x6d5   : > { %5083 = vrot.lane.b32.xlu0 %v5082_v14, %s5335_s3  ;;  %v4864_v1 = vpop.f32.mrb[25].mxu0  ;;  %v5314_v14 = vld [vmem:[#allocation2 + $0x18] sm:$0xff] }
 0x6d6   : > { %v2206_v21 = vpop.f32.mrb[26].mxu0 }
 0x6d7   : > { %v5092_v22 = vpack.i.bf16 %v2206_v21, %v2203_v19  ;;  %v4865_v15 = vpop.f32.mrb[27].mxu0 }
 0x6d8   : > { %v2156_v24 = vpop.f32.mrb[36].mxu1 }
 0x6d9   : > { %5093 = vrot.lane.b32.xlu1 %v5092_v22, %s5336_s11  ;;  %v4858_v25 = vpop.f32.mrb[37].mxu1 }
 0x6da   : > { %v2159_v27 = vpop.f32.mrb[38].mxu1 }
 0x6db   : > { %v5087_v7 = vpack.i.bf16 %v2159_v27, %v2156_v24  ;;  %v4859_v11 = vpop.f32.mrb[39].mxu1 }
 0x6dd   : > { %5088 = vrot.lane.b32.xlu0 %v5087_v7, %s5336_s11 }
 0x73b   : > { %v5069_v17 = vpop.permute.xlu1 %5068 }
 0x73c   : > { %v5071_v23 = vunpack.i.h.bf16 %v5069_v17  ;;  %v5070_v36 = vunpack.i.l.bf16 %v5069_v17 }
 0x73e   : > { %v2261_v20 = vsel %vm1222_vm13, %v1924_v62, %v5071_v23  ;;  %v2260_v29 = vsel %vm1222_vm13, %v1921_v60, %v5070_v36 }
 0x73f   : > { %v5074_v31 = vpop.permute.xlu0 %5073 }
 0x740   : > { %v5076_v2 = vunpack.i.h.bf16 %v5074_v31  ;;  %v5075_v43 = vunpack.i.l.bf16 %v5074_v31 }
 0x742   : > { %v2259_v56 = vsel %vm1222_vm13, %v5924_v55, %v5076_v2  ;;  %v2258_v60 = vsel %vm1222_vm13, %v5922_v12, %v5075_v43  ;;  %v5131_v2 = vld [vmem:[%s5493_s25] sm:$0xff]   ;;  %v5132_v43 = vld [vmem:[%s5493_s25 + $0x8] sm:$0xff]  }
 0x743   : > { %v5079_v16 = vpop.permute.xlu1 %5078  ;;  %4874 = vmatprep.subr.bf16.mxu0 %v5131_v2 }
 0x744   : > { %v5081_v39 = vunpack.i.h.bf16 %v5079_v16  ;;  %v5080_v18 = vunpack.i.l.bf16 %v5079_v16  ;;  %4875 = vmatpush3.bf16.msra.mxu0 %v5131_v2 }
 0x745   : > { %4876 = vmatprep.subr.bf16.mxu0 %v5132_v43 }
 0x746   : > { %v2265_v49 = vsel %vm1649_vm15, %v2261_v20, %v5081_v39  ;;  %v2264_v50 = vsel %vm1649_vm15, %v2260_v29, %v5080_v18 }
 0x747   : > { %v5084_v28 = vpop.permute.xlu0 %5083 }
 0x748   : > { %v5086_v40 = vunpack.i.h.bf16 %v5084_v28  ;;  %v5085_v33 = vunpack.i.l.bf16 %v5084_v28  ;;  %4877 = vmatpush3.bf16.msra.mxu0 %v5132_v43 }
 0x74a   : > { %v2262_v26 = vsel %vm1649_vm15, %v2258_v60, %v5085_v33  ;;  %v2263_v35 = vsel %vm1649_vm15, %v2259_v56, %v5086_v40  ;;  %v5137_v40 = vld [vmem:[%s5504_s2 + $0x20] sm:$0xff]   ;;  %v5138_v33 = vld [vmem:[%s5504_s2 + $0x28] sm:$0xff]  }
 0x74b   : > { %v5094_v32 = vpop.permute.xlu1 %5093 }
 0x74c   : > { %v5096_v45 = vunpack.i.h.bf16 %v5094_v32  ;;  %v5095_v47 = vunpack.i.l.bf16 %v5094_v32 }
 0x74e   : > { %v2270_v51 = vsel %vm2266_vm1, %v2265_v49, %v5096_v45  ;;  %v2269_v52 = vsel %vm2266_vm1, %v2264_v50, %v5095_v47  ;;  %v5133_v45 = vld [vmem:[%s5504_s2] sm:$0xff]   ;;  %v5134_v47 = vld [vmem:[%s5504_s2 + $0x8] sm:$0xff]   ;;  %v5135_v49 = vld [vmem:[%s5504_s2 + $0x10] sm:$0xff]  }
 0x74f   : > { %v2272_v54 = vpack.c.bf16 %v2270_v51, %v2269_v52  ;;  %v5089_v44 = vpop.permute.xlu0 %5088  ;;  %4882 = vmatprep.subr.bf16.mxu1 %v5133_v45  ;;  %v5136_v50 = vld [vmem:[%s5504_s2 + $0x18] sm:$0xff]  }
 0x750   : > { %v5091_v61 = vunpack.i.h.bf16 %v5089_v44  ;;  %v5090_v62 = vunpack.i.l.bf16 %v5089_v44 }
 0x752   : > { %v2267_v46 = vsel %vm2266_vm1, %v2262_v26, %v5090_v62  ;;  %v2268_v3 = vsel %vm2266_vm1, %v2263_v35, %v5091_v61 }
 0x753   : > { %v2271_v48 = vpack.c.bf16 %v2268_v3, %v2267_v46 }
 0x755   : > { %4870 = vmatprep.mubr.msk.bf16.mxu1 %vm839_vm0, %v2271_v48 }
 0x756   : > { %4871 = vmatmul.mubr.msk.bf16.vlgmr.msra.gmra.mrb[40].mxu1 %vm839_vm0, %v2272_v54 }
 0x757   : > { %4883 = vmatpush3.bf16.msra.mxu1 %v5133_v45 }
 0x758   : > { %4884 = vmatprep.subr.bf16.mxu1 %v5134_v47 }
 0x75b   : > { %4885 = vmatpush3.bf16.msra.mxu1 %v5134_v47 }
 0x75c   : > { %4886 = vmatprep.subr.bf16.mxu1 %v5135_v49 }
 0x75f   : > { %4887 = vmatpush3.bf16.msra.mxu1 %v5135_v49 }
 0x760   : > { %4888 = vmatprep.subr.bf16.mxu1 %v5136_v50 }
 0x763   : > { %4889 = vmatpush3.bf16.msra.mxu1 %v5136_v50 }
 0x764   : > { %4890 = vmatprep.subr.bf16.mxu1 %v5137_v40 }
 0x767   : > { %4891 = vmatpush3.bf16.msra.mxu1 %v5137_v40 }
 0x768   : > { %4892 = vmatprep.subr.bf16.mxu1 %v5138_v33 }
 0x76b   : > { %4893 = vmatpush3.bf16.msra.mxu1 %v5138_v33 }
 0x829   : > { %v4872_v55 = vpop.f32.mrb[40].mxu1 }
 0x82a   : > { %v2336_v37 = vpop.f32.mrb[41].mxu1  ;;  %v2345_v4 = vadd.f32 %v4872_v55, %v4528_v34 }
 0x82b   : > { %v2337_v12 = vadd.f32 %v4528_v34, %v2336_v37  ;;  %v4873_v5 = vpop.f32.mrb[42].mxu1 }
 0x82c   : > { %v2339_v38 = vpop.f32.mrb[43].mxu1  ;;  %v2348_v63 = vadd.f32 %v4873_v5, %v4528_v34  ;;  %v2353_v53 = vadd.f32 %v5313_v9, %v2345_v4 }
 0x82d   : > { %v2340_v6 = vadd.f32 %v4528_v34, %v2339_v38  ;;  %v2351_v41 = vadd.f32 %v5311_v30, %v2337_v12  ;;  %v4533_v34 = vld [vmem:[%s5516_s1] ss:$0 sm:$0xff] }
 0x82e   : > { %v2363_v13 = vsel %vm839_vm0, %v2353_v53, 0.0  ;;  %v2354_v59 = vadd.f32 %v5314_v14, %v2348_v63  ;;  %v4534_v38 = vld [vmem:[%s5522_s30] ss:$0 sm:$0xff] }
 0x82f   : > { %v2357_v10 = vsel %vm839_vm0, %v2351_v41, 0.0  ;;  %v2352_v8 = vadd.f32 %v5312_v42, %v2340_v6 }
 0x830   : > { %2358 = vadd.xlane.f32.xlu0 %v2357_v10  ;;  %v2366_v19 = vsel %vm839_vm0, %v2354_v59, 0.0 }
 0x831   : > { %v2360_v58 = vsel %vm839_vm0, %v2352_v8, 0.0 }
 0x832   : > { %2361 = vadd.xlane.f32.xlu1 %v2360_v58 }
 0x834   : > { %2364 = vadd.xlane.f32.xlu0 %v2363_v13 }
 0x838   : > { %2367 = vadd.xlane.f32.xlu0 %v2366_v19  ;;  %v5140_v19 = vld [vmem:[%s5504_s2 + $0x38] sm:$0xff]  }
 0x8bd   : > { %v2359_v1 = vpop.xlane.xlu0 %2358 }
 0x8be   : > { %v2370_v21 = vmul.f32 0.03125, %v2359_v1  ;;  %v4535_v1 = vld [vmem:[%s5499_s9] ss:$0 sm:$0xff] }
 0x8bf   : > { %v2362_v22 = vpop.xlane.xlu1 %2361 }
 0x8c0   : > { %v5955_v15 = vsub.f32 %v2351_v41, %v2370_v21  ;;  %v2371_v24 = vmul.f32 0.03125, %v2362_v22 }
 0x8c1   : > { %v2365_v25 = vpop.xlane.xlu0 %2364 }
 0x8c2   : > { %v2375_v27 = vsub.f32 %v2352_v8, %v2371_v24  ;;  %v2372_v7 = vmul.f32 0.03125, %v2365_v25  ;;  %v2378_v11 = vmul.f32 %v5955_v15, %v5955_v15 }
 0x8c4   : > { %v5959_v17 = vsub.f32 %v2353_v53, %v2372_v7  ;;  %v2382_v31 = vsel %vm839_vm0, %v2378_v11, 0.0  ;;  %v2379_v16 = vmul.f32 %v2375_v27, %v2375_v27 }
 0x8c5   : > { %2383 = vadd.xlane.f32.xlu1 %v2382_v31  ;;  %v2368_v23 = vpop.xlane.xlu0 %2367 }
 0x8c6   : > { %v2373_v36 = vmul.f32 0.03125, %v2368_v23  ;;  %v2385_v39 = vsel %vm839_vm0, %v2379_v16, 0.0  ;;  %v2380_v18 = vmul.f32 %v5959_v17, %v5959_v17 }
 0x8c7   : > { %2386 = vadd.xlane.f32.xlu0 %v2385_v39 }
 0x8c8   : > { %v2377_v28 = vsub.f32 %v2354_v59, %v2373_v36  ;;  %v2388_v20 = vsel %vm839_vm0, %v2380_v18, 0.0  ;;  %v5139_v59 = vld [vmem:[%s5504_s2 + $0x30] sm:$0xff]   ;;  %v4540_v18 = vld [vmem:[%s5510_s27] ss:$0 sm:$0xff] }
 0x8c9   : > { %2389 = vadd.xlane.f32.xlu1 %v2388_v20  ;;  %4894 = vmatprep.subr.bf16.mxu1 %v5139_v59 }
 0x8ca   : > { %v2381_v29 = vmul.f32 %v2377_v28, %v2377_v28  ;;  %4895 = vmatpush3.bf16.msra.mxu1 %v5139_v59 }
 0x8cb   : > { %4896 = vmatprep.subr.bf16.mxu1 %v5140_v19 }
 0x8cc   : > { %v2391_v32 = vsel %vm839_vm0, %v2381_v29, 0.0 }
 0x8cd   : > { %2392 = vadd.xlane.f32.xlu0 %v2391_v32 }
 0x8ce   : > { %4897 = vmatpush3.bf16.msra.mxu1 %v5140_v19 }
 0x8cf   : > { %4928 = vmatprep.subr.bf16.mxu1 %v5323_v0 }
 0x952   : > { %v2384_v51 = vpop.xlane.xlu1 %2383 }
 0x953   : > { %v2394_v52 = vmul.f32 0.03125, %v2384_v51 }
 0x954   : > { %v2387_v54 = vpop.xlane.xlu0 %2386 }
 0x955   : > { %v2398_v44 = vadd.f32 1e-05, %v2394_v52  ;;  %v2395_v56 = vmul.f32 0.03125, %v2387_v54 }
 0x956   : > { %v2390_v60 = vpop.xlane.xlu1 %2389 }
 0x957   : > { %5219 = vrsqrt.f32 %v2398_v44  ;;  %v2399_v61 = vadd.f32 1e-05, %v2395_v56  ;;  %v2396_v62 = vmul.f32 0.03125, %v2390_v60 }
 0x959   : > { %5221 = vrsqrt.f32 %v2399_v61  ;;  %v2400_v26 = vadd.f32 1e-05, %v2396_v62 }
 0x95a   : > { %v2393_v35 = vpop.xlane.xlu0 %2392 }
 0x95b   : > { %5223 = vrsqrt.f32 %v2400_v26  ;;  %v2397_v46 = vmul.f32 0.03125, %v2393_v35 }
 0x95d   : > { %v2401_v3 = vadd.f32 1e-05, %v2397_v46 }
 0x95f   : > { %5225 = vrsqrt.f32 %v2401_v3 }
 0x961   : > { %v5220_v48 = vpop.eup %5219 }
 0x962   : > { %v2406_v55 = vmul.f32 %v5220_v48, %v5955_v15 }
 0x963   : > { %v5222_v37 = vpop.eup %5221 }
 0x964   : > { %v2407_v4 = vmul.f32 %v5222_v37, %v2375_v27  ;;  %v2416_v12 = vmul.f32 %v4533_v34, %v2406_v55 }
 0x965   : > { %v5224_v5 = vpop.eup %5223 }
 0x966   : > { %v2408_v6 = vmul.f32 %v5224_v5, %v5959_v17  ;;  %v2417_v30 = vmul.f32 %v4533_v34, %v2407_v4  ;;  %v2426_v41 = vadd.f32 %v4534_v38, %v2416_v12 }
 0x968   : > { %v2427_v63 = vadd.f32 %v4534_v38, %v2417_v30  ;;  %v2418_v9 = vmul.f32 %v4533_v34, %v2408_v6 }
 0x969   : > { %v5226_v10 = vpop.eup %5225 }
 0x96a   : > { %v2409_v42 = vmul.f32 %v5226_v10, %v2377_v28  ;;  %v2430_v8 = vpack.c.bf16 %v2427_v63, %v2426_v41  ;;  %v2428_v58 = vadd.f32 %v4534_v38, %v2418_v9  ;;  %v5141_v10 = vld [vmem:[%s5469_s28 + $0x10] sm:$0xff]  }
 0x96b   : > { %4902 = vmatprep.subr.bf16.mxu0 %v5141_v10 }
 0x96c   : > { %4878 = vmatprep.mubr.msk.bf16.mxu0 %vm839_vm0, %v2430_v8  ;;  %v2419_v53 = vmul.f32 %v4533_v34, %v2409_v42  ;;  %v5142_v42 = vld [vmem:[%s5469_s28 + $0x18] sm:$0xff]   ;;  %s6479_s28 = scalar_lea.vmem %s6440_s20, %s5471_s4 }
 0x96e   : > { %v2429_v13 = vadd.f32 %v4534_v38, %v2419_v53 }
 0x970   : > { %v2431_v14 = vpack.c.bf16 %v2429_v13, %v2428_v58 }
 0x972   : > { %4879 = vmatmul.mubr.msk.bf16.vlgmr.msra.gmra.mrb[28].mxu0 %vm839_vm0, %v2431_v14 }
 0x973   : > { %4903 = vmatpush3.bf16.msra.mxu0 %v5141_v10 }
 0x974   : > { %4904 = vmatprep.subr.bf16.mxu0 %v5142_v42 }
 0x977   : > { %4905 = vmatpush3.bf16.msra.mxu0 %v5142_v42 }
 0x978   : > { %4910 = vmatprep.subr.bf16.mxu0 %v5323_v0 }
 0xa45   : > { %v4880_v21 = vpop.f32.mrb[28].mxu0 }
 0xa46   : > { %v2504_v22 = vadd.f32 %v4880_v21, %v4535_v1  ;;  %v2495_v15 = vpop.f32.mrb[29].mxu0 }
 0xa47   : > { %v2496_v24 = vadd.f32 %v4535_v1, %v2495_v15  ;;  %v4881_v25 = vpop.f32.mrb[30].mxu0 }
 0xa48   : > { %v2507_v27 = vadd.f32 %v4881_v25, %v4535_v1  ;;  %v2498_v7 = vpop.f32.mrb[31].mxu0  ;;  %v2512_v17 = vmax.f32 %v2504_v22, 0.0  ;;  %v4549_v25 = vld [vmem:[%s5528_s10] ss:$0 sm:$0xff] }
 0xa49   : > { %v2499_v11 = vadd.f32 %v4535_v1, %v2498_v7  ;;  %v2510_v16 = vmax.f32 %v2496_v24, 0.0 }
 0xa4a   : > { %v2513_v31 = vmax.f32 %v2507_v27, 0.0 }
 0xa4b   : > { %v2511_v23 = vmax.f32 %v2499_v11, 0.0 }
 0xa4c   : > { %v2515_v36 = vpack.c.bf16 %v2513_v31, %v2512_v17 }
 0xa4d   : > { %v2514_v39 = vpack.c.bf16 %v2511_v23, %v2510_v16  ;;  %v4550_v16 = vld [vmem:[%s5534_s0] ss:$0 sm:$0xff] }
 0xa4f   : > { %4898 = vmatprep.mubr.bf16.mxu1 %v2514_v39 }
 0xa50   : > { %4899 = vmatmul.mubr.bf16.vlgmr.msra.gmra.mrb[44].mxu1 %v2515_v36 }
 0xa51   : > { %4930 = vmatprep.mubr.msk.bf16.mxu1 %vm5330_vm12, %v5323_v0 }
 0xb23   : > { %v4900_v28 = vpop.f32.mrb[44].mxu1 }
 0xb24   : > { %v2621_v20 = vpop.f32.mrb[45].mxu1  ;;  %v2630_v29 = vadd.f32 %v4900_v28, %v4540_v18 }
 0xb25   : > { %v2622_v32 = vadd.f32 %v4540_v18, %v2621_v20  ;;  %v4901_v2 = vpop.f32.mrb[46].mxu1 }
 0xb26   : > { %v2624_v43 = vpop.f32.mrb[47].mxu1  ;;  %v2633_v45 = vadd.f32 %v4901_v2, %v4540_v18  ;;  %v2638_v33 = vadd.f32 %v2630_v29, %v2428_v58 }
 0xb27   : > { %v2625_v47 = vadd.f32 %v4540_v18, %v2624_v43  ;;  %v2636_v49 = vadd.f32 %v2622_v32, %v2426_v41 }
 0xb28   : > { %v2639_v52 = vadd.f32 %v2633_v45, %v2429_v13  ;;  %v2648_v54 = vsel %vm839_vm0, %v2638_v33, 0.0 }
 0xb29   : > { %v2642_v50 = vsel %vm839_vm0, %v2636_v49, 0.0  ;;  %v2637_v40 = vadd.f32 %v2625_v47, %v2427_v63 }
 0xb2a   : > { %2643 = vadd.xlane.f32.xlu1 %v2642_v50  ;;  %v2651_v44 = vsel %vm839_vm0, %v2639_v52, 0.0  ;;  %v4556_v50 = vld [vmem:[%s6475_s29 + $0x1] ss:$0 sm:$0xff] }
 0xb2b   : > { %v2645_v51 = vsel %vm839_vm0, %v2637_v40, 0.0 }
 0xb2c   : > { %2646 = vadd.xlane.f32.xlu0 %v2645_v51 }
 0xb2e   : > { %2649 = vadd.xlane.f32.xlu1 %v2648_v54 }
 0xb30   : > { %2652 = vadd.xlane.f32.xlu0 %v2651_v44 }
 0xbb7   : > { %v2644_v56 = vpop.xlane.xlu1 %2643 }
 0xbb8   : > { %v2654_v60 = vmul.f32 0.03125, %v2644_v56 }
 0xbb9   : > { %v2647_v61 = vpop.xlane.xlu0 %2646 }
 0xbba   : > { %v2658_v62 = vsub.f32 %v2636_v49, %v2654_v60  ;;  %v2655_v26 = vmul.f32 0.03125, %v2647_v61 }
 0xbbb   : > { %v2650_v35 = vpop.xlane.xlu1 %2649 }
 0xbbc   : > { %v2659_v46 = vsub.f32 %v2637_v40, %v2655_v26  ;;  %v2656_v3 = vmul.f32 0.03125, %v2650_v35  ;;  %v2662_v48 = vmul.f32 %v2658_v62, %v2658_v62 }
 0xbbd   : > { %v2653_v34 = vpop.xlane.xlu0 %2652 }
 0xbbe   : > { %v2660_v55 = vsub.f32 %v2638_v33, %v2656_v3  ;;  %v2657_v37 = vmul.f32 0.03125, %v2653_v34  ;;  %v2666_v4 = vsel %vm839_vm0, %v2662_v48, 0.0  ;;  %v2663_v12 = vmul.f32 %v2659_v46, %v2659_v46 }
 0xbbf   : > { %2667 = vadd.xlane.f32.xlu1 %v2666_v4 }
 0xbc0   : > { %v2661_v5 = vsub.f32 %v2639_v52, %v2657_v37  ;;  %v2669_v38 = vsel %vm839_vm0, %v2663_v12, 0.0  ;;  %v2664_v6 = vmul.f32 %v2660_v55, %v2660_v55 }
 0xbc1   : > { %2670 = vadd.xlane.f32.xlu0 %v2669_v38 }
 0xbc2   : > { %v2672_v30 = vsel %vm839_vm0, %v2664_v6, 0.0  ;;  %v2665_v41 = vmul.f32 %v2661_v5, %v2661_v5 }
 0xbc3   : > { %2673 = vadd.xlane.f32.xlu1 %v2672_v30 }
 0xbc4   : > { %v2675_v63 = vsel %vm839_vm0, %v2665_v41, 0.0 }
 0xbc5   : > { %2676 = vadd.xlane.f32.xlu0 %v2675_v63 }
 0xc4c   : > { %v2668_v8 = vpop.xlane.xlu1 %2667 }
 0xc4d   : > { %v2678_v9 = vmul.f32 0.03125, %v2668_v8 }
 0xc4e   : > { %v2671_v53 = vpop.xlane.xlu0 %2670 }
 0xc4f   : > { %v2682_v58 = vadd.f32 1e-05, %v2678_v9  ;;  %v2679_v13 = vmul.f32 0.03125, %v2671_v53 }
 0xc50   : > { %v2674_v14 = vpop.xlane.xlu1 %2673 }
 0xc51   : > { %5227 = vrsqrt.f32 %v2682_v58  ;;  %v2683_v59 = vadd.f32 1e-05, %v2679_v13  ;;  %v2680_v19 = vmul.f32 0.03125, %v2674_v14 }
 0xc52   : > { %v2677_v1 = vpop.xlane.xlu0 %2676 }
 0xc53   : > { %5229 = vrsqrt.f32 %v2683_v59  ;;  %v2684_v21 = vadd.f32 1e-05, %v2680_v19  ;;  %v2681_v22 = vmul.f32 0.03125, %v2677_v1 }
 0xc55   : > { %5231 = vrsqrt.f32 %v2684_v21  ;;  %v2685_v15 = vadd.f32 1e-05, %v2681_v22 }
 0xc57   : > { %5233 = vrsqrt.f32 %v2685_v15 }
 0xc5b   : > { %v5228_v24 = vpop.eup %5227 }
 0xc5c   : > { %v2690_v27 = vmul.f32 %v5228_v24, %v2658_v62 }
 0xc5d   : > { %v5230_v7 = vpop.eup %5229 }
 0xc5e   : > { %v2691_v11 = vmul.f32 %v5230_v7, %v2659_v46  ;;  %v2700_v17 = vmul.f32 %v4549_v25, %v2690_v27 }
 0xc5f   : > { %v5232_v31 = vpop.eup %5231 }
 0xc60   : > { %v2692_v23 = vmul.f32 %v5232_v31, %v2660_v55  ;;  %v2701_v36 = vmul.f32 %v4549_v25, %v2691_v11  ;;  %v6001_v28 = vadd.f32 %v4550_v16, %v2700_v17 }
 0xc61   : > { %v5234_v39 = vpop.eup %5233 }
 0xc62   : > { %v2693_v18 = vmul.f32 %v5234_v39, %v2661_v5  ;;  %v6003_v20 = vadd.f32 %v4550_v16, %v2701_v36  ;;  %v2702_v29 = vmul.f32 %v4549_v25, %v2692_v23 }
 0xc64   : > { %v2714_v32 = vpack.c.bf16 %v6003_v20, %v6001_v28  ;;  %v2703_v2 = vmul.f32 %v4549_v25, %v2693_v18  ;;  %v6008_v43 = vadd.f32 %v4550_v16, %v2702_v29 }
 0xc66   : > { %4906 = vmatprep.mubr.msk.bf16.mxu0 %vm839_vm0, %v2714_v32  ;;  %v6010_v45 = vadd.f32 %v4550_v16, %v2703_v2 }
 0xc68   : > { %v2715_v47 = vpack.c.bf16 %v6010_v45, %v6008_v43 }
 0xc6a   : > { %4907 = vmatmul.mubr.msk.bf16.vlgmr.msra.gmra.mrb[32].mxu0 %vm839_vm0, %v2715_v47 }
 0xc6b   : > { %4912 = vmatprep.mubr.msk.bf16.mxu0 %vm5330_vm12, %v5323_v0 }
 0xd3d   : > { %v4908_v49 = vpop.f32.mrb[32].mxu0 }
 0xd3e   : > { %v2781_v40 = vpop.f32.mrb[33].mxu0  ;;  %v2790_v51 = vadd.f32 %v4908_v49, %v4556_v50 }
 0xd3f   : > { %v4909_v33 = vpop.f32.mrb[34].mxu0  ;;  %v2782_v44 = vadd.f32 %v4556_v50, %v2781_v40 }
 0xd40   : > { %v2793_v52 = vadd.f32 %v4909_v33, %v4556_v50  ;;  %v2784_v54 = vpop.f32.mrb[35].mxu0 }
 0xd41   : > { %v2785_v56 = vadd.f32 %v4556_v50, %v2784_v54 }
 0xd42   : > { %v6018_v60 = vpack.c.bf16 %v2793_v52, %v2790_v51 }
 0xd43   : > { %v2796_v61 = vpack.c.bf16 %v2785_v56, %v2782_v44 }
 0xd44   : > { %2802 = vrot.lane.b32.xlu0 %v6018_v60, %s5329_s24 }
 0xd45   : > { %2800 = vrot.lane.b32.xlu1 %v2796_v61, %s5329_s24 }
 0xd48   : > { %2808 = vrot.lane.b32.xlu0 %v2796_v61, %s5331_s13 }
 0xd49   : > { %2804 = vrot.lane.b32.xlu1 %v2796_v61, %s5328_s12 }
 0xd4c   : > { %2812 = vrot.lane.b32.xlu0 %v2796_v61, %s5332_s26 }
 0xd4d   : > { %2806 = vrot.lane.b32.xlu1 %v6018_v60, %s5328_s12 }
 0xd51   : > { %2810 = vrot.lane.b32.xlu1 %v6018_v60, %s5331_s13 }
 0xd55   : > { %2861 = vrot.lane.b32.xlu1 %v6018_v60, %s5332_s26 }
 0xdb6   : > { %v6032_v62 = vpop.permute.xlu0 %2802 }
 0xdb7   : > { %2959 = vrot.lane.b32.xlu1 %v6032_v62, %s5332_s26  ;;  %v6036_v26 = vpop.permute.xlu1 %2800 }
 0xdb8   : > { %2910 = vrot.lane.b32.xlu0 %v6036_v26, %s5332_s26 }
 0xdba   : > { %v6040_v35 = vpop.permute.xlu0 %2808 }
 0xdbb   : > { %v6042_v46 = vpop.permute.xlu1 %2804 }
 0xdbc   : > { %3008 = vrot.lane.b32.xlu0 %v6042_v46, %s5332_s26 }
 0xdbe   : > { %v2813_v3 = vpop.permute.xlu0 %2812 }
 0xdbf   : > { %v2818_v48 = vsel %vm1222_vm13, %v2813_v3, 0  ;;  %v6047_v34 = vpop.permute.xlu1 %2806 }
 0xdc0   : > { %4911 = vmatpush3.bf16.xpose.msra.mxu0 %v2818_v48  ;;  %3106 = vrot.lane.b32.xlu0 %v6040_v35, %s5332_s26 }
 0xdc1   : > { %3057 = vrot.lane.b32.xlu1 %v6047_v34, %s5332_s26  ;;  %4916 = vmatprep.subr.bf16.mxu0 %v5323_v0 }
 0xdc3   : > { %v6054_v55 = vpop.permute.xlu1 %2810 }
 0xdc5   : > { %3155 = vrot.lane.b32.xlu1 %v6054_v55, %s5332_s26 }
 0xdc7   : > { %4913 = vmatmul.mubr.msk.bf16.vlgmr.msra.gmra.mrb[36].mxu0 %vm1222_vm13, %v2796_v61  ;;  %v2862_v37 = vpop.permute.xlu1 %2861 }
 0xdc8   : > { %v2867_v4 = vsel %vm1222_vm13, %v2862_v37, 0  ;;  %4918 = vmatprep.mubr.msk.bf16.mxu0 %vm5330_vm12, %v5323_v0 }
 0xdc9   : > { %3420 = vrot.lane.b32.xlu1 %v2796_v61, %s5333_s8  ;;  %4917 = vmatpush3.bf16.xpose.msra.mxu0 %v2867_v4 }
 0xdca   : > { %4922 = vmatprep.subr.bf16.mxu0 %v5323_v0 }
 0xdd0   : > { %4919 = vmatmul.mubr.msk.bf16.vlgmr.msra.gmra.mrb[40].mxu0 %vm1222_vm13, %v6018_v60 }
 0xdd1   : > { %4924 = vmatprep.mubr.msk.bf16.mxu0 %vm5330_vm12, %v5323_v0 }
 0xe29   : > { %v2960_v12 = vpop.permute.xlu1 %2959 }
 0xe2a   : > { %v2965_v5 = vsel %vm1222_vm13, %v2960_v12, 0  ;;  %v2911_v38 = vpop.permute.xlu0 %2910 }
 0xe2b   : > { %v2916_v6 = vsel %vm1222_vm13, %v2911_v38, 0  ;;  %4929 = vmatpush3.bf16.xpose.msra.mxu1 %v2965_v5 }
 0xe2c   : > { %4923 = vmatpush3.bf16.xpose.msra.mxu0 %v2916_v6  ;;  %4940 = vmatprep.subr.bf16.mxu1 %v5323_v0 }
 0xe2d   : > { %4934 = vmatprep.subr.bf16.mxu0 %v5323_v0 }
 0xe2e   : > { %v3009_v30 = vpop.permute.xlu0 %3008 }
 0xe2f   : > { %v3014_v41 = vsel %vm1222_vm13, %v3009_v30, 0 }
 0xe32   : > { %4931 = vmatmul.mubr.msk.bf16.vlgmr.msra.gmra.mrb[48].mxu1 %vm1222_vm13, %v6032_v62  ;;  %v3107_v42 = vpop.permute.xlu0 %3106 }
 0xe33   : > { %v3058_v63 = vpop.permute.xlu1 %3057  ;;  %4925 = vmatmul.mubr.msk.bf16.vlgmr.msra.gmra.mrb[44].mxu0 %vm1222_vm13, %v6036_v26  ;;  %4942 = vmatprep.mubr.msk.bf16.mxu1 %vm5330_vm12, %v5323_v0  ;;  %v3112_v9 = vsel %vm1222_vm13, %v3107_v42, 0 }
 0xe34   : > { %v3063_v10 = vsel %vm1222_vm13, %v3058_v63, 0  ;;  %4935 = vmatpush3.bf16.xpose.msra.mxu0 %v3014_v41  ;;  %4936 = vmatprep.mubr.msk.bf16.mxu0 %vm5330_vm12, %v5323_v0 }
 0xe35   : > { %4941 = vmatpush3.bf16.xpose.msra.mxu1 %v3063_v10  ;;  %4946 = vmatprep.subr.bf16.mxu0 %v5323_v0 }
 0xe36   : > { %4952 = vmatprep.subr.bf16.mxu1 %v5323_v0 }
 0xe37   : > { %v3156_v8 = vpop.permute.xlu1 %3155 }
 0xe38   : > { %v3161_v53 = vsel %vm1222_vm13, %v3156_v8, 0 }
 0xe3b   : > { %4937 = vmatmul.mubr.msk.bf16.vlgmr.msra.gmra.mrb[48].mxu0 %vm1222_vm13, %v6042_v46  ;;  %v3421_v58 = vpop.permute.xlu1 %3420 }
 0xe3c   : > { %4943 = vmatmul.mubr.msk.bf16.vlgmr.msra.gmra.mrb[52].mxu1 %vm1222_vm13, %v6047_v34  ;;  %4947 = vmatpush3.bf16.xpose.msra.mxu0 %v3112_v9 }
 0xe3d   : > { %4953 = vmatpush3.bf16.xpose.msra.mxu1 %v3161_v53  ;;  %4948 = vmatprep.mubr.msk.bf16.mxu0 %vm5330_vm12, %v5323_v0 }
 0xe3e   : > { %4954 = vmatprep.mubr.msk.bf16.mxu1 %vm5330_vm12, %v5323_v0  ;;  %4958 = vmatprep.subr.bf16.mxu0 %v5323_v0 }
 0xe3f   : > { %4964 = vmatprep.subr.bf16.mxu1 %v5323_v0 }
 0xe43   : > { %4949 = vmatmul.mubr.msk.bf16.vlgmr.msra.gmra.mrb[52].mxu0 %vm1222_vm13, %v6040_v35 }
 0xe44   : > { %4955 = vmatmul.mubr.msk.bf16.vlgmr.msra.gmra.mrb[56].mxu1 %vm1222_vm13, %v6054_v55  ;;  %4959 = vmatpush3.bf16.msra.mxu0 %v3421_v58 }
 0xe45   : > { %4960 = vmatprep.mubr.msk.bf16.mxu0 %vm5330_vm12, %v5323_v0  ;;  %4970 = vmatprep.subr.bf16.mxu0 %v5323_v0 }
 0xe46   : > { %4966 = vmatprep.mubr.msk.bf16.mxu1 %vm5330_vm12, %v5323_v0 }
 0xe9a   : > { %v2854_v13 = vpop.f32.mrb[36].mxu0 }
 0xe9b   : > { %v3204_v14 = vmul.f32 0.35355338, %v2854_v13  ;;  %v4914_v59 = vpop.f32.mrb[37].mxu0 }
 0xe9c   : > { %v2857_v19 = vpop.f32.mrb[38].mxu0 }
 0xe9d   : > { %v3205_v1 = vmul.f32 0.35355338, %v2857_v19  ;;  %v4915_v21 = vpop.f32.mrb[39].mxu0  ;;  %v6107_v22 = vsel %vm5684_vm14, %v3204_v14, -1e+30 }
 0xe9e   : > { %v3236_v15 = vsel %vm1649_vm15, %v6107_v22, -inf }
 0xe9f   : > { %3237 = vmax.xlane.f32.xlu0 %v3236_v15  ;;  %v6113_v24 = vsel %vm5684_vm14, %v3205_v1, -1e+30 }
 0xea0   : > { %v3239_v25 = vsel %vm1649_vm15, %v6113_v24, -inf }
 0xea1   : > { %3240 = vmax.xlane.f32.xlu1 %v3239_v25 }
 0xea3   : > { %v2903_v27 = vpop.f32.mrb[40].mxu0 }
 0xea4   : > { %v3206_v7 = vmul.f32 0.35355338, %v2903_v27  ;;  %v4920_v11 = vpop.f32.mrb[41].mxu0 }
 0xea5   : > { %v2906_v17 = vpop.f32.mrb[42].mxu0 }
 0xea6   : > { %v3207_v31 = vmul.f32 0.35355338, %v2906_v17  ;;  %v4921_v16 = vpop.f32.mrb[43].mxu0  ;;  %v6119_v23 = vsel %vm5684_vm14, %v3206_v7, -1e+30 }
 0xea7   : > { %v3242_v36 = vsel %vm1649_vm15, %v6119_v23, -inf }
 0xea8   : > { %3243 = vmax.xlane.f32.xlu0 %v3242_v36  ;;  %v6125_v39 = vsel %vm5684_vm14, %v3207_v31, -1e+30 }
 0xea9   : > { %v3245_v18 = vsel %vm1649_vm15, %v6125_v39, -inf }
 0xeac   : > { %3246 = vmax.xlane.f32.xlu0 %v3245_v18 }
 0xf05   : > { %v3001_v29 = vpop.f32.mrb[48].mxu1 }
 0xf06   : > { %v3210_v32 = vmul.f32 0.35355338, %v3001_v29  ;;  %v2952_v2 = vpop.f32.mrb[44].mxu0  ;;  %v4932_v47 = vpop.f32.mrb[49].mxu1 }
 0xf07   : > { %v3208_v49 = vmul.f32 0.35355338, %v2952_v2  ;;  %v4926_v50 = vpop.f32.mrb[45].mxu0  ;;  %v3004_v40 = vpop.f32.mrb[50].mxu1 }
 0xf08   : > { %v3211_v33 = vmul.f32 0.35355338, %v3004_v40  ;;  %v2955_v51 = vpop.f32.mrb[46].mxu0  ;;  %v4933_v52 = vpop.f32.mrb[51].mxu1  ;;  %v6131_v54 = vsel %vm5684_vm14, %v3210_v32, -1e+30 }
 0xf09   : > { %v3209_v44 = vmul.f32 0.35355338, %v2955_v51  ;;  %v4927_v56 = vpop.f32.mrb[47].mxu0  ;;  %v3254_v61 = vsel %vm1649_vm15, %v6131_v54, -inf  ;;  %v6141_v48 = vsel %vm5684_vm14, %v3208_v49, -1e+30 }
 0xf0a   : > { %3255 = vmax.xlane.f32.xlu1 %v3254_v61  ;;  %v6137_v3 = vsel %vm5684_vm14, %v3211_v33, -1e+30  ;;  %v3248_v12 = vsel %vm1649_vm15, %v6141_v48, -inf }
 0xf0b   : > { %v3257_v37 = vsel %vm1649_vm15, %v6137_v3, -inf  ;;  %v6147_v4 = vsel %vm5684_vm14, %v3209_v44, -1e+30 }
 0xf0c   : > { %3258 = vmax.xlane.f32.xlu0 %v3257_v37  ;;  %v3251_v30 = vsel %vm1649_vm15, %v6147_v4, -inf }
 0xf0e   : > { %v3050_v5 = vpop.f32.mrb[48].mxu0  ;;  %3249 = vmax.xlane.f32.xlu1 %v3248_v12 }
 0xf0f   : > { %v3099_v38 = vpop.f32.mrb[52].mxu1  ;;  %v4938_v6 = vpop.f32.mrb[49].mxu0  ;;  %v3212_v41 = vmul.f32 0.35355338, %v3050_v5 }
 0xf10   : > { %v3214_v63 = vmul.f32 0.35355338, %v3099_v38  ;;  %v4944_v10 = vpop.f32.mrb[53].mxu1  ;;  %v3053_v42 = vpop.f32.mrb[50].mxu0  ;;  %3252 = vmax.xlane.f32.xlu0 %v3251_v30 }
 0xf11   : > { %v3213_v8 = vmul.f32 0.35355338, %v3053_v42  ;;  %v3102_v9 = vpop.f32.mrb[54].mxu1  ;;  %v4939_v53 = vpop.f32.mrb[51].mxu0  ;;  %v6161_v19 = vsel %vm5684_vm14, %v3212_v41, -1e+30 }
 0xf12   : > { %v6155_v58 = vsel %vm5684_vm14, %v3214_v63, -1e+30  ;;  %v3215_v13 = vmul.f32 0.35355338, %v3102_v9  ;;  %v4945_v14 = vpop.f32.mrb[55].mxu1  ;;  %v3260_v11 = vsel %vm1649_vm15, %v6161_v19, -inf }
 0xf13   : > { %v3266_v59 = vsel %vm1649_vm15, %v6155_v58, -inf  ;;  %v6171_v15 = vsel %vm5684_vm14, %v3213_v8, -1e+30 }
 0xf14   : > { %v6165_v1 = vsel %vm5684_vm14, %v3215_v13, -1e+30  ;;  %3267 = vmax.xlane.f32.xlu1 %v3266_v59  ;;  %v3263_v2 = vsel %vm1649_vm15, %v6171_v15, -inf }
 0xf15   : > { %v3269_v21 = vsel %vm1649_vm15, %v6165_v1, -inf }
 0xf16   : > { %3270 = vmax.xlane.f32.xlu0 %v3269_v21  ;;  %v3148_v25 = vpop.f32.mrb[52].mxu0 }
 0xf17   : > { %v3197_v27 = vpop.f32.mrb[56].mxu1  ;;  %v4950_v7 = vpop.f32.mrb[53].mxu0  ;;  %v3216_v17 = vmul.f32 0.35355338, %v3148_v25 }
 0xf18   : > { %v3218_v31 = vmul.f32 0.35355338, %v3197_v27  ;;  %3261 = vmax.xlane.f32.xlu1 %v3260_v11  ;;  %v4956_v16 = vpop.f32.mrb[57].mxu1  ;;  %v3151_v36 = vpop.f32.mrb[54].mxu0 }
 0xf19   : > { %v3217_v18 = vmul.f32 0.35355338, %v3151_v36  ;;  %v3200_v29 = vpop.f32.mrb[58].mxu1  ;;  %v4951_v32 = vpop.f32.mrb[55].mxu0  ;;  %v6185_v33 = vsel %vm5684_vm14, %v3216_v17, -1e+30 }
 0xf1a   : > { %v6179_v47 = vsel %vm5684_vm14, %v3218_v31, -1e+30  ;;  %v3219_v49 = vmul.f32 0.35355338, %v3200_v29  ;;  %3264 = vmax.xlane.f32.xlu0 %v3263_v2  ;;  %v4957_v50 = vpop.f32.mrb[59].mxu1  ;;  %v3272_v56 = vsel %vm1649_vm15, %v6185_v33, -inf }
 0xf1b   : > { %v3278_v40 = vsel %vm1649_vm15, %v6179_v47, -inf  ;;  %v6195_v44 = vsel %vm5684_vm14, %v3217_v18, -1e+30 }
 0xf1c   : > { %v6189_v51 = vsel %vm5684_vm14, %v3219_v49, -1e+30  ;;  %3279 = vmax.xlane.f32.xlu1 %v3278_v40  ;;  %v3275_v61 = vsel %vm1649_vm15, %v6195_v44, -inf }
 0xf1d   : > { %v3281_v52 = vsel %vm1649_vm15, %v6189_v51, -inf }
 0xf1e   : > { %3282 = vmax.xlane.f32.xlu0 %v3281_v52 }
 0xf20   : > { %3273 = vmax.xlane.f32.xlu1 %v3272_v56 }
 0xf22   : > { %3276 = vmax.xlane.f32.xlu0 %v3275_v61 }
 0xf2c   : > { %v3238_v57 = vpop.xlane.xlu0 %3237 }
 0xf2e   : > { %v3241_v12 = vpop.xlane.xlu1 %3240 }
 0xf2f   : > { %v3285_v5 = vsub.f32 %v6113_v24, %v3241_v12 }
 0xf31   : > { %3514 = vrot.lane.b32.xlu1 %v6036_v26, %s5333_s8  ;;  %v3284_v26 = vsub.f32 %v6107_v22, %v3238_v57  ;;  %v3302_v6 = vmul.f32 1.442695, %v3285_v5 }
 0xf33   : > { %v3300_v30 = vmul.f32 1.442695, %v3284_v26  ;;  %5235 = vpow2.f32 %v3302_v6 }
 0xf35   : > { %3561 = vrot.lane.b32.xlu1 %v6032_v62, %s5333_s8  ;;  %v3244_v37 = vpop.xlane.xlu0 %3243  ;;  %5237 = vpow2.f32 %v3300_v30 }
 0xf38   : > { %3467 = vrot.lane.b32.xlu0 %v6018_v60, %s5333_s8  ;;  %v3286_v60 = vsub.f32 %v6119_v23, %v3244_v37 }
 0xf39   : > { %3655 = vrot.lane.b32.xlu1 %v6047_v34, %s5333_s8  ;;  %v3247_v38 = vpop.xlane.xlu0 %3246 }
 0xf3a   : > { %v3287_v62 = vsub.f32 %v6125_v39, %v3247_v38  ;;  %v3304_v34 = vmul.f32 1.442695, %v3286_v60 }
 0xf3c   : > { %3608 = vrot.lane.b32.xlu0 %v6042_v46, %s5333_s8  ;;  %v3306_v41 = vmul.f32 1.442695, %v3287_v62 }
 0xf3d   : > { %v6215_v46 = vpop.eup %5235 }
 0xf3e   : > { %5239 = vpow2.f32 %v3306_v41  ;;  %v3335_v24 = vsel %vm1649_vm15, %v6215_v46, 0.0 }
 0xf3f   : > { %5241 = vpow2.f32 %v3304_v34  ;;  %v6217_v63 = vpop.eup %5237 }
 0xf40   : > { %v3332_v39 = vsel %vm1649_vm15, %v6217_v63, 0.0 }
 0xf48   : > { %v6221_v22 = vpop.eup %5239 }
 0xf49   : > { %v6225_v23 = vpop.eup %5241  ;;  %v3341_v10 = vsel %vm1649_vm15, %v6221_v22, 0.0 }
 0xf4a   : > { %v3338_v42 = vsel %vm1649_vm15, %v6225_v23, 0.0 }
 0xf5b   : > { %3336 = vadd.xlane.f32.xlu0 %v3335_v24 }
 0xf5d   : > { %3333 = vadd.xlane.f32.xlu1 %v3332_v39 }
 0xf5f   : > { %3342 = vadd.xlane.f32.xlu0 %v3341_v10 }
 0xf61   : > { %3339 = vadd.xlane.f32.xlu1 %v3338_v42 }
 0xf97   : > { %v3256_v8 = vpop.xlane.xlu1 %3255 }
 0xf98   : > { %v3290_v9 = vsub.f32 %v6131_v54, %v3256_v8 }
 0xf99   : > { %v3259_v53 = vpop.xlane.xlu0 %3258 }
 0xf9a   : > { %v3312_v13 = vmul.f32 1.442695, %v3290_v9  ;;  %v3291_v14 = vsub.f32 %v6137_v3, %v3259_v53 }
 0xf9b   : > { %v3250_v59 = vpop.xlane.xlu1 %3249 }
 0xf9c   : > { %5243 = vpow2.f32 %v3312_v13  ;;  %v3314_v21 = vmul.f32 1.442695, %v3291_v14  ;;  %v3288_v25 = vsub.f32 %v6141_v48, %v3250_v59 }
 0xf9d   : > { %v3253_v27 = vpop.xlane.xlu0 %3252 }
 0xf9e   : > { %5245 = vpow2.f32 %v3314_v21  ;;  %v3308_v7 = vmul.f32 1.442695, %v3288_v25  ;;  %v3289_v11 = vsub.f32 %v6147_v4, %v3253_v27 }
 0xfa0   : > { %5247 = vpow2.f32 %v3308_v7  ;;  %v3310_v17 = vmul.f32 1.442695, %v3289_v11 }
 0xfa1   : > { %v3268_v31 = vpop.xlane.xlu1 %3267 }
 0xfa2   : > { %5249 = vpow2.f32 %v3310_v17  ;;  %v3294_v54 = vsub.f32 %v6155_v58, %v3268_v31 }
 0xfa3   : > { %v3271_v16 = vpop.xlane.xlu0 %3270 }
 0xfa4   : > { %v3320_v36 = vmul.f32 1.442695, %v3294_v54  ;;  %v3295_v3 = vsub.f32 %v6165_v1, %v3271_v16 }
 0xfa5   : > { %v3262_v18 = vpop.xlane.xlu1 %3261 }
 0xfa6   : > { %v6237_v29 = vpop.eup %5243  ;;  %5251 = vpow2.f32 %v3320_v36  ;;  %v3322_v48 = vmul.f32 1.442695, %v3295_v3  ;;  %v3292_v32 = vsub.f32 %v6161_v19, %v3262_v18 }
 0xfa7   : > { %v3265_v2 = vpop.xlane.xlu0 %3264  ;;  %v3350_v4 = vsel %vm1649_vm15, %v6237_v29, 0.0 }
 0xfa8   : > { %v6242_v49 = vpop.eup %5245  ;;  %5253 = vpow2.f32 %v3322_v48  ;;  %v3316_v50 = vmul.f32 1.442695, %v3292_v32  ;;  %v3293_v58 = vsub.f32 %v6171_v15, %v3265_v2  ;;  %3351 = vadd.xlane.f32.xlu1 %v3350_v4 }
 0xfa9   : > { %v3280_v40 = vpop.xlane.xlu1 %3279  ;;  %v3353_v1 = vsel %vm1649_vm15, %v6242_v49, 0.0 }
 0xfaa   : > { %v6247_v52 = vpop.eup %5247  ;;  %5255 = vpow2.f32 %v3316_v50  ;;  %v3318_v56 = vmul.f32 1.442695, %v3293_v58  ;;  %v3298_v19 = vsub.f32 %v6179_v47, %v3280_v40  ;;  %3354 = vadd.xlane.f32.xlu0 %v3353_v1 }
 0xfab   : > { %v3283_v61 = vpop.xlane.xlu0 %3282  ;;  %v3344_v57 = vsel %vm1649_vm15, %v6247_v52, 0.0 }
 0xfac   : > { %v6252_v37 = vpop.eup %5249  ;;  %5257 = vpow2.f32 %v3318_v56  ;;  %v3328_v15 = vmul.f32 1.442695, %v3298_v19  ;;  %v3299_v12 = vsub.f32 %v6189_v51, %v3283_v61  ;;  %3345 = vadd.xlane.f32.xlu1 %v3344_v57 }
 0xfad   : > { %v3274_v5 = vpop.xlane.xlu1 %3273  ;;  %v3347_v38 = vsel %vm1649_vm15, %v6252_v37, 0.0 }
 0xfae   : > { %5259 = vpow2.f32 %v3328_v15  ;;  %v3330_v26 = vmul.f32 1.442695, %v3299_v12  ;;  %v3296_v47 = vsub.f32 %v6185_v33, %v3274_v5  ;;  %3348 = vadd.xlane.f32.xlu0 %v3347_v38 }
 0xfaf   : > { %v3277_v6 = vpop.xlane.xlu0 %3276 }
 0xfb0   : > { %v6258_v62 = vpop.eup %5251  ;;  %5261 = vpow2.f32 %v3330_v26  ;;  %v3324_v30 = vmul.f32 1.442695, %v3296_v47  ;;  %v3297_v60 = vsub.f32 %v6195_v44, %v3277_v6 }
 0xfb1   : > { %v3362_v51 = vsel %vm1649_vm15, %v6258_v62, 0.0  ;;  %v3515_v27 = vpop.permute.xlu1 %3514 }
 0xfb2   : > { %v6263_v41 = vpop.eup %5253  ;;  %5263 = vpow2.f32 %v3324_v30  ;;  %v3326_v34 = vmul.f32 1.442695, %v3297_v60  ;;  %3363 = vadd.xlane.f32.xlu1 %v3362_v51 }
 0xfb3   : > { %v3468_v24 = vpop.permute.xlu0 %3467  ;;  %v3365_v33 = vsel %vm1649_vm15, %v6263_v41, 0.0 }
 0xfb4   : > { %v6267_v39 = vpop.eup %5255  ;;  %5265 = vpow2.f32 %v3326_v34  ;;  %4965 = vmatpush3.bf16.msra.mxu1 %v3468_v24  ;;  %3366 = vadd.xlane.f32.xlu0 %v3365_v33 }
 0xfb5   : > { %v3356_v44 = vsel %vm1649_vm15, %v6267_v39, 0.0  ;;  %4976 = vmatprep.subr.bf16.mxu1 %v5323_v0  ;;  %v3562_v7 = vpop.permute.xlu1 %3561 }
 0xfb6   : > { %v6272_v10 = vpop.eup %5257  ;;  %3357 = vadd.xlane.f32.xlu1 %v3356_v44 }
 0xfb7   : > { %v3359_v42 = vsel %vm1649_vm15, %v6272_v10, 0.0  ;;  %v6296_v11 = vpop.permute.xlu0 %3608 }
 0xfb8   : > { %v6276_v8 = vpop.eup %5259  ;;  %3360 = vadd.xlane.f32.xlu0 %v3359_v42 }
 0xfb9   : > { %v3374_v9 = vsel %vm1649_vm15, %v6276_v8, 0.0  ;;  %v3656_v17 = vpop.permute.xlu1 %3655 }
 0xfba   : > { %v6280_v53 = vpop.eup %5261  ;;  %3375 = vadd.xlane.f32.xlu1 %v3374_v9 }
 0xfbb   : > { %v3377_v13 = vsel %vm1649_vm15, %v6280_v53, 0.0 }
 0xfbc   : > { %v6284_v14 = vpop.eup %5263  ;;  %3378 = vadd.xlane.f32.xlu0 %v3377_v13 }
 0xfbd   : > { %v3368_v59 = vsel %vm1649_vm15, %v6284_v14, 0.0 }
 0xfbe   : > { %v6288_v21 = vpop.eup %5265  ;;  %3369 = vadd.xlane.f32.xlu1 %v3368_v59 }
 0xfbf   : > { %v3371_v25 = vsel %vm1649_vm15, %v6288_v21, 0.0 }
 0xfc0   : > { %3372 = vadd.xlane.f32.xlu0 %v3371_v25 }
 0xfcf   : > { %3749 = vrot.lane.b32.xlu1 %v6054_v55, %s5333_s8 }
 0xfd6   : > { %3702 = vrot.lane.b32.xlu0 %v6040_v35, %s5333_s8 }
 0xfe8   : > { %v3337_v31 = vpop.xlane.xlu0 %3336 }
 0xfe9   : > { %5267 = vrcp.f32 %v3337_v31 }
 0xfea   : > { %v3334_v54 = vpop.xlane.xlu1 %3333 }
 0xfeb   : > { %5269 = vrcp.f32 %v3334_v54 }
 0xfec   : > { %v3343_v16 = vpop.xlane.xlu0 %3342 }
 0xfed   : > { %5271 = vrcp.f32 %v3343_v16 }
 0xfee   : > { %v3340_v36 = vpop.xlane.xlu1 %3339 }
 0xfef   : > { %5273 = vrcp.f32 %v3340_v36 }
 0xff3   : > { %v5268_v3 = vpop.eup %5267 }
 0xff4   : > { %v3397_v55 = vmul.f32 %v5268_v3, %v6215_v46 }
 0xff5   : > { %v5270_v18 = vpop.eup %5269 }
 0xff6   : > { %v3396_v48 = vmul.f32 %v5270_v18, %v6217_v63 }
 0xff7   : > { %v5272_v35 = vpop.eup %5271 }
 0xff8   : > { %v3412_v32 = vpack.c.bf16 %v3397_v55, %v3396_v48  ;;  %v3399_v4 = vmul.f32 %v5272_v35, %v6221_v22 }
 0xff9   : > { %v5274_v2 = vpop.eup %5273 }
 0xffa   : > { %v3398_v50 = vmul.f32 %v5274_v2, %v6225_v23  ;;  %4961 = vmatmul.mubr.msk.bf16.vlgmr.msra.gmra.mrb[56].mxu0 %vm1649_vm15, %v3412_v32 }
 0xffb   : > { %4971 = vmatpush3.bf16.msra.mxu0 %v3515_v27  ;;  %4972 = vmatprep.mubr.msk.bf16.mxu0 %vm5330_vm12, %v5323_v0 }
 0xffc   : > { %v3413_v58 = vpack.c.bf16 %v3399_v4, %v3398_v50  ;;  %4982 = vmatprep.subr.bf16.mxu0 %v5323_v0 }
 0xffe   : > { %4967 = vmatmul.mubr.msk.bf16.vlgmr.msra.gmra.mrb[60].mxu1 %vm1649_vm15, %v3413_v58 }
 0xfff   : > { %4977 = vmatpush3.bf16.msra.mxu1 %v3562_v7  ;;  %4978 = vmatprep.mubr.msk.bf16.mxu1 %vm5330_vm12, %v5323_v0 }
0x1000   : > { %4988 = vmatprep.subr.bf16.mxu1 %v5323_v0 }
0x1035   : > { %v3352_v46 = vpop.xlane.xlu1 %3351 }
0x1036   : > { %5275 = vrcp.f32 %v3352_v46 }
0x1037   : > { %v3355_v63 = vpop.xlane.xlu0 %3354 }
0x1038   : > { %5277 = vrcp.f32 %v3355_v63 }
0x1039   : > { %v3346_v22 = vpop.xlane.xlu1 %3345 }
0x103a   : > { %5279 = vrcp.f32 %v3346_v22 }
0x103b   : > { %v3349_v23 = vpop.xlane.xlu0 %3348 }
0x103c   : > { %5281 = vrcp.f32 %v3349_v23 }
0x103f   : > { %v3364_v40 = vpop.xlane.xlu1 %3363 }
0x1040   : > { %v5276_v1 = vpop.eup %5275  ;;  %5283 = vrcp.f32 %v3364_v40  ;;  %v5143_v40 = vld [vmem:[%s6478_s22 + $0x10] sm:$0xff]  }
0x1041   : > { %v3367_v56 = vpop.xlane.xlu0 %3366  ;;  %v3402_v61 = vmul.f32 %v5276_v1, %v6237_v29 }
0x1042   : > { %v5278_v19 = vpop.eup %5277  ;;  %5285 = vrcp.f32 %v3367_v56 }
0x1043   : > { %v3403_v57 = vmul.f32 %v5278_v19, %v6242_v49  ;;  %v3358_v15 = vpop.xlane.xlu1 %3357 }
0x1044   : > { %v5280_v12 = vpop.eup %5279  ;;  %5287 = vrcp.f32 %v3358_v15 }
0x1045   : > { %v3361_v5 = vpop.xlane.xlu0 %3360  ;;  %v3415_v38 = vpack.c.bf16 %v3403_v57, %v3402_v61  ;;  %v3400_v47 = vmul.f32 %v5280_v12, %v6247_v52  ;;  %v5144_v57 = vld [vmem:[%s6478_s22 + $0x18] sm:$0xff]  }
0x1046   : > { %v5282_v26 = vpop.eup %5281  ;;  %5289 = vrcp.f32 %v3361_v5 }
0x1047   : > { %v3401_v6 = vmul.f32 %v5282_v26, %v6252_v37  ;;  %v3376_v30 = vpop.xlane.xlu1 %3375  ;;  %4979 = vmatmul.mubr.msk.bf16.vlgmr.msra.gmra.mrb[64].mxu1 %vm1649_vm15, %v3415_v38 }
0x1048   : > { %5291 = vrcp.f32 %v3376_v30  ;;  %4989 = vmatpush3.bf16.msra.mxu1 %v3656_v17  ;;  %4990 = vmatprep.mubr.msk.bf16.mxu1 %vm5330_vm12, %v5323_v0 }
0x1049   : > { %v3379_v29 = vpop.xlane.xlu0 %3378  ;;  %v3414_v49 = vpack.c.bf16 %v3401_v6, %v3400_v47  ;;  %5000 = vmatprep.subr.bf16.mxu1 %v5323_v0 }
0x104a   : > { %v5284_v60 = vpop.eup %5283  ;;  %5293 = vrcp.f32 %v3379_v29 }
0x104b   : > { %v3370_v51 = vpop.xlane.xlu1 %3369  ;;  %4973 = vmatmul.mubr.msk.bf16.vlgmr.msra.gmra.mrb[60].mxu0 %vm1649_vm15, %v3414_v49  ;;  %v3406_v37 = vmul.f32 %v5284_v60, %v6258_v62 }
0x104c   : > { %v5286_v52 = vpop.eup %5285  ;;  %5295 = vrcp.f32 %v3370_v51  ;;  %4983 = vmatpush3.bf16.msra.mxu0 %v6296_v11  ;;  %4984 = vmatprep.mubr.msk.bf16.mxu0 %vm5330_vm12, %v5323_v0 }
0x104d   : > { %v3407_v34 = vmul.f32 %v5286_v52, %v6263_v41  ;;  %v3373_v24 = vpop.xlane.xlu0 %3372  ;;  %4994 = vmatprep.subr.bf16.mxu0 %v5323_v0 }
0x104e   : > { %v5288_v33 = vpop.eup %5287  ;;  %5297 = vrcp.f32 %v3373_v24 }
0x104f   : > { %v3750_v44 = vpop.permute.xlu1 %3749  ;;  %v3417_v42 = vpack.c.bf16 %v3407_v34, %v3406_v37  ;;  %v3404_v13 = vmul.f32 %v5288_v33, %v6267_v39 }
0x1050   : > { %v5290_v9 = vpop.eup %5289 }
0x1051   : > { %v3405_v59 = vmul.f32 %v5290_v9, %v6272_v10  ;;  %4991 = vmatmul.mubr.msk.bf16.vlgmr.msra.gmra.mrb[68].mxu1 %vm1649_vm15, %v3417_v42  ;;  %v3703_v11 = vpop.permute.xlu0 %3702 }
0x1052   : > { %v5292_v25 = vpop.eup %5291  ;;  %5001 = vmatpush3.bf16.msra.mxu1 %v3750_v44  ;;  %5002 = vmatprep.mubr.msk.bf16.mxu1 %vm5330_vm12, %v5323_v0 }
0x1053   : > { %v3416_v62 = vpack.c.bf16 %v3405_v59, %v3404_v13  ;;  %v3410_v27 = vmul.f32 %v5292_v25, %v6276_v8 }
0x1054   : > { %v5294_v41 = vpop.eup %5293 }
0x1055   : > { %v3411_v7 = vmul.f32 %v5294_v41, %v6280_v53  ;;  %4985 = vmatmul.mubr.msk.bf16.vlgmr.msra.gmra.mrb[64].mxu0 %vm1649_vm15, %v3416_v62 }
0x1056   : > { %v5296_v17 = vpop.eup %5295  ;;  %4995 = vmatpush3.bf16.msra.mxu0 %v3703_v11  ;;  %4996 = vmatprep.mubr.msk.bf16.mxu0 %vm5330_vm12, %v5323_v0 }
0x1057   : > { %v3419_v39 = vpack.c.bf16 %v3411_v7, %v3410_v27  ;;  %v3408_v31 = vmul.f32 %v5296_v17, %v6284_v14  ;;  %5006 = vmatprep.subr.bf16.mxu0 %v5143_v40 }
0x1058   : > { %v5298_v10 = vpop.eup %5297 }
0x1059   : > { %v3409_v54 = vmul.f32 %v5298_v10, %v6288_v21  ;;  %5003 = vmatmul.mubr.msk.bf16.vlgmr.msra.gmra.mrb[72].mxu1 %vm1649_vm15, %v3419_v39 }
0x105b   : > { %v3418_v16 = vpack.c.bf16 %v3409_v54, %v3408_v31 }
0x105d   : > { %4997 = vmatmul.mubr.msk.bf16.vlgmr.msra.gmra.mrb[68].mxu0 %vm1649_vm15, %v3418_v16 }
0x105e   : > { %5007 = vmatpush3.bf16.msra.mxu0 %v5143_v40 }
0x105f   : > { %5008 = vmatprep.subr.bf16.mxu0 %v5144_v57 }
0x1062   : > { %5009 = vmatpush3.bf16.msra.mxu0 %v5144_v57 }
0x10cd   : > { %v6339_v8 = vpop.f32.mrb[56].mxu0 }
0x10ce   : > { %v4962_v53 = vpop.f32.mrb[57].mxu0 }
0x10cf   : > { %v6341_v36 = vpop.f32.mrb[58].mxu0 }
0x10d0   : > { %v4963_v3 = vpop.f32.mrb[59].mxu0 }
0x10d1   : > { %v3507_v18 = vpop.f32.mrb[60].mxu1 }
0x10d2   : > { %v4968_v55 = vpop.f32.mrb[61].mxu1 }
0x10d3   : > { %v3510_v0 = vpop.f32.mrb[62].mxu1 }
0x10d4   : > { %v4969_v48 = vpop.f32.mrb[63].mxu1 }
0x111a   : > { %v3601_v35 = vpop.f32.mrb[64].mxu1 }
0x111b   : > { %v4980_v14 = vpop.f32.mrb[65].mxu1 }
0x111c   : > { %v3604_v32 = vpop.f32.mrb[66].mxu1 }
0x111d   : > { %v5097_v21 = vpack.i.bf16 %v3604_v32, %v3601_v35  ;;  %v4981_v2 = vpop.f32.mrb[67].mxu1 }
0x111e   : > { %v3554_v4 = vpop.f32.mrb[60].mxu0 }
0x111f   : > { %5098 = vrot.lane.b32.xlu1 %v5097_v21, %s5334_s14  ;;  %v4974_v50 = vpop.f32.mrb[61].mxu0 }
0x1120   : > { %v3557_v58 = vpop.f32.mrb[62].mxu0  ;;  %v4582_v50 = vld [vmem:[%s5488_s7 + $0x1] ss:$0 sm:$0xff] }
0x1121   : > { %v5102_v46 = vpack.i.bf16 %v3557_v58, %v3554_v4  ;;  %v4975_v63 = vpop.f32.mrb[63].mxu0 }
0x1123   : > { %5103 = vrot.lane.b32.xlu0 %v5102_v46, %s5334_s14 }
0x1124   : > { %v3695_v22 = vpop.f32.mrb[68].mxu1 }
0x1125   : > { %v4992_v23 = vpop.f32.mrb[69].mxu1 }
0x1126   : > { %v3698_v1 = vpop.f32.mrb[70].mxu1 }
0x1127   : > { %v5107_v56 = vpack.i.bf16 %v3698_v1, %v3695_v22  ;;  %v4993_v19 = vpop.f32.mrb[71].mxu1 }
0x1128   : > { %v3648_v61 = vpop.f32.mrb[64].mxu0 }
0x1129   : > { %5108 = vrot.lane.b32.xlu1 %v5107_v56, %s5335_s3  ;;  %v4986_v15 = vpop.f32.mrb[65].mxu0 }
0x112a   : > { %v3651_v12 = vpop.f32.mrb[66].mxu0 }
0x112b   : > { %v5112_v5 = vpack.i.bf16 %v3651_v12, %v3648_v61  ;;  %v4987_v38 = vpop.f32.mrb[67].mxu0 }
0x112c   : > { %v3789_v26 = vpop.f32.mrb[72].mxu1 }
0x112d   : > { %5113 = vrot.lane.b32.xlu0 %v5112_v5, %s5335_s3  ;;  %v5004_v47 = vpop.f32.mrb[73].mxu1 }
0x112e   : > { %v3792_v6 = vpop.f32.mrb[74].mxu1 }
0x112f   : > { %v5122_v30 = vpack.i.bf16 %v3792_v6, %v3789_v26  ;;  %v5005_v29 = vpop.f32.mrb[75].mxu1 }
0x1130   : > { %v3742_v49 = vpop.f32.mrb[68].mxu0 }
0x1131   : > { %v4998_v60 = vpop.f32.mrb[69].mxu0  ;;  %5123 = vrot.lane.b32.xlu1 %v5122_v30, %s5336_s11 }
0x1132   : > { %v3745_v51 = vpop.f32.mrb[70].mxu0 }
0x1133   : > { %v5117_v52 = vpack.i.bf16 %v3745_v51, %v3742_v49  ;;  %v4999_v37 = vpop.f32.mrb[71].mxu0 }
0x1135   : > { %5118 = vrot.lane.b32.xlu0 %v5117_v52, %s5336_s11 }
0x1191   : > { %v5099_v34 = vpop.permute.xlu1 %5098 }
0x1192   : > { %v5101_v44 = vunpack.i.h.bf16 %v5099_v34  ;;  %v5100_v42 = vunpack.i.l.bf16 %v5099_v34 }
0x1194   : > { %v3847_v25 = vsel %vm1222_vm13, %v3510_v0, %v5101_v44  ;;  %v3846_v62 = vsel %vm1222_vm13, %v3507_v18, %v5100_v42 }
0x1195   : > { %v5104_v24 = vpop.permute.xlu0 %5103 }
0x1196   : > { %v5106_v27 = vunpack.i.h.bf16 %v5104_v24  ;;  %v5105_v7 = vunpack.i.l.bf16 %v5104_v24 }
0x1198   : > { %v3845_v18 = vsel %vm1222_vm13, %v6341_v36, %v5106_v27  ;;  %v3844_v0 = vsel %vm1222_vm13, %v6339_v8, %v5105_v7  ;;  %v5151_v27 = vld [vmem:[%s5504_s2 + $0x60] sm:$0xff]   ;;  %v5152_v7 = vld [vmem:[%s5504_s2 + $0x68] sm:$0xff]  }
0x119b   : > { %v5109_v33 = vpop.permute.xlu1 %5108 }
0x119c   : > { %v5111_v9 = vunpack.i.h.bf16 %v5109_v33  ;;  %v5110_v13 = vunpack.i.l.bf16 %v5109_v33 }
0x119e   : > { %v3850_v39 = vsel %vm1649_vm15, %v3846_v62, %v5110_v13  ;;  %v3851_v10 = vsel %vm1649_vm15, %v3847_v25, %v5111_v9  ;;  %v5145_v9 = vld [vmem:[%s5493_s25 + $0x10] sm:$0xff]   ;;  %v5146_v13 = vld [vmem:[%s5493_s25 + $0x18] sm:$0xff]   ;;  %v5148_v25 = vld [vmem:[%s5504_s2 + $0x48] sm:$0xff]  }
0x119f   : > { %v5114_v59 = vpop.permute.xlu0 %5113  ;;  %5014 = vmatprep.subr.bf16.mxu1 %v5145_v9  ;;  %v5149_v62 = vld [vmem:[%s5504_s2 + $0x50] sm:$0xff]  }
0x11a0   : > { %v5116_v31 = vunpack.i.h.bf16 %v5114_v59  ;;  %v5115_v54 = vunpack.i.l.bf16 %v5114_v59  ;;  %5015 = vmatpush3.bf16.msra.mxu1 %v5145_v9  ;;  %v5147_v59 = vld [vmem:[%s5504_s2 + $0x40] sm:$0xff]  }
0x11a1   : > { %5016 = vmatprep.subr.bf16.mxu1 %v5146_v13  ;;  %5022 = vmatprep.subr.bf16.mxu0 %v5147_v59 }
0x11a2   : > { %v3849_v14 = vsel %vm1649_vm15, %v3845_v18, %v5116_v31  ;;  %v3848_v32 = vsel %vm1649_vm15, %v3844_v0, %v5115_v54 }
0x11a3   : > { %v5124_v41 = vpop.permute.xlu1 %5123 }
0x11a4   : > { %v5126_v11 = vunpack.i.h.bf16 %v5124_v41  ;;  %v5125_v17 = vunpack.i.l.bf16 %v5124_v41  ;;  %5017 = vmatpush3.bf16.msra.mxu1 %v5146_v13  ;;  %v5150_v41 = vld [vmem:[%s5504_s2 + $0x58] sm:$0xff]  }
0x11a6   : > { %v3854_v16 = vsel %vm2266_vm1, %v3850_v39, %v5125_v17  ;;  %v3855_v53 = vsel %vm2266_vm1, %v3851_v10, %v5126_v11 }
0x11a7   : > { %v3857_v3 = vpack.c.bf16 %v3855_v53, %v3854_v16  ;;  %v5119_v55 = vpop.permute.xlu0 %5118 }
0x11a8   : > { %v5121_v48 = vunpack.i.h.bf16 %v5119_v55  ;;  %v5120_v35 = vunpack.i.l.bf16 %v5119_v55 }
0x11aa   : > { %v3852_v21 = vsel %vm2266_vm1, %v3848_v32, %v5120_v35  ;;  %v3853_v2 = vsel %vm2266_vm1, %v3849_v14, %v5121_v48  ;;  %v4589_v35 = vld [vmem:[%s5516_s1 + $0x1] ss:$0 sm:$0xff] }
0x11ab   : > { %v3856_v4 = vpack.c.bf16 %v3853_v2, %v3852_v21 }
0x11ad   : > { %5010 = vmatprep.mubr.msk.bf16.mxu0 %vm839_vm0, %v3856_v4 }
0x11ae   : > { %5011 = vmatmul.mubr.msk.bf16.vlgmr.msra.gmra.mrb[72].mxu0 %vm839_vm0, %v3857_v3 }
0x11af   : > { %5023 = vmatpush3.bf16.msra.mxu0 %v5147_v59 }
0x11b0   : > { %5024 = vmatprep.subr.bf16.mxu0 %v5148_v25 }
0x11b3   : > { %5025 = vmatpush3.bf16.msra.mxu0 %v5148_v25 }
0x11b4   : > { %5026 = vmatprep.subr.bf16.mxu0 %v5149_v62 }
0x11b7   : > { %5027 = vmatpush3.bf16.msra.mxu0 %v5149_v62 }
0x11b8   : > { %5028 = vmatprep.subr.bf16.mxu0 %v5150_v41 }
0x11bb   : > { %5029 = vmatpush3.bf16.msra.mxu0 %v5150_v41 }
0x11bc   : > { %5030 = vmatprep.subr.bf16.mxu0 %v5151_v27 }
0x11bf   : > { %5031 = vmatpush3.bf16.msra.mxu0 %v5151_v27 }
0x11c0   : > { %5032 = vmatprep.subr.bf16.mxu0 %v5152_v7 }
0x11c3   : > { %5033 = vmatpush3.bf16.msra.mxu0 %v5152_v7 }
0x1281   : > { %v5012_v36 = vpop.f32.mrb[72].mxu0 }
0x1282   : > { %v3923_v58 = vpop.f32.mrb[73].mxu0  ;;  %v3932_v46 = vadd.f32 %v5012_v36, %v4582_v50 }
0x1283   : > { %v3924_v8 = vadd.f32 %v4582_v50, %v3923_v58  ;;  %v5013_v63 = vpop.f32.mrb[74].mxu0 }
0x1284   : > { %v3926_v22 = vpop.f32.mrb[75].mxu0  ;;  %v3940_v1 = vadd.f32 %v3932_v46, %v6008_v43  ;;  %v3935_v56 = vadd.f32 %v5013_v63, %v4582_v50 }
0x1285   : > { %v3938_v23 = vadd.f32 %v3924_v8, %v6001_v28  ;;  %v3927_v40 = vadd.f32 %v4582_v50, %v3926_v22  ;;  %v4590_v50 = vld [vmem:[%s5522_s30 + $0x1] ss:$0 sm:$0xff] }
0x1286   : > { %v3941_v15 = vadd.f32 %v3935_v56, %v6010_v45  ;;  %v3952_v12 = vsel %vm839_vm0, %v3940_v1, 0.0 }
0x1287   : > { %v3939_v19 = vadd.f32 %v3927_v40, %v6003_v20  ;;  %v3946_v61 = vsel %vm839_vm0, %v3938_v23, 0.0 }
0x1288   : > { %3947 = vadd.xlane.f32.xlu0 %v3946_v61  ;;  %v3955_v5 = vsel %vm839_vm0, %v3941_v15, 0.0 }
0x1289   : > { %v3949_v57 = vsel %vm839_vm0, %v3939_v19, 0.0 }
0x128a   : > { %3950 = vadd.xlane.f32.xlu1 %v3949_v57  ;;  %v5153_v57 = vld [vmem:[%s5504_s2 + $0x70] sm:$0xff]  }
0x128b   : > { %5034 = vmatprep.subr.bf16.mxu0 %v5153_v57 }
0x128c   : > { %3953 = vadd.xlane.f32.xlu0 %v3952_v12  ;;  %5035 = vmatpush3.bf16.msra.mxu0 %v5153_v57  ;;  %v4596_v12 = vld [vmem:[%s5499_s9 + $0x1] ss:$0 sm:$0xff] }
0x1290   : > { %3956 = vadd.xlane.f32.xlu0 %v3955_v5 }
0x1315   : > { %v3948_v28 = vpop.xlane.xlu0 %3947 }
0x1316   : > { %v3958_v38 = vmul.f32 0.03125, %v3948_v28 }
0x1317   : > { %v3951_v43 = vpop.xlane.xlu1 %3950 }
0x1318   : > { %v6376_v26 = vsub.f32 %v3938_v23, %v3958_v38  ;;  %v3959_v20 = vmul.f32 0.03125, %v3951_v43 }
0x1319   : > { %v3954_v47 = vpop.xlane.xlu0 %3953 }
0x131a   : > { %v3963_v6 = vsub.f32 %v3939_v19, %v3959_v20  ;;  %v3960_v30 = vmul.f32 0.03125, %v3954_v47  ;;  %v3966_v29 = vmul.f32 %v6376_v26, %v6376_v26 }
0x131c   : > { %v6380_v45 = vsub.f32 %v3940_v1, %v3960_v30  ;;  %v3970_v49 = vsel %vm839_vm0, %v3966_v29, 0.0  ;;  %v3967_v60 = vmul.f32 %v3963_v6, %v3963_v6 }
0x131d   : > { %3971 = vadd.xlane.f32.xlu1 %v3970_v49  ;;  %v3957_v51 = vpop.xlane.xlu0 %3956 }
0x131e   : > { %v3961_v52 = vmul.f32 0.03125, %v3957_v51  ;;  %v3973_v37 = vsel %vm839_vm0, %v3967_v60, 0.0  ;;  %v3968_v34 = vmul.f32 %v6380_v45, %v6380_v45 }
0x131f   : > { %3974 = vadd.xlane.f32.xlu0 %v3973_v37 }
0x1320   : > { %v3965_v24 = vsub.f32 %v3941_v15, %v3961_v52  ;;  %v3976_v33 = vsel %vm839_vm0, %v3968_v34, 0.0  ;;  %v5154_v15 = vld [vmem:[%s5504_s2 + $0x78] sm:$0xff]   ;;  %v4618_v52 = vld [vmem:[%s5510_s27 + $0x1] ss:$0 sm:$0xff] }
0x1321   : > { %3977 = vadd.xlane.f32.xlu1 %v3976_v33  ;;  %5036 = vmatprep.subr.bf16.mxu0 %v5154_v15 }
0x1322   : > { %v3969_v44 = vmul.f32 %v3965_v24, %v3965_v24  ;;  %5037 = vmatpush3.bf16.msra.mxu0 %v5154_v15 }
0x1324   : > { %v3979_v42 = vsel %vm839_vm0, %v3969_v44, 0.0 }
0x1325   : > { %3980 = vadd.xlane.f32.xlu0 %v3979_v42 }
0x13aa   : > { %v3972_v11 = vpop.xlane.xlu1 %3971 }
0x13ab   : > { %v3982_v17 = vmul.f32 0.03125, %v3972_v11 }
0x13ac   : > { %v3975_v39 = vpop.xlane.xlu0 %3974 }
0x13ad   : > { %v3986_v10 = vadd.f32 1e-05, %v3982_v17  ;;  %v3983_v31 = vmul.f32 0.03125, %v3975_v39 }
0x13ae   : > { %v3978_v54 = vpop.xlane.xlu1 %3977 }
0x13af   : > { %5299 = vrsqrt.f32 %v3986_v10  ;;  %v3987_v16 = vadd.f32 1e-05, %v3983_v31  ;;  %v3984_v53 = vmul.f32 0.03125, %v3978_v54 }
0x13b1   : > { %5301 = vrsqrt.f32 %v3987_v16  ;;  %v3988_v3 = vadd.f32 1e-05, %v3984_v53 }
0x13b2   : > { %v3981_v55 = vpop.xlane.xlu0 %3980 }
0x13b3   : > { %5303 = vrsqrt.f32 %v3988_v3  ;;  %v3985_v18 = vmul.f32 0.03125, %v3981_v55 }
0x13b5   : > { %v3989_v0 = vadd.f32 1e-05, %v3985_v18 }
0x13b7   : > { %5305 = vrsqrt.f32 %v3989_v0 }
0x13b9   : > { %v5300_v48 = vpop.eup %5299 }
0x13ba   : > { %v3994_v14 = vmul.f32 %v5300_v48, %v6376_v26 }
0x13bb   : > { %v5302_v32 = vpop.eup %5301 }
0x13bc   : > { %v3995_v21 = vmul.f32 %v5302_v32, %v3963_v6  ;;  %v4004_v2 = vmul.f32 %v4589_v35, %v3994_v14 }
0x13bd   : > { %v5304_v4 = vpop.eup %5303 }
0x13be   : > { %v3996_v36 = vmul.f32 %v5304_v4, %v6380_v45  ;;  %v4005_v58 = vmul.f32 %v4589_v35, %v3995_v21  ;;  %v4014_v46 = vadd.f32 %v4590_v50, %v4004_v2  ;;  %v4630_v21 = vld [vmem:[%s5534_s0 + $0x1] ss:$0 sm:$0xff] }
0x13c0   : > { %v4015_v8 = vadd.f32 %v4590_v50, %v4005_v58  ;;  %v4006_v40 = vmul.f32 %v4589_v35, %v3996_v36 }
0x13c1   : > { %v5306_v63 = vpop.eup %5305 }
0x13c2   : > { %v3997_v22 = vmul.f32 %v5306_v63, %v3965_v24  ;;  %v4018_v23 = vpack.c.bf16 %v4015_v8, %v4014_v46  ;;  %v4016_v56 = vadd.f32 %v4590_v50, %v4006_v40 }
0x13c4   : > { %5018 = vmatprep.mubr.msk.bf16.mxu1 %vm839_vm0, %v4018_v23  ;;  %v4007_v1 = vmul.f32 %v4589_v35, %v3997_v22  ;;  %v4629_v35 = vld [vmem:[%s5528_s10 + $0x1] ss:$0 sm:$0xff] }
0x13c6   : > { %v4017_v19 = vadd.f32 %v4590_v50, %v4007_v1 }
0x13c8   : > { %v4019_v61 = vpack.c.bf16 %v4017_v19, %v4016_v56 }
0x13ca   : > { %5019 = vmatmul.mubr.msk.bf16.vlgmr.msra.gmra.mrb[76].mxu1 %vm839_vm0, %v4019_v61 }
0x149d   : > { %v5020_v5 = vpop.f32.mrb[76].mxu1 }
0x149e   : > { %v4094_v28 = vadd.f32 %v5020_v5, %v4596_v12  ;;  %v4085_v38 = vpop.f32.mrb[77].mxu1 }
0x149f   : > { %v4086_v43 = vadd.f32 %v4596_v12, %v4085_v38  ;;  %v5021_v26 = vpop.f32.mrb[78].mxu1 }
0x14a0   : > { %v4097_v20 = vadd.f32 %v5021_v26, %v4596_v12  ;;  %v4088_v47 = vpop.f32.mrb[79].mxu1  ;;  %v4102_v30 = vmax.f32 %v4094_v28, 0.0 }
0x14a1   : > { %v4089_v6 = vadd.f32 %v4596_v12, %v4088_v47  ;;  %v4100_v45 = vmax.f32 %v4086_v43, 0.0 }
0x14a2   : > { %v4103_v29 = vmax.f32 %v4097_v20, 0.0 }
0x14a3   : > { %v4101_v49 = vmax.f32 %v4089_v6, 0.0 }
0x14a4   : > { %v4105_v60 = vpack.c.bf16 %v4103_v29, %v4102_v30 }
0x14a5   : > { %v4104_v51 = vpack.c.bf16 %v4101_v49, %v4100_v45 }
0x14a7   : > { %5038 = vmatprep.mubr.bf16.mxu0 %v4104_v51 }
0x14a8   : > { %5039 = vmatmul.mubr.bf16.vlgmr.msra.gmra.mrb[76].mxu0 %v4105_v60 }
0x157b   : > { %v5040_v37 = vpop.f32.mrb[76].mxu0 }
0x157c   : > { %v4221_v34 = vadd.f32 %v5040_v37, %v4618_v52  ;;  %v4213_v24 = vpop.f32.mrb[77].mxu0 }
0x157d   : > { %v4214_v33 = vadd.f32 %v4618_v52, %v4213_v24  ;;  %v5041_v44 = vpop.f32.mrb[78].mxu0 }
0x157e   : > { %v4227_v42 = vadd.f32 %v4221_v34, %v4016_v56  ;;  %v4216_v9 = vpop.f32.mrb[79].mxu0 }
0x157f   : > { %v4226_v13 = vadd.f32 %v4214_v33, %v4014_v46 }
0x1580   : > { %v4235_v59 = vsel %vm839_vm0, %v4227_v42, 0.0 }
0x1581   : > { %4236 = vadd.xlane.f32.xlu1 %v4235_v59  ;;  %v4232_v25 = vsel %vm839_vm0, %v4226_v13, 0.0 }
0x1582   : > { %4233 = vadd.xlane.f32.xlu0 %v4232_v25 }
0x160e   : > { %v4237_v62 = vpop.xlane.xlu1 %4236 }
0x160f   : > { %v4239_v41 = vmul.f32 0.03125, %v4237_v62  ;;  %v4234_v27 = vpop.xlane.xlu0 %4233 }
0x1610   : > { %v4238_v7 = vmul.f32 0.03125, %v4234_v27 }
0x1611   : > { %v4241_v11 = vsub.f32 %v4227_v42, %v4239_v41 }
0x1612   : > { %v4240_v17 = vsub.f32 %v4226_v13, %v4238_v7 }
0x1613   : > { %v4243_v39 = vmul.f32 %v4241_v11, %v4241_v11 }
0x1614   : > { %v4242_v10 = vmul.f32 %v4240_v17, %v4240_v17 }
0x1615   : > { %v4247_v31 = vsel %vm839_vm0, %v4243_v39, 0.0 }
0x1616   : > { %4248 = vadd.xlane.f32.xlu1 %v4247_v31  ;;  %v4244_v54 = vsel %vm839_vm0, %v4242_v10, 0.0  ;;  %vm4277_vm0 = vcmask 1041409  }
0x1617   : > { %4245 = vadd.xlane.f32.xlu0 %v4244_v54 }
0x16a3   : > { %v4249_v16 = vpop.xlane.xlu1 %4248 }
0x16a4   : > { %v4251_v53 = vmul.f32 0.03125, %v4249_v16  ;;  %v4246_v3 = vpop.xlane.xlu0 %4245 }
0x16a5   : > { %v4250_v55 = vmul.f32 0.03125, %v4246_v3 }
0x16a6   : > { %v4253_v18 = vadd.f32 1e-05, %v4251_v53 }
0x16a7   : > { %v4252_v0 = vadd.f32 1e-05, %v4250_v55 }
0x16a8   : > { %5307 = vrsqrt.f32 %v4253_v18 }
0x16a9   : > { %5309 = vrsqrt.f32 %v4252_v0 }
0x16b2   : > { %v5308_v48 = vpop.eup %5307 }
0x16b3   : > { %v5310_v14 = vpop.eup %5309  ;;  %v4257_v32 = vmul.f32 %v5308_v48, %v4241_v11 }
0x16b4   : > { %v4256_v2 = vmul.f32 %v5310_v14, %v4240_v17 }
0x16b5   : > { %v4265_v4 = vmul.f32 %v4629_v35, %v4257_v32 }
0x16b6   : > { %v4264_v50 = vmul.f32 %v4629_v35, %v4256_v2 }
0x16b7   : > { %v4273_v36 = vadd.f32 %v4630_v21, %v4265_v4 }
0x16b8   : > { %v4272_v58 = vadd.f32 %v4630_v21, %v4264_v50 }
0x16b9   : > { %v4276_v46 = vrot.slane %v4273_v36, 7 }
0x16bb   : > { %v4278_v8 = vsel %vm4277_vm0, %v4276_v46, %v4272_v58 }
0x16bc   : > { %4281 = vst.msk [vmem:[%s6479_s28] sm:$0x3] %vm4280_vm2, %v4278_v8 }
0x16bd PF: > { %s6480_s2 = sld [smem:[#allocation3_spill]] }
0x16c3   : > { %s30_s1 = sadd.s32 1, %s6480_s2  }
0x16c4   : > { %p27_p7 = scmp.ge.s32.totalorder %s30_s1, 4  }
0x16c6   :  { %29 = sbr.rel (!%p27_p7) target bundleno = 14 (0xe), region = 188 }

</bundles_post_ra>
